<compile_context>
chip_gen: v5e
topology: v5e:2x2
jax: 0.10.0
libtpu: 0.0.40
codegen_flags: <defaults>
</compile_context>

<pallas_src>
import numpy as np
import jax
import jax.numpy as jnp
from jax.experimental import pallas as pl
from jax.experimental.pallas import tpu as pltpu

# ----------------------------------------------------------------------------
# Model dims (small test sizes consistent with the module)
# ----------------------------------------------------------------------------
OBS_C, OBS_HW = 4, 16
NUM_FILTERS = 32
FEATURE_DIM = 32
ACTION_DIM = 4
LSTATE_DIM = 6
HIDDEN_DIM = 32
HIDDEN_DEPTH = 2

CONV_STRIDES = (2, 1, 1, 1)
CONV_HW = (16, 7, 5, 3, 1)                      # spatial size before conv1 .. after conv4
_WC = (CONV_HW[0] * OBS_C,                      # flattened (W*C) row width per stage
       CONV_HW[1] * NUM_FILTERS,
       CONV_HW[2] * NUM_FILTERS,
       CONV_HW[3] * NUM_FILTERS,
       CONV_HW[4] * NUM_FILTERS)
_PAD8 = 8                                       # pad tiny K dims (lstate/action) to 8
_PAIR_W = 2 * OBS_HW * OBS_C                    # 128: two obs rows packed along lanes


# ----------------------------------------------------------------------------
# Fused Pallas kernel: one grid step == one batch tile of B_TILE samples
# ----------------------------------------------------------------------------
def _critic_fused_kernel(
        obs_ref,                                 # (8*bt, 128) bf16, pair-packed rows
        gu_ref,                                  # (bt, 16) f32: [goals|0|action|0]
        bw1a_ref, bw1b_ref, bb1_ref,             # conv1 pair-packed banded weights
        bw2_ref, bb2_ref, bw3_ref, bb3_ref,      # conv2/3/4 banded weights + biases
        bw4_ref, bb4_ref,
        hw_ref, hb_ref, lg_ref, lb_ref,          # head Linear + LayerNorm params
        qwf_ref, qwgu_ref, qb0_ref,              # fused dual-Q layer 0 (row-split)
        qw1_ref, qb1_ref, qw2_ref, qb2_ref,      # fused dual-Q layers 1, 2
        out_ref,                                 # (bt, 2): [q1 | q2]
        s1, s2, s3):                             # bf16 VMEM scratch, (H*bt, W*C)
    f32, bf16 = jnp.float32, jnp.bfloat16
    bt = out_ref.shape[0]

    # conv1 (3x3 stride 2) + ReLU.  Each obs row is a pair of input rows packed
    # along lanes (even|odd), so the 3 vertical taps become 2 K=128 MXU dots.
    acc = jnp.dot(obs_ref[0:7 * bt, :], bw1a_ref[...], preferred_element_type=f32)
    acc = acc + jnp.dot(obs_ref[bt:8 * bt, :], bw1b_ref[...],
                        preferred_element_type=f32)
    s1[...] = jnp.maximum(acc + bb1_ref[...], 0.0).astype(bf16)      # (7*bt, 224)

    # conv2 (3x3 stride 1) + ReLU: 3 accumulating banded dots on aligned row blocks.
    acc = jnp.dot(s1[0:5 * bt, :], bw2_ref[0], preferred_element_type=f32)
    for i in (1, 2):
        acc = acc + jnp.dot(s1[i * bt:(i + 5) * bt, :], bw2_ref[i],
                            preferred_element_type=f32)
    s2[...] = jnp.maximum(acc + bb2_ref[...], 0.0).astype(bf16)      # (5*bt, 160)

    # conv3 (3x3 stride 1) + ReLU
    acc = jnp.dot(s2[0:3 * bt, :], bw3_ref[0], preferred_element_type=f32)
    for i in (1, 2):
        acc = acc + jnp.dot(s2[i * bt:(i + 3) * bt, :], bw3_ref[i],
                            preferred_element_type=f32)
    s3[...] = jnp.maximum(acc + bb3_ref[...], 0.0).astype(bf16)      # (3*bt, 96)

    # conv4 (3x3 stride 1) + ReLU -> (bt, 32) == PyTorch flatten of (B, 32, 1, 1)
    acc = jnp.dot(s3[0:bt, :], bw4_ref[0], preferred_element_type=f32)
    for i in (1, 2):
        acc = acc + jnp.dot(s3[i * bt:(i + 1) * bt, :], bw4_ref[i],
                            preferred_element_type=f32)
    h = jnp.maximum(acc + bb4_ref[...], 0.0)

    # encoder head: Linear -> LayerNorm(eps=1e-5) -> tanh   (elementwise in f32)
    y = jnp.dot(h.astype(bf16), hw_ref[...], preferred_element_type=f32) + hb_ref[...]
    mu = jnp.mean(y, axis=-1, keepdims=True)
    var = jnp.mean(jnp.square(y - mu), axis=-1, keepdims=True)
    feat = jnp.tanh((y - mu) * jax.lax.rsqrt(var + 1e-5) * lg_ref[...] + lb_ref[...])

    # concat(feat, state_goals, action) folded into a row-split first Q layer;
    # Q1 and Q2 share every matmul (weights concatenated / block-diagonal).
    h0 = (jnp.dot(feat.astype(bf16), qwf_ref[...], preferred_element_type=f32)
          + jnp.dot(gu_ref[...].astype(bf16), qwgu_ref[...],
                    preferred_element_type=f32)
          + qb0_ref[...])
    h0 = jnp.maximum(h0, 0.0).astype(bf16)                # (bt, 2*HIDDEN) = [Q1 | Q2]
    h1 = jnp.maximum(jnp.dot(h0, qw1_ref[...], preferred_element_type=f32)
                     + qb1_ref[...], 0.0).astype(bf16)
    q12 = jnp.dot(h1, qw2_ref[...], preferred_element_type=f32) + qb2_ref[...]
    out_ref[...] = q12.astype(out_ref.dtype)              # one (bt, 2) store per step


# ----------------------------------------------------------------------------
# Deterministic synthetic parameters (no checkpoint load)
# ----------------------------------------------------------------------------
def _winit(key, shape, fan_in):
    return jax.random.normal(key, shape, jnp.float32) / jnp.sqrt(jnp.float32(fan_in))


def init_params(seed=0):
    key = jax.random.PRNGKey(seed)
    ks = iter(jax.random.split(key, 32))
    p = {"conv_w": [], "conv_b": []}
    cins = [OBS_C, NUM_FILTERS, NUM_FILTERS, NUM_FILTERS]
    for l in range(4):
        p["conv_w"].append(_winit(next(ks), (3, 3, cins[l], NUM_FILTERS), 9 * cins[l]))
        p["conv_b"].append(0.05 * jax.random.normal(next(ks), (NUM_FILTERS,), jnp.float32))
    flat_dim = NUM_FILTERS                      # spatial 16 -> 7 -> 5 -> 3 -> 1
    p["head_w"] = _winit(next(ks), (flat_dim, FEATURE_DIM), flat_dim)
    p["head_b"] = 0.05 * jax.random.normal(next(ks), (FEATURE_DIM,), jnp.float32)
    p["ln_g"] = 1.0 + 0.05 * jax.random.normal(next(ks), (FEATURE_DIM,), jnp.float32)
    p["ln_b"] = 0.05 * jax.random.normal(next(ks), (FEATURE_DIM,), jnp.float32)
    in_dim = FEATURE_DIM + LSTATE_DIM + ACTION_DIM
    dims = [in_dim] + [HIDDEN_DIM] * HIDDEN_DEPTH + [1]
    for qname in ("q1", "q2"):
        ws, bs = [], []
        for l in range(len(dims) - 1):
            ws.append(_winit(next(ks), (dims[l], dims[l + 1]), dims[l]))
            bs.append(0.05 * jax.random.normal(next(ks), (dims[l + 1],), jnp.float32))
        p[qname + "_w"], p[qname + "_b"] = ws, bs
    return p


# ----------------------------------------------------------------------------
# One-time packing of raw params into the fused kernel's layout (weights -> bf16)
# ----------------------------------------------------------------------------
def _banded_conv_weight(w, w_in, w_out, stride):
    """(3,3,Cin,Cout) conv -> 3 banded matrices (W_in*Cin, W_out*Cout), one per
    vertical tap, so a 3x3 conv on an (H, W*C) activation slab becomes 3 matmuls."""
    cin, cout = w.shape[2], w.shape[3]
    out = np.zeros((3, w_in * cin, w_out * cout), np.float32)
    for i in range(3):
        for wo in range(w_out):
            for j in range(3):
                wi = stride * wo + j
                out[i, wi * cin:(wi + 1) * cin, wo * cout:(wo + 1) * cout] = w[i, j]
    return out


def pack_params(p):
    bf16 = jnp.bfloat16
    packed = {}

    # conv1: fold obs/255 into the weights, pair-pack taps 0/1 along K (K=128),
    # tap 2 gets the even-row half of the next pair row (odd half zeroed).
    b1 = _banded_conv_weight(np.asarray(p["conv_w"][0], np.float32),
                             CONV_HW[0], CONV_HW[1], CONV_STRIDES[0]) / 255.0
    packed["bw1a"] = jnp.asarray(np.concatenate([b1[0], b1[1]], axis=0), bf16)
    packed["bw1b"] = jnp.asarray(np.concatenate([b1[2], np.zeros_like(b1[2])], axis=0),
                                 bf16)
    packed["bb1"] = jnp.asarray(
        np.tile(np.asarray(p["conv_b"][0], np.float32), CONV_HW[1])[None, :])

    for l in (1, 2, 3):
        bw = _banded_conv_weight(np.asarray(p["conv_w"][l], np.float32),
                                 CONV_HW[l], CONV_HW[l + 1], CONV_STRIDES[l])
        packed[f"bw{l + 1}"] = jnp.asarray(bw, bf16)
        packed[f"bb{l + 1}"] = jnp.asarray(
            np.tile(np.asarray(p["conv_b"][l], np.float32), CONV_HW[l + 1])[None, :])

    packed["head_w"] = p["head_w"].astype(bf16)
    packed["head_b"] = p["head_b"].reshape(1, -1)
    packed["ln_g"] = p["ln_g"].reshape(1, -1)
    packed["ln_b"] = p["ln_b"].reshape(1, -1)

    # Fused dual-Q: layer0 concatenated along N and split along K (feat vs.
    # [goal|action] with each zero-padded to 8 rows); layers 1-2 block-diagonal.
    H = HIDDEN_DIM
    w0 = np.asarray(jnp.concatenate([p["q1_w"][0], p["q2_w"][0]], axis=1), np.float32)
    packed["q_w0_feat"] = jnp.asarray(w0[:FEATURE_DIM], bf16)
    wgu = np.zeros((2 * _PAD8, 2 * H), np.float32)
    wgu[:LSTATE_DIM] = w0[FEATURE_DIM:FEATURE_DIM + LSTATE_DIM]
    wgu[_PAD8:_PAD8 + ACTION_DIM] = w0[FEATURE_DIM + LSTATE_DIM:]
    packed["q_w0_gu"] = jnp.asarray(wgu, bf16)
    packed["q_b0"] = jnp.concatenate([p["q1_b"][0], p["q2_b"][0]])[None, :]

    w1 = np.zeros((2 * H, 2 * H), np.float32)
    w1[:H, :H] = np.asarray(p["q1_w"][1]); w1[H:, H:] = np.asarray(p["q2_w"][1])
    packed["q_w1"] = jnp.asarray(w1, bf16)
    packed["q_b1"] = jnp.concatenate([p["q1_b"][1], p["q2_b"][1]])[None, :]

    w2 = np.zeros((2 * H, 2), np.float32)
    w2[:H, 0:1] = np.asarray(p["q1_w"][2]); w2[H:, 1:2] = np.asarray(p["q2_w"][2])
    packed["q_w2"] = jnp.asarray(w2, bf16)
    packed["q_b2"] = jnp.concatenate([p["q1_b"][2], p["q2_b"][2]])[None, :]
    return packed


# ----------------------------------------------------------------------------
# Forward pass (mirrors Critic.forward)
# ----------------------------------------------------------------------------
def _const_spec(a):
    nd = a.ndim
    return pl.BlockSpec(a.shape, lambda b, _nd=nd: (0,) * _nd)


def _round_up(x, m):
    return ((x + m - 1) // m) * m


def critic_forward(packed, obs, action, state_goals=None, *, b_tile=128):
    """Returns (q1, q2), each of shape (B, 1)."""
    assert obs.shape[0] == action.shape[0]
    B = obs.shape[0]
    # Batch tile: multiple of 16 (bf16 sublane tile) so every in-kernel row slice is
    # aligned; capped at b_tile to bound VMEM (~5 MiB at 128, fine for v7x's 64 MiB).
    bt = max(16, min(_round_up(b_tile, 16), _round_up(B, 16)))
    nb = pl.cdiv(B, bt)
    b_pad = nb * bt
    hp = OBS_HW // 2                            # 8 pair-rows per image

    # Raw-input glue only: NCHW -> NHWC, pack row pairs (2g, 2g+1) along lanes
    # (128-wide K for conv1), pad the batch, and lay each block out as
    # (pair-row-major, batch-minor) rows so all in-kernel tap slices are contiguous.
    x = jnp.transpose(obs.astype(jnp.bfloat16), (0, 2, 3, 1))       # (B, 16, 16, 4)
    x = x.reshape(B, hp, _PAIR_W)                                   # (B, 8, 128)
    x = jnp.pad(x, ((0, b_pad - B), (0, 0), (0, 0)))
    obs2d = jnp.transpose(x.reshape(nb, bt, hp, _PAIR_W),
                          (0, 2, 1, 3)).reshape(nb * hp * bt, _PAIR_W)

    if state_goals is None:
        # lstate_shape > 0 in this config, so the Q input always has the slot.
        sg = jnp.zeros((B, LSTATE_DIM), jnp.float32)
    else:
        sg = jnp.squeeze(state_goals, 1) if state_goals.ndim > 2 else state_goals
        sg = sg.astype(jnp.float32)
    gu = jnp.concatenate(
        [jnp.pad(sg, ((0, 0), (0, _PAD8 - LSTATE_DIM))),
         jnp.pad(action.astype(jnp.float32), ((0, 0), (0, _PAD8 - ACTION_DIM)))],
        axis=-1)
    gu = jnp.pad(gu, ((0, b_pad - B), (0, 0)))                      # (b_pad, 16)

    inputs = (obs2d, gu,
              packed["bw1a"], packed["bw1b"], packed["bb1"],
              packed["bw2"], packed["bb2"], packed["bw3"], packed["bb3"],
              packed["bw4"], packed["bb4"],
              packed["head_w"], packed["head_b"], packed["ln_g"], packed["ln_b"],
              packed["q_w0_feat"], packed["q_w0_gu"], packed["q_b0"],
              packed["q_w1"], packed["q_b1"], packed["q_w2"], packed["q_b2"])

    in_specs = [pl.BlockSpec((hp * bt, _PAIR_W), lambda b: (b, 0)),
                pl.BlockSpec((bt, 2 * _PAD8), lambda b: (b, 0))]
    in_specs += [_const_spec(a) for a in inputs[2:]]

    q12 = pl.pallas_call(
        _critic_fused_kernel,
        out_shape=jax.ShapeDtypeStruct((b_pad, 2), jnp.float32),
        grid=(nb,),
        in_specs=in_specs,
        out_specs=pl.BlockSpec((bt, 2), lambda b: (b, 0)),
        scratch_shapes=[pltpu.VMEM((CONV_HW[1] * bt, _WC[1]), jnp.bfloat16),
                        pltpu.VMEM((CONV_HW[2] * bt, _WC[2]), jnp.bfloat16),
                        pltpu.VMEM((CONV_HW[3] * bt, _WC[3]), jnp.bfloat16)],
        compiler_params=pltpu.CompilerParams(
            dimension_semantics=("parallel",),       # batch blocks across TCs on v7x
            vmem_limit_bytes=32 * 1024 * 1024),
    )(*inputs)
    return q12[:B, 0:1], q12[:B, 1:2]


# ----------------------------------------------------------------------------
# Pure-JAX reference (for validation only)
# ----------------------------------------------------------------------------
def _reference_forward(params, obs, action, state_goals):
    hi = jax.lax.Precision.HIGHEST
    x = jnp.transpose(obs.astype(jnp.float32) / 255.0, (0, 2, 3, 1))
    for l in range(4):
        x = jax.lax.conv_general_dilated(
            x, params["conv_w"][l], (CONV_STRIDES[l],) * 2, "VALID",
            dimension_numbers=("NHWC", "HWIO", "NHWC"), precision=hi)
        x = jnp.maximum(x + params["conv_b"][l], 0.0)
    h = x.reshape(x.shape[0], -1)
    y = jnp.dot(h, params["head_w"], precision=hi) + params["head_b"]
    mu = y.mean(-1, keepdims=True)
    var = jnp.square(y - mu).mean(-1, keepdims=True)
    feat = jnp.tanh((y - mu) * jax.lax.rsqrt(var + 1e-5) * params["ln_g"] + params["ln_b"])
    sg = jnp.squeeze(state_goals, 1) if state_goals.ndim > feat.ndim else state_goals
    oa = jnp.concatenate([feat, sg, action.astype(jnp.float32)], axis=-1)

    def mlp(z, ws, bs):
        for l in range(len(ws) - 1):
            z = jnp.maximum(jnp.dot(z, ws[l], precision=hi) + bs[l], 0.0)
        return jnp.dot(z, ws[-1], precision=hi) + bs[-1]

    return mlp(oa, params["q1_w"], params["q1_b"]), mlp(oa, params["q2_w"], params["q2_b"])


# ----------------------------------------------------------------------------
if __name__ == "__main__":
    B = 2
    key = jax.random.PRNGKey(0)
    k_obs, k_act, k_goal = jax.random.split(key, 3)
    obs = jax.random.uniform(k_obs, (B, OBS_C, OBS_HW, OBS_HW), jnp.float32) * 255.0
    action = jax.random.normal(k_act, (B, ACTION_DIM), jnp.float32)
    state_goals = jax.random.normal(k_goal, (B, 1, LSTATE_DIM), jnp.float32)  # squeezed

    params = init_params(seed=0)
    packed = pack_params(params)

    fwd = jax.jit(critic_forward, static_argnames=("b_tile",))
    q1, q2 = fwd(packed, obs, action, state_goals)
    jax.block_until_ready((q1, q2))
    assert q1.shape == (B, 1) and q2.shape == (B, 1)

    r1, r2 = _reference_forward(params, obs, action, state_goals)
    np.testing.assert_allclose(np.asarray(q1), np.asarray(r1), rtol=2e-2, atol=2e-2)
    np.testing.assert_allclose(np.asarray(q2), np.asarray(r2), rtol=2e-2, atol=2e-2)
    print("KERNEL_OK")
</pallas_src>

<mosaic_0001>
module attributes {stable_mosaic.version = 11 : i64} {
  func.func @_critic_fused_kernel(%arg0: i32, %arg1: memref<128x128xbf16, #tpu.memory_space<vmem>>, %arg2: memref<16x16xf32, #tpu.memory_space<vmem>>, %arg3: memref<128x224xbf16, #tpu.memory_space<vmem>>, %arg4: memref<128x224xbf16, #tpu.memory_space<vmem>>, %arg5: memref<1x224xf32, #tpu.memory_space<vmem>>, %arg6: memref<3x224x160xbf16, #tpu.memory_space<vmem>>, %arg7: memref<1x160xf32, #tpu.memory_space<vmem>>, %arg8: memref<3x160x96xbf16, #tpu.memory_space<vmem>>, %arg9: memref<1x96xf32, #tpu.memory_space<vmem>>, %arg10: memref<3x96x32xbf16, #tpu.memory_space<vmem>>, %arg11: memref<1x32xf32, #tpu.memory_space<vmem>>, %arg12: memref<32x32xbf16, #tpu.memory_space<vmem>>, %arg13: memref<1x32xf32, #tpu.memory_space<vmem>>, %arg14: memref<1x32xf32, #tpu.memory_space<vmem>>, %arg15: memref<1x32xf32, #tpu.memory_space<vmem>>, %arg16: memref<32x64xbf16, #tpu.memory_space<vmem>>, %arg17: memref<16x64xbf16, #tpu.memory_space<vmem>>, %arg18: memref<1x64xf32, #tpu.memory_space<vmem>>, %arg19: memref<64x64xbf16, #tpu.memory_space<vmem>>, %arg20: memref<1x64xf32, #tpu.memory_space<vmem>>, %arg21: memref<64x2xbf16, #tpu.memory_space<vmem>>, %arg22: memref<1x2xf32, #tpu.memory_space<vmem>>, %arg23: memref<16x2xf32, #tpu.memory_space<vmem>>, %arg24: memref<112x224xbf16, #tpu.memory_space<vmem>>, %arg25: memref<80x160xbf16, #tpu.memory_space<vmem>>, %arg26: memref<48x96xbf16, #tpu.memory_space<vmem>>) attributes {dimension_semantics = [#tpu.dimension_semantics<parallel>], iteration_bounds = array<i64: 1>, scalar_prefetch = 0 : i64, scratch_operands = 3 : i64, tpu.core_type = #tpu.core_type<tc>, window_params = [{transform_indices = @transform_0, window_bounds = array<i64: 128, 128>}, {transform_indices = @transform_1, window_bounds = array<i64: 16, 16>}, {pipeline_mode = #tpu.pipeline_mode<synchronous>, transform_indices = @transform_2, window_bounds = array<i64: 128, 224>}, {pipeline_mode = #tpu.pipeline_mode<synchronous>, transform_indices = @transform_3, window_bounds = array<i64: 128, 224>}, {pipeline_mode = #tpu.pipeline_mode<synchronous>, transform_indices = @transform_4, window_bounds = array<i64: 1, 224>}, {pipeline_mode = #tpu.pipeline_mode<synchronous>, transform_indices = @transform_5, window_bounds = array<i64: 3, 224, 160>}, {pipeline_mode = #tpu.pipeline_mode<synchronous>, transform_indices = @transform_6, window_bounds = array<i64: 1, 160>}, {pipeline_mode = #tpu.pipeline_mode<synchronous>, transform_indices = @transform_7, window_bounds = array<i64: 3, 160, 96>}, {pipeline_mode = #tpu.pipeline_mode<synchronous>, transform_indices = @transform_8, window_bounds = array<i64: 1, 96>}, {pipeline_mode = #tpu.pipeline_mode<synchronous>, transform_indices = @transform_9, window_bounds = array<i64: 3, 96, 32>}, {pipeline_mode = #tpu.pipeline_mode<synchronous>, transform_indices = @transform_10, window_bounds = array<i64: 1, 32>}, {pipeline_mode = #tpu.pipeline_mode<synchronous>, transform_indices = @transform_11, window_bounds = array<i64: 32, 32>}, {pipeline_mode = #tpu.pipeline_mode<synchronous>, transform_indices = @transform_12, window_bounds = array<i64: 1, 32>}, {pipeline_mode = #tpu.pipeline_mode<synchronous>, transform_indices = @transform_13, window_bounds = array<i64: 1, 32>}, {pipeline_mode = #tpu.pipeline_mode<synchronous>, transform_indices = @transform_14, window_bounds = array<i64: 1, 32>}, {pipeline_mode = #tpu.pipeline_mode<synchronous>, transform_indices = @transform_15, window_bounds = array<i64: 32, 64>}, {pipeline_mode = #tpu.pipeline_mode<synchronous>, transform_indices = @transform_16, window_bounds = array<i64: 16, 64>}, {pipeline_mode = #tpu.pipeline_mode<synchronous>, transform_indices = @transform_17, window_bounds = array<i64: 1, 64>}, {pipeline_mode = #tpu.pipeline_mode<synchronous>, transform_indices = @transform_18, window_bounds = array<i64: 64, 64>}, {pipeline_mode = #tpu.pipeline_mode<synchronous>, transform_indices = @transform_19, window_bounds = array<i64: 1, 64>}, {pipeline_mode = #tpu.pipeline_mode<synchronous>, transform_indices = @transform_20, window_bounds = array<i64: 64, 2>}, {pipeline_mode = #tpu.pipeline_mode<synchronous>, transform_indices = @transform_21, window_bounds = array<i64: 1, 2>}, {transform_indices = @transform_22, window_bounds = array<i64: 16, 2>}]} {
    %c0 = arith.constant 0 : index
    %c0_0 = arith.constant 0 : index
    %0 = vector.load %arg1[%c0, %c0_0] : memref<128x128xbf16, #tpu.memory_space<vmem>>, vector<112x128xbf16>
    %c0_1 = arith.constant 0 : index
    %c0_2 = arith.constant 0 : index
    %1 = vector.load %arg3[%c0_1, %c0_2] : memref<128x224xbf16, #tpu.memory_space<vmem>>, vector<128x224xbf16>
    %cst = arith.constant dense<0.000000e+00> : vector<112x224xf32>
    %2 = tpu.matmul %0, %1, %cst {dimension_numbers = #tpu.dot_dimension_numbers<[1], [0], [0], [1], [0, 0, 1, 1], [], []>} : vector<112x128xbf16>, vector<128x224xbf16>, vector<112x224xf32> -> vector<112x224xf32>
    %c16 = arith.constant 16 : index
    %c0_3 = arith.constant 0 : index
    %3 = vector.load %arg1[%c16, %c0_3] : memref<128x128xbf16, #tpu.memory_space<vmem>>, vector<112x128xbf16>
    %c0_4 = arith.constant 0 : index
    %c0_5 = arith.constant 0 : index
    %4 = vector.load %arg4[%c0_4, %c0_5] : memref<128x224xbf16, #tpu.memory_space<vmem>>, vector<128x224xbf16>
    %cst_6 = arith.constant dense<0.000000e+00> : vector<112x224xf32>
    %5 = tpu.matmul %3, %4, %cst_6 {dimension_numbers = #tpu.dot_dimension_numbers<[1], [0], [0], [1], [0, 0, 1, 1], [], []>} : vector<112x128xbf16>, vector<128x224xbf16>, vector<112x224xf32> -> vector<112x224xf32>
    %6 = arith.addf %2, %5 : vector<112x224xf32>
    %c0_7 = arith.constant 0 : index
    %c0_8 = arith.constant 0 : index
    %7 = vector.load %arg5[%c0_7, %c0_8] : memref<1x224xf32, #tpu.memory_space<vmem>>, vector<1x224xf32>
    %8 = vector.broadcast %7 : vector<1x224xf32> to vector<112x224xf32>
    %9 = arith.addf %6, %8 : vector<112x224xf32>
    %cst_9 = arith.constant 0.000000e+00 : f32
    %10 = vector.broadcast %cst_9 : f32 to vector<112x224xf32>
    %11 = arith.maximumf %9, %10 : vector<112x224xf32>
    %12 = arith.truncf %11 : vector<112x224xf32> to vector<112x224xbf16>
    %c0_10 = arith.constant 0 : index
    %c0_11 = arith.constant 0 : index
    %13 = vector.load %arg24[%c0_10, %c0_11] : memref<112x224xbf16, #tpu.memory_space<vmem>>, vector<112x224xbf16>
    tpu.vector_store %arg24[%c0_10, %c0_11], %12 {strides = array<i32>} : memref<112x224xbf16, #tpu.memory_space<vmem>>, vector<112x224xbf16>,
    %c0_12 = arith.constant 0 : index
    %c0_13 = arith.constant 0 : index
    %14 = vector.load %arg24[%c0_12, %c0_13] : memref<112x224xbf16, #tpu.memory_space<vmem>>, vector<80x224xbf16>
    %c0_14 = arith.constant 0 : index
    %c0_15 = arith.constant 0 : index
    %c0_16 = arith.constant 0 : index
    %15 = vector.load %arg6[%c0_14, %c0_15, %c0_16] : memref<3x224x160xbf16, #tpu.memory_space<vmem>>, vector<1x224x160xbf16>
    %16 = vector.shape_cast %15 : vector<1x224x160xbf16> to vector<224x160xbf16>
    %cst_17 = arith.constant dense<0.000000e+00> : vector<80x160xf32>
    %17 = tpu.matmul %14, %16, %cst_17 {dimension_numbers = #tpu.dot_dimension_numbers<[1], [0], [0], [1], [0, 0, 1, 1], [], []>} : vector<80x224xbf16>, vector<224x160xbf16>, vector<80x160xf32> -> vector<80x160xf32>
    %c16_18 = arith.constant 16 : index
    %c0_19 = arith.constant 0 : index
    %18 = vector.load %arg24[%c16_18, %c0_19] : memref<112x224xbf16, #tpu.memory_space<vmem>>, vector<80x224xbf16>
    %c1 = arith.constant 1 : index
    %c0_20 = arith.constant 0 : index
    %c0_21 = arith.constant 0 : index
    %19 = vector.load %arg6[%c1, %c0_20, %c0_21] : memref<3x224x160xbf16, #tpu.memory_space<vmem>>, vector<1x224x160xbf16>
    %20 = vector.shape_cast %19 : vector<1x224x160xbf16> to vector<224x160xbf16>
    %cst_22 = arith.constant dense<0.000000e+00> : vector<80x160xf32>
    %21 = tpu.matmul %18, %20, %cst_22 {dimension_numbers = #tpu.dot_dimension_numbers<[1], [0], [0], [1], [0, 0, 1, 1], [], []>} : vector<80x224xbf16>, vector<224x160xbf16>, vector<80x160xf32> -> vector<80x160xf32>
    %22 = arith.addf %17, %21 : vector<80x160xf32>
    %c32 = arith.constant 32 : index
    %c0_23 = arith.constant 0 : index
    %23 = vector.load %arg24[%c32, %c0_23] : memref<112x224xbf16, #tpu.memory_space<vmem>>, vector<80x224xbf16>
    %c2 = arith.constant 2 : index
    %c0_24 = arith.constant 0 : index
    %c0_25 = arith.constant 0 : index
    %24 = vector.load %arg6[%c2, %c0_24, %c0_25] : memref<3x224x160xbf16, #tpu.memory_space<vmem>>, vector<1x224x160xbf16>
    %25 = vector.shape_cast %24 : vector<1x224x160xbf16> to vector<224x160xbf16>
    %cst_26 = arith.constant dense<0.000000e+00> : vector<80x160xf32>
    %26 = tpu.matmul %23, %25, %cst_26 {dimension_numbers = #tpu.dot_dimension_numbers<[1], [0], [0], [1], [0, 0, 1, 1], [], []>} : vector<80x224xbf16>, vector<224x160xbf16>, vector<80x160xf32> -> vector<80x160xf32>
    %27 = arith.addf %22, %26 : vector<80x160xf32>
    %c0_27 = arith.constant 0 : index
    %c0_28 = arith.constant 0 : index
    %28 = vector.load %arg7[%c0_27, %c0_28] : memref<1x160xf32, #tpu.memory_space<vmem>>, vector<1x160xf32>
    %29 = vector.broadcast %28 : vector<1x160xf32> to vector<80x160xf32>
    %30 = arith.addf %27, %29 : vector<80x160xf32>
    %cst_29 = arith.constant 0.000000e+00 : f32
    %31 = vector.broadcast %cst_29 : f32 to vector<80x160xf32>
    %32 = arith.maximumf %30, %31 : vector<80x160xf32>
    %33 = arith.truncf %32 : vector<80x160xf32> to vector<80x160xbf16>
    %c0_30 = arith.constant 0 : index
    %c0_31 = arith.constant 0 : index
    %34 = vector.load %arg25[%c0_30, %c0_31] : memref<80x160xbf16, #tpu.memory_space<vmem>>, vector<80x160xbf16>
    tpu.vector_store %arg25[%c0_30, %c0_31], %33 {strides = array<i32>} : memref<80x160xbf16, #tpu.memory_space<vmem>>, vector<80x160xbf16>,
    %c0_32 = arith.constant 0 : index
    %c0_33 = arith.constant 0 : index
    %35 = vector.load %arg25[%c0_32, %c0_33] : memref<80x160xbf16, #tpu.memory_space<vmem>>, vector<48x160xbf16>
    %c0_34 = arith.constant 0 : index
    %c0_35 = arith.constant 0 : index
    %c0_36 = arith.constant 0 : index
    %36 = vector.load %arg8[%c0_34, %c0_35, %c0_36] : memref<3x160x96xbf16, #tpu.memory_space<vmem>>, vector<1x160x96xbf16>
    %37 = vector.shape_cast %36 : vector<1x160x96xbf16> to vector<160x96xbf16>
    %cst_37 = arith.constant dense<0.000000e+00> : vector<48x96xf32>
    %38 = tpu.matmul %35, %37, %cst_37 {dimension_numbers = #tpu.dot_dimension_numbers<[1], [0], [0], [1], [0, 0, 1, 1], [], []>} : vector<48x160xbf16>, vector<160x96xbf16>, vector<48x96xf32> -> vector<48x96xf32>
    %c16_38 = arith.constant 16 : index
    %c0_39 = arith.constant 0 : index
    %39 = vector.load %arg25[%c16_38, %c0_39] : memref<80x160xbf16, #tpu.memory_space<vmem>>, vector<48x160xbf16>
    %c1_40 = arith.constant 1 : index
    %c0_41 = arith.constant 0 : index
    %c0_42 = arith.constant 0 : index
    %40 = vector.load %arg8[%c1_40, %c0_41, %c0_42] : memref<3x160x96xbf16, #tpu.memory_space<vmem>>, vector<1x160x96xbf16>
    %41 = vector.shape_cast %40 : vector<1x160x96xbf16> to vector<160x96xbf16>
    %cst_43 = arith.constant dense<0.000000e+00> : vector<48x96xf32>
    %42 = tpu.matmul %39, %41, %cst_43 {dimension_numbers = #tpu.dot_dimension_numbers<[1], [0], [0], [1], [0, 0, 1, 1], [], []>} : vector<48x160xbf16>, vector<160x96xbf16>, vector<48x96xf32> -> vector<48x96xf32>
    %43 = arith.addf %38, %42 : vector<48x96xf32>
    %c32_44 = arith.constant 32 : index
    %c0_45 = arith.constant 0 : index
    %44 = vector.load %arg25[%c32_44, %c0_45] : memref<80x160xbf16, #tpu.memory_space<vmem>>, vector<48x160xbf16>
    %c2_46 = arith.constant 2 : index
    %c0_47 = arith.constant 0 : index
    %c0_48 = arith.constant 0 : index
    %45 = vector.load %arg8[%c2_46, %c0_47, %c0_48] : memref<3x160x96xbf16, #tpu.memory_space<vmem>>, vector<1x160x96xbf16>
    %46 = vector.shape_cast %45 : vector<1x160x96xbf16> to vector<160x96xbf16>
    %cst_49 = arith.constant dense<0.000000e+00> : vector<48x96xf32>
    %47 = tpu.matmul %44, %46, %cst_49 {dimension_numbers = #tpu.dot_dimension_numbers<[1], [0], [0], [1], [0, 0, 1, 1], [], []>} : vector<48x160xbf16>, vector<160x96xbf16>, vector<48x96xf32> -> vector<48x96xf32>
    %48 = arith.addf %43, %47 : vector<48x96xf32>
    %c0_50 = arith.constant 0 : index
    %c0_51 = arith.constant 0 : index
    %49 = vector.load %arg9[%c0_50, %c0_51] : memref<1x96xf32, #tpu.memory_space<vmem>>, vector<1x96xf32>
    %50 = vector.broadcast %49 : vector<1x96xf32> to vector<48x96xf32>
    %51 = arith.addf %48, %50 : vector<48x96xf32>
    %cst_52 = arith.constant 0.000000e+00 : f32
    %52 = vector.broadcast %cst_52 : f32 to vector<48x96xf32>
    %53 = arith.maximumf %51, %52 : vector<48x96xf32>
    %54 = arith.truncf %53 : vector<48x96xf32> to vector<48x96xbf16>
    %c0_53 = arith.constant 0 : index
    %c0_54 = arith.constant 0 : index
    %55 = vector.load %arg26[%c0_53, %c0_54] : memref<48x96xbf16, #tpu.memory_space<vmem>>, vector<48x96xbf16>
    tpu.vector_store %arg26[%c0_53, %c0_54], %54 {strides = array<i32>} : memref<48x96xbf16, #tpu.memory_space<vmem>>, vector<48x96xbf16>,
    %c0_55 = arith.constant 0 : index
    %c0_56 = arith.constant 0 : index
    %56 = vector.load %arg26[%c0_55, %c0_56] : memref<48x96xbf16, #tpu.memory_space<vmem>>, vector<16x96xbf16>
    %c0_57 = arith.constant 0 : index
    %c0_58 = arith.constant 0 : index
    %c0_59 = arith.constant 0 : index
    %57 = vector.load %arg10[%c0_57, %c0_58, %c0_59] : memref<3x96x32xbf16, #tpu.memory_space<vmem>>, vector<1x96x32xbf16>
    %58 = vector.shape_cast %57 : vector<1x96x32xbf16> to vector<96x32xbf16>
    %cst_60 = arith.constant dense<0.000000e+00> : vector<16x32xf32>
    %59 = tpu.matmul %56, %58, %cst_60 {dimension_numbers = #tpu.dot_dimension_numbers<[1], [0], [0], [1], [0, 0, 1, 1], [], []>} : vector<16x96xbf16>, vector<96x32xbf16>, vector<16x32xf32> -> vector<16x32xf32>
    %c16_61 = arith.constant 16 : index
    %c0_62 = arith.constant 0 : index
    %60 = vector.load %arg26[%c16_61, %c0_62] : memref<48x96xbf16, #tpu.memory_space<vmem>>, vector<16x96xbf16>
    %c1_63 = arith.constant 1 : index
    %c0_64 = arith.constant 0 : index
    %c0_65 = arith.constant 0 : index
    %61 = vector.load %arg10[%c1_63, %c0_64, %c0_65] : memref<3x96x32xbf16, #tpu.memory_space<vmem>>, vector<1x96x32xbf16>
    %62 = vector.shape_cast %61 : vector<1x96x32xbf16> to vector<96x32xbf16>
    %cst_66 = arith.constant dense<0.000000e+00> : vector<16x32xf32>
    %63 = tpu.matmul %60, %62, %cst_66 {dimension_numbers = #tpu.dot_dimension_numbers<[1], [0], [0], [1], [0, 0, 1, 1], [], []>} : vector<16x96xbf16>, vector<96x32xbf16>, vector<16x32xf32> -> vector<16x32xf32>
    %64 = arith.addf %59, %63 : vector<16x32xf32>
    %c32_67 = arith.constant 32 : index
    %c0_68 = arith.constant 0 : index
    %65 = vector.load %arg26[%c32_67, %c0_68] : memref<48x96xbf16, #tpu.memory_space<vmem>>, vector<16x96xbf16>
    %c2_69 = arith.constant 2 : index
    %c0_70 = arith.constant 0 : index
    %c0_71 = arith.constant 0 : index
    %66 = vector.load %arg10[%c2_69, %c0_70, %c0_71] : memref<3x96x32xbf16, #tpu.memory_space<vmem>>, vector<1x96x32xbf16>
    %67 = vector.shape_cast %66 : vector<1x96x32xbf16> to vector<96x32xbf16>
    %cst_72 = arith.constant dense<0.000000e+00> : vector<16x32xf32>
    %68 = tpu.matmul %65, %67, %cst_72 {dimension_numbers = #tpu.dot_dimension_numbers<[1], [0], [0], [1], [0, 0, 1, 1], [], []>} : vector<16x96xbf16>, vector<96x32xbf16>, vector<16x32xf32> -> vector<16x32xf32>
    %69 = arith.addf %64, %68 : vector<16x32xf32>
    %c0_73 = arith.constant 0 : index
    %c0_74 = arith.constant 0 : index
    %70 = vector.load %arg11[%c0_73, %c0_74] : memref<1x32xf32, #tpu.memory_space<vmem>>, vector<1x32xf32>
    %71 = vector.broadcast %70 : vector<1x32xf32> to vector<16x32xf32>
    %72 = arith.addf %69, %71 : vector<16x32xf32>
    %cst_75 = arith.constant 0.000000e+00 : f32
    %73 = vector.broadcast %cst_75 : f32 to vector<16x32xf32>
    %74 = arith.maximumf %72, %73 : vector<16x32xf32>
    %75 = arith.truncf %74 : vector<16x32xf32> to vector<16x32xbf16>
    %c0_76 = arith.constant 0 : index
    %c0_77 = arith.constant 0 : index
    %76 = vector.load %arg12[%c0_76, %c0_77] : memref<32x32xbf16, #tpu.memory_space<vmem>>, vector<32x32xbf16>
    %cst_78 = arith.constant dense<0.000000e+00> : vector<16x32xf32>
    %77 = tpu.matmul %75, %76, %cst_78 {dimension_numbers = #tpu.dot_dimension_numbers<[1], [0], [0], [1], [0, 0, 1, 1], [], []>} : vector<16x32xbf16>, vector<32x32xbf16>, vector<16x32xf32> -> vector<16x32xf32>
    %c0_79 = arith.constant 0 : index
    %c0_80 = arith.constant 0 : index
    %78 = vector.load %arg13[%c0_79, %c0_80] : memref<1x32xf32, #tpu.memory_space<vmem>>, vector<1x32xf32>
    %79 = vector.broadcast %78 : vector<1x32xf32> to vector<16x32xf32>
    %80 = arith.addf %77, %79 : vector<16x32xf32>
    %cst_81 = arith.constant dense<0.000000e+00> : vector<16xf32>
    %81 = vector.multi_reduction <add>, %80, %cst_81 [1] : vector<16x32xf32> to vector<16xf32>
    %82 = vector.shape_cast %81 : vector<16xf32> to vector<16x1xf32>
    %cst_82 = arith.constant 3.200000e+01 : f32
    %83 = vector.broadcast %cst_82 : f32 to vector<16x1xf32>
    %84 = arith.divf %82, %83 : vector<16x1xf32>
    %85 = vector.broadcast %84 : vector<16x1xf32> to vector<16x32xf32>
    %86 = arith.subf %80, %85 : vector<16x32xf32>
    %87 = arith.mulf %86, %86 : vector<16x32xf32>
    %cst_83 = arith.constant dense<0.000000e+00> : vector<16xf32>
    %88 = vector.multi_reduction <add>, %87, %cst_83 [1] : vector<16x32xf32> to vector<16xf32>
    %89 = vector.shape_cast %88 : vector<16xf32> to vector<16x1xf32>
    %cst_84 = arith.constant 3.200000e+01 : f32
    %90 = vector.broadcast %cst_84 : f32 to vector<16x1xf32>
    %91 = arith.divf %89, %90 : vector<16x1xf32>
    %92 = vector.broadcast %84 : vector<16x1xf32> to vector<16x32xf32>
    %93 = arith.subf %80, %92 : vector<16x32xf32>
    %cst_85 = arith.constant 9.99999974E-6 : f32
    %94 = vector.broadcast %cst_85 : f32 to vector<16x1xf32>
    %95 = arith.addf %91, %94 : vector<16x1xf32>
    %96 = math.rsqrt %95 : vector<16x1xf32>
    %97 = vector.broadcast %96 : vector<16x1xf32> to vector<16x32xf32>
    %98 = arith.mulf %93, %97 : vector<16x32xf32>
    %c0_86 = arith.constant 0 : index
    %c0_87 = arith.constant 0 : index
    %99 = vector.load %arg14[%c0_86, %c0_87] : memref<1x32xf32, #tpu.memory_space<vmem>>, vector<1x32xf32>
    %100 = vector.broadcast %99 : vector<1x32xf32> to vector<16x32xf32>
    %101 = arith.mulf %98, %100 : vector<16x32xf32>
    %c0_88 = arith.constant 0 : index
    %c0_89 = arith.constant 0 : index
    %102 = vector.load %arg15[%c0_88, %c0_89] : memref<1x32xf32, #tpu.memory_space<vmem>>, vector<1x32xf32>
    %103 = vector.broadcast %102 : vector<1x32xf32> to vector<16x32xf32>
    %104 = arith.addf %101, %103 : vector<16x32xf32>
    %105 = math.tanh %104 : vector<16x32xf32>
    %106 = arith.truncf %105 : vector<16x32xf32> to vector<16x32xbf16>
    %c0_90 = arith.constant 0 : index
    %c0_91 = arith.constant 0 : index
    %107 = vector.load %arg16[%c0_90, %c0_91] : memref<32x64xbf16, #tpu.memory_space<vmem>>, vector<32x64xbf16>
    %cst_92 = arith.constant dense<0.000000e+00> : vector<16x64xf32>
    %108 = tpu.matmul %106, %107, %cst_92 {dimension_numbers = #tpu.dot_dimension_numbers<[1], [0], [0], [1], [0, 0, 1, 1], [], []>} : vector<16x32xbf16>, vector<32x64xbf16>, vector<16x64xf32> -> vector<16x64xf32>
    %c0_93 = arith.constant 0 : index
    %c0_94 = arith.constant 0 : index
    %109 = vector.load %arg2[%c0_93, %c0_94] : memref<16x16xf32, #tpu.memory_space<vmem>>, vector<16x16xf32>
    %110 = arith.truncf %109 : vector<16x16xf32> to vector<16x16xbf16>
    %c0_95 = arith.constant 0 : index
    %c0_96 = arith.constant 0 : index
    %111 = vector.load %arg17[%c0_95, %c0_96] : memref<16x64xbf16, #tpu.memory_space<vmem>>, vector<16x64xbf16>
    %cst_97 = arith.constant dense<0.000000e+00> : vector<16x64xf32>
    %112 = tpu.matmul %110, %111, %cst_97 {dimension_numbers = #tpu.dot_dimension_numbers<[1], [0], [0], [1], [0, 0, 1, 1], [], []>} : vector<16x16xbf16>, vector<16x64xbf16>, vector<16x64xf32> -> vector<16x64xf32>
    %113 = arith.addf %108, %112 : vector<16x64xf32>
    %c0_98 = arith.constant 0 : index
    %c0_99 = arith.constant 0 : index
    %114 = vector.load %arg18[%c0_98, %c0_99] : memref<1x64xf32, #tpu.memory_space<vmem>>, vector<1x64xf32>
    %115 = vector.broadcast %114 : vector<1x64xf32> to vector<16x64xf32>
    %116 = arith.addf %113, %115 : vector<16x64xf32>
    %cst_100 = arith.constant 0.000000e+00 : f32
    %117 = vector.broadcast %cst_100 : f32 to vector<16x64xf32>
    %118 = arith.maximumf %116, %117 : vector<16x64xf32>
    %119 = arith.truncf %118 : vector<16x64xf32> to vector<16x64xbf16>
    %c0_101 = arith.constant 0 : index
    %c0_102 = arith.constant 0 : index
    %120 = vector.load %arg19[%c0_101, %c0_102] : memref<64x64xbf16, #tpu.memory_space<vmem>>, vector<64x64xbf16>
    %cst_103 = arith.constant dense<0.000000e+00> : vector<16x64xf32>
    %121 = tpu.matmul %119, %120, %cst_103 {dimension_numbers = #tpu.dot_dimension_numbers<[1], [0], [0], [1], [0, 0, 1, 1], [], []>} : vector<16x64xbf16>, vector<64x64xbf16>, vector<16x64xf32> -> vector<16x64xf32>
    %c0_104 = arith.constant 0 : index
    %c0_105 = arith.constant 0 : index
    %122 = vector.load %arg20[%c0_104, %c0_105] : memref<1x64xf32, #tpu.memory_space<vmem>>, vector<1x64xf32>
    %123 = vector.broadcast %122 : vector<1x64xf32> to vector<16x64xf32>
    %124 = arith.addf %121, %123 : vector<16x64xf32>
    %cst_106 = arith.constant 0.000000e+00 : f32
    %125 = vector.broadcast %cst_106 : f32 to vector<16x64xf32>
    %126 = arith.maximumf %124, %125 : vector<16x64xf32>
    %127 = arith.truncf %126 : vector<16x64xf32> to vector<16x64xbf16>
    %c0_107 = arith.constant 0 : index
    %c0_108 = arith.constant 0 : index
    %128 = vector.load %arg21[%c0_107, %c0_108] : memref<64x2xbf16, #tpu.memory_space<vmem>>, vector<64x2xbf16>
    %cst_109 = arith.constant dense<0.000000e+00> : vector<16x2xf32>
    %129 = tpu.matmul %127, %128, %cst_109 {dimension_numbers = #tpu.dot_dimension_numbers<[1], [0], [0], [1], [0, 0, 1, 1], [], []>} : vector<16x64xbf16>, vector<64x2xbf16>, vector<16x2xf32> -> vector<16x2xf32>
    %c0_110 = arith.constant 0 : index
    %c0_111 = arith.constant 0 : index
    %130 = vector.load %arg22[%c0_110, %c0_111] : memref<1x2xf32, #tpu.memory_space<vmem>>, vector<1x2xf32>
    %131 = vector.broadcast %130 : vector<1x2xf32> to vector<16x2xf32>
    %132 = arith.addf %129, %131 : vector<16x2xf32>
    %c0_112 = arith.constant 0 : index
    %c0_113 = arith.constant 0 : index
    %133 = vector.load %arg23[%c0_112, %c0_113] : memref<16x2xf32, #tpu.memory_space<vmem>>, vector<16x2xf32>
    tpu.vector_store %arg23[%c0_112, %c0_113], %132 {strides = array<i32>} : memref<16x2xf32, #tpu.memory_space<vmem>>, vector<16x2xf32>,
    return
  }
  func.func @transform_0(%arg0: i32) -> (i32, i32) {
    %c0_i32 = arith.constant 0 : i32
    %c0_i32_0 = arith.constant 0 : i32
    return %arg0, %c0_i32 : i32, i32
  }
  func.func @transform_1(%arg0: i32) -> (i32, i32) {
    %c0_i32 = arith.constant 0 : i32
    %c0_i32_0 = arith.constant 0 : i32
    return %arg0, %c0_i32 : i32, i32
  }
  func.func @transform_2(%arg0: i32) -> (i32, i32) {
    %c0_i32 = arith.constant 0 : i32
    %c0_i32_0 = arith.constant 0 : i32
    %c0_i32_1 = arith.constant 0 : i32
    return %c0_i32, %c0_i32_0 : i32, i32
  }
  func.func @transform_3(%arg0: i32) -> (i32, i32) {
    %c0_i32 = arith.constant 0 : i32
    %c0_i32_0 = arith.constant 0 : i32
    %c0_i32_1 = arith.constant 0 : i32
    return %c0_i32, %c0_i32_0 : i32, i32
  }
  func.func @transform_4(%arg0: i32) -> (i32, i32) {
    %c0_i32 = arith.constant 0 : i32
    %c0_i32_0 = arith.constant 0 : i32
    %c0_i32_1 = arith.constant 0 : i32
    return %c0_i32, %c0_i32_0 : i32, i32
  }
  func.func @transform_5(%arg0: i32) -> (i32, i32, i32) {
    %c0_i32 = arith.constant 0 : i32
    %c0_i32_0 = arith.constant 0 : i32
    %c0_i32_1 = arith.constant 0 : i32
    %c0_i32_2 = arith.constant 0 : i32
    return %c0_i32, %c0_i32_0, %c0_i32_1 : i32, i32, i32
  }
  func.func @transform_6(%arg0: i32) -> (i32, i32) {
    %c0_i32 = arith.constant 0 : i32
    %c0_i32_0 = arith.constant 0 : i32
    %c0_i32_1 = arith.constant 0 : i32
    return %c0_i32, %c0_i32_0 : i32, i32
  }
  func.func @transform_7(%arg0: i32) -> (i32, i32, i32) {
    %c0_i32 = arith.constant 0 : i32
    %c0_i32_0 = arith.constant 0 : i32
    %c0_i32_1 = arith.constant 0 : i32
    %c0_i32_2 = arith.constant 0 : i32
    return %c0_i32, %c0_i32_0, %c0_i32_1 : i32, i32, i32
  }
  func.func @transform_8(%arg0: i32) -> (i32, i32) {
    %c0_i32 = arith.constant 0 : i32
    %c0_i32_0 = arith.constant 0 : i32
    %c0_i32_1 = arith.constant 0 : i32
    return %c0_i32, %c0_i32_0 : i32, i32
  }
  func.func @transform_9(%arg0: i32) -> (i32, i32, i32) {
    %c0_i32 = arith.constant 0 : i32
    %c0_i32_0 = arith.constant 0 : i32
    %c0_i32_1 = arith.constant 0 : i32
    %c0_i32_2 = arith.constant 0 : i32
    return %c0_i32, %c0_i32_0, %c0_i32_1 : i32, i32, i32
  }
  func.func @transform_10(%arg0: i32) -> (i32, i32) {
    %c0_i32 = arith.constant 0 : i32
    %c0_i32_0 = arith.constant 0 : i32
    %c0_i32_1 = arith.constant 0 : i32
    return %c0_i32, %c0_i32_0 : i32, i32
  }
  func.func @transform_11(%arg0: i32) -> (i32, i32) {
    %c0_i32 = arith.constant 0 : i32
    %c0_i32_0 = arith.constant 0 : i32
    %c0_i32_1 = arith.constant 0 : i32
    return %c0_i32, %c0_i32_0 : i32, i32
  }
  func.func @transform_12(%arg0: i32) -> (i32, i32) {
    %c0_i32 = arith.constant 0 : i32
    %c0_i32_0 = arith.constant 0 : i32
    %c0_i32_1 = arith.constant 0 : i32
    return %c0_i32, %c0_i32_0 : i32, i32
  }
  func.func @transform_13(%arg0: i32) -> (i32, i32) {
    %c0_i32 = arith.constant 0 : i32
    %c0_i32_0 = arith.constant 0 : i32
    %c0_i32_1 = arith.constant 0 : i32
    return %c0_i32, %c0_i32_0 : i32, i32
  }
  func.func @transform_14(%arg0: i32) -> (i32, i32) {
    %c0_i32 = arith.constant 0 : i32
    %c0_i32_0 = arith.constant 0 : i32
    %c0_i32_1 = arith.constant 0 : i32
    return %c0_i32, %c0_i32_0 : i32, i32
  }
  func.func @transform_15(%arg0: i32) -> (i32, i32) {
    %c0_i32 = arith.constant 0 : i32
    %c0_i32_0 = arith.constant 0 : i32
    %c0_i32_1 = arith.constant 0 : i32
    return %c0_i32, %c0_i32_0 : i32, i32
  }
  func.func @transform_16(%arg0: i32) -> (i32, i32) {
    %c0_i32 = arith.constant 0 : i32
    %c0_i32_0 = arith.constant 0 : i32
    %c0_i32_1 = arith.constant 0 : i32
    return %c0_i32, %c0_i32_0 : i32, i32
  }
  func.func @transform_17(%arg0: i32) -> (i32, i32) {
    %c0_i32 = arith.constant 0 : i32
    %c0_i32_0 = arith.constant 0 : i32
    %c0_i32_1 = arith.constant 0 : i32
    return %c0_i32, %c0_i32_0 : i32, i32
  }
  func.func @transform_18(%arg0: i32) -> (i32, i32) {
    %c0_i32 = arith.constant 0 : i32
    %c0_i32_0 = arith.constant 0 : i32
    %c0_i32_1 = arith.constant 0 : i32
    return %c0_i32, %c0_i32_0 : i32, i32
  }
  func.func @transform_19(%arg0: i32) -> (i32, i32) {
    %c0_i32 = arith.constant 0 : i32
    %c0_i32_0 = arith.constant 0 : i32
    %c0_i32_1 = arith.constant 0 : i32
    return %c0_i32, %c0_i32_0 : i32, i32
  }
  func.func @transform_20(%arg0: i32) -> (i32, i32) {
    %c0_i32 = arith.constant 0 : i32
    %c0_i32_0 = arith.constant 0 : i32
    %c0_i32_1 = arith.constant 0 : i32
    return %c0_i32, %c0_i32_0 : i32, i32
  }
  func.func @transform_21(%arg0: i32) -> (i32, i32) {
    %c0_i32 = arith.constant 0 : i32
    %c0_i32_0 = arith.constant 0 : i32
    %c0_i32_1 = arith.constant 0 : i32
    return %c0_i32, %c0_i32_0 : i32, i32
  }
  func.func @transform_22(%arg0: i32) -> (i32, i32) {
    %c0_i32 = arith.constant 0 : i32
    %c0_i32_0 = arith.constant 0 : i32
    return %arg0, %c0_i32 : i32, i32
  }
}

</mosaic_0001>

<bundles_post_ra>
// kernel: critic_forward.1
= control target key start
LH: loop header
LB: loop body
LE: loop exit
PB: predicated region body
PF: predicated region fallthrough
CT: control target
= control target key end

     0   :  { %vm628_vm0 = vcmask 1043456   ;;  %vm629_vm1 = vcmask 785412   ;;  %vm899_vm3 = vcmask 785408   ;;  %vm1790_vm4 = vcmask 261124   ;;  %s5658_s3 = inlined_call_operand.vmem [shape: bf16[128,224], index: 3, kind: input, shape index: {}]   ;;  %s5659_s2 = inlined_call_operand.vmem [shape: bf16[128,224], index: 2, kind: input, shape index: {}]   ;;  %s5660_s0 = inlined_call_operand.vmem [shape: bf16[128,128], index: 0, kind: input, shape index: {}]   ;;  %s5661_s5 = inlined_call_operand.vmem [shape: bf16[3,224,160], index: 5, kind: input, shape index: {}]   ;;  %s5662_s4 = inlined_call_operand.vmem [shape: f32[1,224], index: 4, kind: input, shape index: {}]   ;;  %s5663_s7 = inlined_call_operand.vmem [shape: bf16[3,160,96], index: 7, kind: input, shape index: {}]   ;;  %s5664_s6 = inlined_call_operand.vmem [shape: f32[1,160], index: 6, kind: input, shape index: {}]   ;;  %s5665_s8 = inlined_call_operand.vmem [shape: f32[1,96], index: 8, kind: input, shape index: {}]   ;;  %s5666_s9 = inlined_call_operand.vmem [shape: bf16[3,96,32], index: 9, kind: input, shape index: {}]   ;;  %s5667_s10 = inlined_call_operand.vmem [shape: f32[1,32], index: 10, kind: input, shape index: {}]   ;;  %s5668_s12 = inlined_call_operand.vmem [shape: f32[1,32], index: 12, kind: input, shape index: {}]   ;;  %s5669_s11 = inlined_call_operand.vmem [shape: bf16[32,32], index: 11, kind: input, shape index: {}]   ;;  %s5670_s13 = inlined_call_operand.vmem [shape: f32[1,32], index: 13, kind: input, shape index: {}]   ;;  %s5671_s14 = inlined_call_operand.vmem [shape: f32[1,32], index: 14, kind: input, shape index: {}]   ;;  %s5672_s16 = inlined_call_operand.vmem [shape: bf16[16,64], index: 16, kind: input, shape index: {}]   ;;  %s5673_s15 = inlined_call_operand.vmem [shape: bf16[32,64], index: 15, kind: input, shape index: {}]   ;;  %s5674_s1 = inlined_call_operand.vmem [shape: f32[16,16], index: 1, kind: input, shape index: {}]   ;;  %s5675_s18 = inlined_call_operand.vmem [shape: bf16[64,64], index: 18, kind: input, shape index: {}]   ;;  %s5676_s17 = inlined_call_operand.vmem [shape: f32[1,64], index: 17, kind: input, shape index: {}]   ;;  %s5677_s19 = inlined_call_operand.vmem [shape: f32[1,64], index: 19, kind: input, shape index: {}]   ;;  %s5678_s20 = inlined_call_operand.vmem [shape: bf16[64,2], index: 20, kind: input, shape index: {}]   ;;  %s5679_s21 = inlined_call_operand.vmem [shape: f32[1,2], index: 21, kind: input, shape index: {}]   ;;  %s5680_s22 = inlined_call_operand.vmem [shape: f32[16,2], index: 22, kind: output, shape index: {}]  }
   0x1   :  { %5686 = sst [smem:[#allocation5_spill]] %s5658_s3  ;;  %vm4706_vm2 = vmor %vm629_vm1, %vm628_vm0  ;;  %vm1938_vm6 = vcmask 261120   ;;  %vm2315_vm7 = vcmask 781312   ;;  %vm2669_vm9 = vcmask 130048   ;;  %vm2835_vm1 = vcmask 15360  }
   0x2   :  { %5687 = sst [smem:[#allocation6_spill]] %s5659_s2  ;;  %vm5370_vm5 = vmor %vm1790_vm4, %vm628_vm0  ;;  %vm2761_vm0 = vcmask 523264  }
   0x3   :  { %5688 = sst [smem:[#allocation7_spill]] %s5660_s0 }
   0x4   :  { %5689 = sst [smem:[#allocation8_spill]] %s5661_s5 }
   0x5   :  { %5690 = sst [smem:[#allocation9_spill]] %s5662_s4 }
   0x6   :  { %5691 = sst [smem:[#allocation10_spill]] %s5663_s7 }
   0x7   :  { %5692 = sst [smem:[#allocation11_spill]] %s5664_s6 }
   0x8   :  { %s5693_s29 = sld [smem:[#allocation5_spill]] }
   0x9   :  { %s5694_s25 = sld [smem:[#allocation6_spill]] }
   0xa   :  { %s5695_s27 = sld [smem:[#allocation7_spill]] }
   0xb   :  { %s5696_s7 = sld [smem:[#allocation8_spill]] }
   0xc   :  { %s5697_s2 = sld [smem:[#allocation9_spill]] }
   0xd   :  { %s5700_s26 = sld [smem:[#allocation10_spill]] }
   0xe   :  { %v2928_v0 = vld [vmem:[%s5693_s29 + $0x70] sm:$0xf]  ;;  %v3974_v1 = vld [vmem:[%s5693_s29 + $0x74] sm:$0xf0]  ;;  %v3973_v2 = vld [vmem:[%s5693_s29 + $0x74] sm:$0xf] }
   0xf   :  { %v2929_v3 = vor.u32 %v3974_v1, %v2928_v0  ;;  %v2930_v4 = vld [vmem:[%s5693_s29 + $0x78] sm:$0xf0]  ;;  %v3020_v5 = vld [vmem:[%s5694_s25 + $0x70] sm:$0xf]  ;;  %v3951_v6 = vld [vmem:[%s5694_s25 + $0x74] sm:$0xf0] }
  0x10   :  { %v2933_v7 = vor.u32 %v3973_v2, %v2930_v4  ;;  %v3021_v8 = vor.u32 %v3951_v6, %v3020_v5  ;;  %v3950_v9 = vld [vmem:[%s5694_s25 + $0x74] sm:$0xf]  ;;  %v3022_v10 = vld [vmem:[%s5694_s25 + $0x78] sm:$0xf0]  ;;  %v2920_v11 = vld [vmem:[%s5693_s29 + $0x60] sm:$0xf] }
  0x11   :  { %254 = vmatpush.bf16.msra.mxu0 %v2929_v3  ;;  %v3025_v12 = vor.u32 %v3950_v9, %v3022_v10  ;;  %v3972_v13 = vld [vmem:[%s5693_s29 + $0x64] sm:$0xf0]  ;;  %v3971_v14 = vld [vmem:[%s5693_s29 + $0x64] sm:$0xf]  ;;  %v2922_v15 = vld [vmem:[%s5693_s29 + $0x68] sm:$0xf0] }
  0x12   :  { %298 = vmatpush.bf16.msra.mxu1 %v2933_v7  ;;  %464 = vmatpush.bf16.msra.mxu2 %v3021_v8  ;;  %v2921_v16 = vor.u32 %v3972_v13, %v2920_v11  ;;  %v2925_v17 = vor.u32 %v3971_v14, %v2922_v15  ;;  %v3012_v18 = vld [vmem:[%s5694_s25 + $0x60] sm:$0xf]  ;;  %v3949_v19 = vld [vmem:[%s5694_s25 + $0x64] sm:$0xf0]  ;;  %v3948_v20 = vld [vmem:[%s5694_s25 + $0x64] sm:$0xf] }
  0x13   :  { %508 = vmatpush.bf16.msra.mxu3 %v3025_v12  ;;  %v3013_v21 = vor.u32 %v3949_v19, %v3012_v18  ;;  %v3014_v22 = vld [vmem:[%s5694_s25 + $0x68] sm:$0xf0]  ;;  %v2912_v23 = vld [vmem:[%s5693_s29 + $0x50] sm:$0xf]  ;;  %v3970_v24 = vld [vmem:[%s5693_s29 + $0x54] sm:$0xf0] }
  0x14   :  { %v3017_v25 = vor.u32 %v3948_v20, %v3014_v22  ;;  %v3969_v26 = vld [vmem:[%s5693_s29 + $0x54] sm:$0xf]  ;;  %v2914_v27 = vld [vmem:[%s5693_s29 + $0x58] sm:$0xf0]  ;;  %v3004_v28 = vld [vmem:[%s5694_s25 + $0x50] sm:$0xf]  ;;  %v2913_v29 = vor.u32 %v3970_v24, %v2912_v23 }
  0x15   :  { %255 = vmatpush.bf16.msra.mxu0 %v2921_v16  ;;  %v3947_v30 = vld [vmem:[%s5694_s25 + $0x54] sm:$0xf0]  ;;  %v3946_v31 = vld [vmem:[%s5694_s25 + $0x54] sm:$0xf]  ;;  %v3006_v32 = vld [vmem:[%s5694_s25 + $0x58] sm:$0xf0]  ;;  %v2917_v33 = vor.u32 %v3969_v26, %v2914_v27 }
  0x16   :  { %299 = vmatpush.bf16.msra.mxu1 %v2925_v17  ;;  %465 = vmatpush.bf16.msra.mxu2 %v3013_v21  ;;  %v3005_v34 = vor.u32 %v3947_v30, %v3004_v28  ;;  %v2904_v35 = vld [vmem:[%s5693_s29 + $0x40] sm:$0xf]  ;;  %v3968_v36 = vld [vmem:[%s5693_s29 + $0x44] sm:$0xf0]  ;;  %v3967_v37 = vld [vmem:[%s5693_s29 + $0x44] sm:$0xf]  ;;  %v3009_v38 = vor.u32 %v3946_v31, %v3006_v32 }
  0x17   :  { %509 = vmatpush.bf16.msra.mxu3 %v3017_v25  ;;  %v2906_v39 = vld [vmem:[%s5693_s29 + $0x48] sm:$0xf0]  ;;  %v2996_v40 = vld [vmem:[%s5694_s25 + $0x40] sm:$0xf]  ;;  %v3945_v41 = vld [vmem:[%s5694_s25 + $0x44] sm:$0xf0]  ;;  %v2905_v44 = vor.u32 %v3968_v36, %v2904_v35 }
  0x18   :  { %v3944_v42 = vld [vmem:[%s5694_s25 + $0x44] sm:$0xf]  ;;  %v2998_v43 = vld [vmem:[%s5694_s25 + $0x48] sm:$0xf0]  ;;  %v2909_v45 = vor.u32 %v3967_v37, %v2906_v39  ;;  %v2997_v46 = vor.u32 %v3945_v41, %v2996_v40  ;;  %v2896_v47 = vld [vmem:[%s5693_s29 + $0x30] sm:$0xf] }
  0x19   :  { %256 = vmatpush.bf16.msra.mxu0 %v2913_v29  ;;  %v3966_v48 = vld [vmem:[%s5693_s29 + $0x34] sm:$0xf0]  ;;  %v3965_v49 = vld [vmem:[%s5693_s29 + $0x34] sm:$0xf]  ;;  %v3001_v50 = vor.u32 %v3944_v42, %v2998_v43  ;;  %v2898_v51 = vld [vmem:[%s5693_s29 + $0x38] sm:$0xf0] }
  0x1a   :  { %300 = vmatpush.bf16.msra.mxu1 %v2917_v33  ;;  %466 = vmatpush.bf16.msra.mxu2 %v3005_v34  ;;  %v2988_v52 = vld [vmem:[%s5694_s25 + $0x30] sm:$0xf]  ;;  %v3943_v53 = vld [vmem:[%s5694_s25 + $0x34] sm:$0xf0]  ;;  %v3942_v54 = vld [vmem:[%s5694_s25 + $0x34] sm:$0xf]  ;;  %v2897_v56 = vor.u32 %v3966_v48, %v2896_v47  ;;  %v2901_v57 = vor.u32 %v3965_v49, %v2898_v51 }
  0x1b   :  { %510 = vmatpush.bf16.msra.mxu3 %v3009_v38  ;;  %v2990_v55 = vld [vmem:[%s5694_s25 + $0x38] sm:$0xf0]  ;;  %v2989_v58 = vor.u32 %v3943_v53, %v2988_v52  ;;  %v2888_v59 = vld [vmem:[%s5693_s29 + $0x20] sm:$0xf]  ;;  %v3964_v60 = vld [vmem:[%s5693_s29 + $0x24] sm:$0xf0] }
  0x1c   :  { %v3963_v61 = vld [vmem:[%s5693_s29 + $0x24] sm:$0xf]  ;;  %v2993_v62 = vor.u32 %v3942_v54, %v2990_v55  ;;  %v2890_v63 = vld [vmem:[%s5693_s29 + $0x28] sm:$0xf0]  ;;  %v2980_v0 = vld [vmem:[%s5694_s25 + $0x20] sm:$0xf]  ;;  %v2889_v4 = vor.u32 %v3964_v60, %v2888_v59 }
  0x1d   :  { %257 = vmatpush.bf16.msra.mxu0 %v2905_v44  ;;  %v3941_v1 = vld [vmem:[%s5694_s25 + $0x24] sm:$0xf0]  ;;  %v3940_v2 = vld [vmem:[%s5694_s25 + $0x24] sm:$0xf]  ;;  %v2982_v3 = vld [vmem:[%s5694_s25 + $0x28] sm:$0xf0]  ;;  %v2893_v5 = vor.u32 %v3963_v61, %v2890_v63 }
  0x1e   :  { %301 = vmatpush.bf16.msra.mxu1 %v2909_v45  ;;  %467 = vmatpush.bf16.msra.mxu2 %v2997_v46  ;;  %v2981_v6 = vor.u32 %v3941_v1, %v2980_v0  ;;  %v2880_v7 = vld [vmem:[%s5693_s29 + $0x10] sm:$0xf]  ;;  %v3962_v8 = vld [vmem:[%s5693_s29 + $0x14] sm:$0xf0]  ;;  %v3961_v9 = vld [vmem:[%s5693_s29 + $0x14] sm:$0xf]  ;;  %v2985_v10 = vor.u32 %v3940_v2, %v2982_v3 }
  0x1f   :  { %511 = vmatpush.bf16.msra.mxu3 %v3001_v50  ;;  %v2882_v11 = vld [vmem:[%s5693_s29 + $0x18] sm:$0xf0]  ;;  %v2972_v12 = vld [vmem:[%s5694_s25 + $0x10] sm:$0xf]  ;;  %v3939_v13 = vld [vmem:[%s5694_s25 + $0x14] sm:$0xf0]  ;;  %v2881_v16 = vor.u32 %v3962_v8, %v2880_v7 }
  0x20   :  { %v3938_v14 = vld [vmem:[%s5694_s25 + $0x14] sm:$0xf]  ;;  %v2974_v15 = vld [vmem:[%s5694_s25 + $0x18] sm:$0xf0]  ;;  %v2885_v17 = vor.u32 %v3961_v9, %v2882_v11  ;;  %v2973_v18 = vor.u32 %v3939_v13, %v2972_v12  ;;  %v2872_v19 = vld [vmem:[%s5693_s29] sm:$0xf] }
  0x21   :  { %258 = vmatpush.bf16.msra.mxu0 %v2897_v56  ;;  %v3960_v20 = vld [vmem:[%s5693_s29 + $0x4] sm:$0xf0]  ;;  %v3959_v21 = vld [vmem:[%s5693_s29 + $0x4] sm:$0xf]  ;;  %v2977_v22 = vor.u32 %v3938_v14, %v2974_v15  ;;  %v2874_v23 = vld [vmem:[%s5693_s29 + $0x8] sm:$0xf0] }
  0x22   :  { %302 = vmatpush.bf16.msra.mxu1 %v2901_v57  ;;  %468 = vmatpush.bf16.msra.mxu2 %v2989_v58  ;;  %v2964_v24 = vld [vmem:[%s5694_s25] sm:$0xf]  ;;  %v3937_v25 = vld [vmem:[%s5694_s25 + $0x4] sm:$0xf0]  ;;  %v3936_v26 = vld [vmem:[%s5694_s25 + $0x4] sm:$0xf]  ;;  %v2873_v28 = vor.u32 %v3960_v20, %v2872_v19  ;;  %v2877_v29 = vor.u32 %v3959_v21, %v2874_v23 }
  0x23   :  { %512 = vmatpush.bf16.msra.mxu3 %v2993_v62  ;;  %v2966_v27 = vld [vmem:[%s5694_s25 + $0x8] sm:$0xf0]  ;;  %v2965_v30 = vor.u32 %v3937_v25, %v2964_v24  ;;  %v3929_v33 = vld [vmem:[%s5695_s27] sm:$0xff]  ;;  %v3953_v34 = vld [vmem:[%s5695_s27 + $0x10] sm:$0xff]  ;;  %s5701_s25 = sld [smem:[#allocation11_spill]] }
  0x24   :  { %v2969_v31 = vor.u32 %v3936_v26, %v2966_v27  ;;  %v3952_v32 = vld [vmem:[%s5695_s27 + $0x8] sm:$0xff]  ;;  %v4029_v36 = vld [vmem:[%s5696_s7 + $0x154] sm:$0xf]  ;;  %v3154_v37 = vld [vmem:[%s5696_s7 + $0x158] sm:$0xf0] }
  0x25   :  { %259 = vmatpush.bf16.msra.mxu0 %v2889_v4  ;;  %v3930_v35 = vld [vmem:[%s5695_s27 + $0x8] sm:$0xff]  ;;  %v4041_v38 = vld [vmem:[%s5696_s7 + $0x1b4] sm:$0xf]  ;;  %v3157_v39 = vor.u32 %v4029_v36, %v3154_v37  ;;  %v3202_v40 = vld [vmem:[%s5696_s7 + $0x1b8] sm:$0xf0] }
  0x26   :  { %303 = vmatpush.bf16.msra.mxu1 %v2893_v5  ;;  %469 = vmatpush.bf16.msra.mxu2 %v2981_v6  ;;  %v3205_v41 = vor.u32 %v4041_v38, %v3202_v40  ;;  %v3954_v42 = vld [vmem:[%s5695_s27 + $0x18] sm:$0xff]  ;;  %v3931_v43 = vld [vmem:[%s5695_s27 + $0x10] sm:$0xff]  ;;  %v4027_v49 = vld [vmem:[%s5696_s7 + $0x144] sm:$0xf] }
  0x27   :  { %513 = vmatpush.bf16.msra.mxu3 %v2985_v10  ;;  %v3152_v44 = vld [vmem:[%s5696_s7 + $0x150] sm:$0xf]  ;;  %v4030_v45 = vld [vmem:[%s5696_s7 + $0x154] sm:$0xf0]  ;;  %v3146_v50 = vld [vmem:[%s5696_s7 + $0x148] sm:$0xf0] }
  0x28   :  { %v3200_v46 = vld [vmem:[%s5696_s7 + $0x1b0] sm:$0xf]  ;;  %v3153_v47 = vor.u32 %v4030_v45, %v3152_v44  ;;  %v4042_v48 = vld [vmem:[%s5696_s7 + $0x1b4] sm:$0xf0]  ;;  %v3149_v52 = vor.u32 %v4027_v49, %v3146_v50  ;;  %v3955_v53 = vld [vmem:[%s5695_s27 + $0x20] sm:$0xff] }
  0x29   :  { %260 = vmatpush.bf16.msra.mxu0 %v2881_v16  ;;  %v3201_v51 = vor.u32 %v4042_v48, %v3200_v46  ;;  %v3932_v54 = vld [vmem:[%s5695_s27 + $0x18] sm:$0xff]  ;;  %v4039_v55 = vld [vmem:[%s5696_s7 + $0x1a4] sm:$0xf]  ;;  %v3194_v56 = vld [vmem:[%s5696_s7 + $0x1a8] sm:$0xf0] }
  0x2a   :  { %304 = vmatpush.bf16.msra.mxu1 %v2885_v17  ;;  %470 = vmatpush.bf16.msra.mxu2 %v2973_v18  ;;  %v3144_v57 = vld [vmem:[%s5696_s7 + $0x140] sm:$0xf]  ;;  %v3197_v58 = vor.u32 %v4039_v55, %v3194_v56  ;;  %v4028_v59 = vld [vmem:[%s5696_s7 + $0x144] sm:$0xf0]  ;;  %v4025_v0 = vld [vmem:[%s5696_s7 + $0x134] sm:$0xf] }
  0x2b   :  { %514 = vmatpush.bf16.msra.mxu3 %v2977_v22  ;;  %v3192_v60 = vld [vmem:[%s5696_s7 + $0x1a0] sm:$0xf]  ;;  %v4040_v61 = vld [vmem:[%s5696_s7 + $0x1a4] sm:$0xf0]  ;;  %v3145_v62 = vor.u32 %v4028_v59, %v3144_v57  ;;  %v3138_v1 = vld [vmem:[%s5696_s7 + $0x138] sm:$0xf0] }
  0x2c   :  { %v3193_v63 = vor.u32 %v4040_v61, %v3192_v60  ;;  %v3136_v2 = vld [vmem:[%s5696_s7 + $0x130] sm:$0xf]  ;;  %v3141_v3 = vor.u32 %v4025_v0, %v3138_v1  ;;  %v4026_v4 = vld [vmem:[%s5696_s7 + $0x134] sm:$0xf0]  ;;  %v4037_v5 = vld [vmem:[%s5696_s7 + $0x194] sm:$0xf] }
  0x2d   :  { %261 = vmatpush.bf16.msra.mxu0 %v2873_v28  ;;  %v3186_v6 = vld [vmem:[%s5696_s7 + $0x198] sm:$0xf0]  ;;  %v3137_v7 = vor.u32 %v4026_v4, %v3136_v2  ;;  %v4023_v9 = vld [vmem:[%s5696_s7 + $0x124] sm:$0xf]  ;;  %v3130_v10 = vld [vmem:[%s5696_s7 + $0x128] sm:$0xf0] }
  0x2e   :  { %305 = vmatpush.bf16.msra.mxu1 %v2877_v29  ;;  %471 = vmatpush.bf16.msra.mxu2 %v2965_v30  ;;  %v3189_v8 = vor.u32 %v4037_v5, %v3186_v6  ;;  %v3184_v11 = vld [vmem:[%s5696_s7 + $0x190] sm:$0xf]  ;;  %v3133_v12 = vor.u32 %v4023_v9, %v3130_v10  ;;  %v4038_v13 = vld [vmem:[%s5696_s7 + $0x194] sm:$0xf0]  ;;  %v3128_v14 = vld [vmem:[%s5696_s7 + $0x120] sm:$0xf] }
  0x2f   :  { %515 = vmatpush.bf16.msra.mxu3 %v2969_v31  ;;  %v4024_v15 = vld [vmem:[%s5696_s7 + $0x124] sm:$0xf0]  ;;  %v3185_v16 = vor.u32 %v4038_v13, %v3184_v11  ;;  %v4021_v17 = vld [vmem:[%s5696_s7 + $0x114] sm:$0xf]  ;;  %v3122_v18 = vld [vmem:[%s5696_s7 + $0x118] sm:$0xf0] }
  0x30   :  { %262 = vmatmul.bf16.vlgmr.msra.gmra.mxu0 %v3952_v32  ;;  %v4035_v19 = vld [vmem:[%s5696_s7 + $0x184] sm:$0xf]  ;;  %v3178_v20 = vld [vmem:[%s5696_s7 + $0x188] sm:$0xf0]  ;;  %v3129_v21 = vor.u32 %v4024_v15, %v3128_v14  ;;  %v3176_v23 = vld [vmem:[%s5696_s7 + $0x180] sm:$0xf]  ;;  %v3125_v25 = vor.u32 %v4021_v17, %v3122_v18 }
  0x31   :  { %306 = vmatmul.bf16.vlgmr.msra.gmra.mxu1 %v3952_v32  ;;  %472 = vmatmul.bf16.vlgmr.msra.gmra.mxu2 %v3929_v33  ;;  %v3181_v22 = vor.u32 %v4035_v19, %v3178_v20  ;;  %v4036_v24 = vld [vmem:[%s5696_s7 + $0x184] sm:$0xf0]  ;;  %v3120_v26 = vld [vmem:[%s5696_s7 + $0x110] sm:$0xf]  ;;  %v4022_v27 = vld [vmem:[%s5696_s7 + $0x114] sm:$0xf0] }
  0x32   :  { %516 = vmatmul.bf16.vlgmr.msra.gmra.mxu3 %v3929_v33  ;;  %983 = vmatpush.bf16.msrb.mxu2 %v3157_v39  ;;  %v3177_v28 = vor.u32 %v4036_v24, %v3176_v23  ;;  %v3956_v29 = vld [vmem:[%s5695_s27 + $0x28] sm:$0xff]  ;;  %v3933_v30 = vld [vmem:[%s5695_s27 + $0x20] sm:$0xff]  ;;  %v3121_v31 = vor.u32 %v4022_v27, %v3120_v26  ;;  %v3957_v32 = vld [vmem:[%s5695_s27 + $0x30] sm:$0xff] }
  0x33   :  { %1019 = vmatpush.bf16.msrb.mxu3 %v3205_v41  ;;  %915 = vmatpush.bf16.msrb.mxu0 %v3153_v47  ;;  %v3934_v33 = vld [vmem:[%s5695_s27 + $0x28] sm:$0xff]  ;;  %v4033_v36 = vld [vmem:[%s5696_s7 + $0x174] sm:$0xf]  ;;  %v3170_v38 = vld [vmem:[%s5696_s7 + $0x178] sm:$0xf0] }
  0x34   :  { %951 = vmatpush.bf16.msrb.mxu1 %v3201_v51  ;;  %v3112_v39 = vld [vmem:[%s5696_s7 + $0x100] sm:$0xf]  ;;  %v4020_v40 = vld [vmem:[%s5696_s7 + $0x104] sm:$0xf0]  ;;  %v3173_v41 = vor.u32 %v4033_v36, %v3170_v38  ;;  %v4034_v44 = vld [vmem:[%s5696_s7 + $0x174] sm:$0xf0] }
  0x35   :  { %v4017_v45 = vld [vmem:[%s5696_s7 + $0xf4] sm:$0xf]  ;;  %v3106_v47 = vld [vmem:[%s5696_s7 + $0xf8] sm:$0xf0]  ;;  %v552_v56 = vld [vmem:[%s5697_s2] sm:$0x3] }
  0x36   :  { %984 = vmatpush.bf16.msrb.mxu2 %v3149_v52  ;;  %v3935_v48 = vld [vmem:[%s5695_s27 + $0x30] sm:$0xff]  ;;  %v3109_v49 = vor.u32 %v4017_v45, %v3106_v47  ;;  %v3958_v50 = vld [vmem:[%s5695_s27 + $0x38] sm:$0xff]  ;;  %v4675_v57 = vperm.slane %v552_v56, 0  ;;  %v4677_v59 = vperm.slane %v552_v56, 1  ;;  %v4031_v1 = vld [vmem:[%s5696_s7 + $0x164] sm:$0xf] }
  0x37   :  { %1020 = vmatpush.bf16.msrb.mxu3 %v3197_v58  ;;  %916 = vmatpush.bf16.msrb.mxu0 %v3145_v62  ;;  %v3162_v2 = vld [vmem:[%s5696_s7 + $0x168] sm:$0xf0]  ;;  %v3096_v14 = vld [vmem:[%s5696_s7 + $0xe0] sm:$0xf]  ;;  %v4016_v15 = vld [vmem:[%s5696_s7 + $0xe4] sm:$0xf0] }
  0x38   :  { %952 = vmatpush.bf16.msrb.mxu1 %v3193_v63  ;;  %v3165_v5 = vor.u32 %v4031_v1, %v3162_v2  ;;  %v3098_v6 = vld [vmem:[%s5696_s7 + $0xe8] sm:$0xf0]  ;;  %v3097_v17 = vor.u32 %v4016_v15, %v3096_v14  ;;  %v3999_v36 = vld [vmem:[%s5696_s7 + $0x74] sm:$0xf]  ;;  %v3274_v15 = vld [vmem:[%s5696_s7 + $0x60] sm:$0xf] }
  0x3a   :  { %985 = vmatpush.bf16.msrb.mxu2 %v3141_v3  ;;  %v4015_v3 = vld [vmem:[%s5696_s7 + $0xe4] sm:$0xf] }
  0x3b   :  { %1021 = vmatpush.bf16.msrb.mxu3 %v3189_v8  ;;  %917 = vmatpush.bf16.msrb.mxu0 %v3137_v7  ;;  %v3160_v7 = vld [vmem:[%s5696_s7 + $0x160] sm:$0xf]  ;;  %v4032_v8 = vld [vmem:[%s5696_s7 + $0x164] sm:$0xf0]  ;;  %v3101_v10 = vor.u32 %v4015_v3, %v3098_v6 }
  0x3c   :  { %953 = vmatpush.bf16.msrb.mxu1 %v3185_v16  ;;  %v3161_v11 = vor.u32 %v4032_v8, %v3160_v7 }
  0x3e   :  { %986 = vmatpush.bf16.msrb.mxu2 %v3133_v12 }
  0x3f   :  { %1022 = vmatpush.bf16.msrb.mxu3 %v3181_v22  ;;  %918 = vmatpush.bf16.msrb.mxu0 %v3129_v21 }
  0x40   :  { %267 = vmatmul.bf16.gmra.mxu0 %v3953_v34  ;;  %954 = vmatpush.bf16.msrb.mxu1 %v3177_v28 }
  0x41   :  { %311 = vmatmul.bf16.gmra.mxu1 %v3953_v34  ;;  %477 = vmatmul.bf16.gmra.mxu2 %v3930_v35  ;;  %v4019_v34 = vld [vmem:[%s5696_s7 + $0x104] sm:$0xf] }
  0x42   :  { %521 = vmatmul.bf16.gmra.mxu3 %v3930_v35  ;;  %987 = vmatpush.bf16.msrb.mxu2 %v3125_v25  ;;  %v3114_v35 = vld [vmem:[%s5696_s7 + $0x108] sm:$0xf0] }
  0x43   :  { %919 = vmatpush.bf16.msrb.mxu0 %v3121_v31  ;;  %v3117_v37 = vor.u32 %v4019_v34, %v3114_v35  ;;  %1023 = vmatpush.bf16.msrb.mxu3 %v3173_v41  ;;  %v3332_v41 = vld [vmem:[%s5696_s7 + $0xd8] sm:$0xf0] }
  0x46   :  { %988 = vmatpush.bf16.msrb.mxu2 %v3117_v37  ;;  %v3284_v37 = vld [vmem:[%s5696_s7 + $0x78] sm:$0xf0] }
  0x47   :  { %1024 = vmatpush.bf16.msrb.mxu3 %v3165_v5 }
  0x4a   :  { %989 = vmatpush.bf16.msrb.mxu2 %v3109_v49 }
  0x4e   :  { %990 = vmatpush.bf16.msrb.mxu2 %v3101_v10 }
  0x50   :  { %272 = vmatmul.bf16.gmra.mxu0 %v3954_v42 }
  0x51   :  { %316 = vmatmul.bf16.gmra.mxu1 %v3954_v42  ;;  %482 = vmatmul.bf16.gmra.mxu2 %v3931_v43  ;;  %v3113_v42 = vor.u32 %v4020_v40, %v3112_v39  ;;  %v3287_v39 = vor.u32 %v3999_v36, %v3284_v37  ;;  %v4011_v40 = vld [vmem:[%s5696_s7 + $0xd4] sm:$0xf] }
  0x52   :  { %526 = vmatmul.bf16.gmra.mxu3 %v3931_v43  ;;  %v3168_v43 = vld [vmem:[%s5696_s7 + $0x170] sm:$0xf] }
  0x53   :  { %920 = vmatpush.bf16.msrb.mxu0 %v3113_v42  ;;  %v3169_v46 = vor.u32 %v4034_v44, %v3168_v43  ;;  %v3335_v43 = vor.u32 %v4011_v40, %v3332_v41  ;;  %1271 = vmatpush.bf16.msra.mxu2 %v3287_v39  ;;  %v3266_v41 = vld [vmem:[%s5696_s7 + $0x50] sm:$0xf] }
  0x55   :  { %955 = vmatpush.bf16.msrb.mxu1 %v3169_v46  ;;  %1307 = vmatpush.bf16.msra.mxu3 %v3335_v43 }
  0x59   :  { %956 = vmatpush.bf16.msrb.mxu1 %v3161_v11  ;;  %v4009_v11 = vld [vmem:[%s5696_s7 + $0xc4] sm:$0xf] }
  0x60   :  { %277 = vmatmul.bf16.gmra.mxu0 %v3955_v53 }
  0x61   :  { %321 = vmatmul.bf16.gmra.mxu1 %v3955_v53  ;;  %487 = vmatmul.bf16.gmra.mxu2 %v3932_v54  ;;  %v3104_v53 = vld [vmem:[%s5696_s7 + $0xf0] sm:$0xf] }
  0x62   :  { %531 = vmatmul.bf16.gmra.mxu3 %v3932_v54  ;;  %v4018_v54 = vld [vmem:[%s5696_s7 + $0xf4] sm:$0xf0] }
  0x63   :  { %v3105_v55 = vor.u32 %v4018_v54, %v3104_v53  ;;  %v3282_v53 = vld [vmem:[%s5696_s7 + $0x70] sm:$0xf]  ;;  %v4000_v54 = vld [vmem:[%s5696_s7 + $0x74] sm:$0xf0] }
  0x64   :  { %v3283_v56 = vor.u32 %v4000_v54, %v3282_v53 }
  0x65   :  { %921 = vmatpush.bf16.msrb.mxu0 %v3105_v55 }
  0x69   :  { %922 = vmatpush.bf16.msrb.mxu0 %v3097_v17  ;;  %v3998_v17 = vld [vmem:[%s5696_s7 + $0x64] sm:$0xf0] }
  0x6d   :  { %1203 = vmatpush.bf16.msra.mxu0 %v3283_v56 }
  0x70   :  { %282 = vmatmul.bf16.gmra.mxu0 %v3956_v29 }
  0x71   :  { %326 = vmatmul.bf16.gmra.mxu1 %v3956_v29  ;;  %492 = vmatmul.bf16.gmra.mxu2 %v3933_v30 }
  0x72   :  { %536 = vmatmul.bf16.gmra.mxu3 %v3933_v30 }
  0x80   :  { %287 = vmatmul.bf16.gmra.mxu0 %v3957_v32 }
  0x81   :  { %331 = vmatmul.bf16.gmra.mxu1 %v3957_v32  ;;  %497 = vmatmul.bf16.gmra.mxu2 %v3934_v33 }
  0x82   :  { %541 = vmatmul.bf16.gmra.mxu3 %v3934_v33 }
  0x90   :  { %292 = vmatmul.bf16.gmra.mxu0 %v3958_v50 }
  0x91   :  { %502 = vmatmul.bf16.gmra.mxu2 %v3935_v48  ;;  %336 = vmatmul.bf16.gmra.mxu1 %v3958_v50 }
  0x92   :  { %546 = vmatmul.bf16.gmra.mxu3 %v3935_v48 }
  0xad   :  { %v263_v51 = vpop.f32.mrf.mxu0 }
  0xae   :  { %v307_v52 = vpop.f32.mrf.mxu1 }
  0xb4   :  { %v473_v58 = vpop.f32.mrf.mxu2 }
  0xb5   :  { %v474_v60 = vadd.f32 %v473_v58, %v263_v51  ;;  %v517_v61 = vpop.f32.mrf.mxu3  ;;  %v265_v62 = vpop.f32.mrf.mxu0  ;;  %v3330_v58 = vld [vmem:[%s5696_s7 + $0xd0] sm:$0xf] }
  0xb6   :  { %v518_v63 = vadd.f32 %v517_v61, %v307_v52  ;;  %v309_v0 = vpop.f32.mrf.mxu1  ;;  %v3997_v61 = vld [vmem:[%s5696_s7 + $0x64] sm:$0xf] }
  0xb7   :  { %v558_v4 = vadd.f32 %v4675_v57, %v474_v60  ;;  %v4012_v60 = vld [vmem:[%s5696_s7 + $0xd4] sm:$0xf0] }
  0xb8   :  { %v559_v9 = vadd.f32 %v4677_v59, %v518_v63  ;;  %v3331_v63 = vor.u32 %v4012_v60, %v3330_v58  ;;  %v3993_v60 = vld [vmem:[%s5696_s7 + $0x44] sm:$0xf] }
  0xb9   :  { %v586_v12 = vmax.f32 %v558_v4, 0.0 }
  0xba   :  { %v587_v13 = vmax.f32 %v559_v9, 0.0  ;;  %1239 = vmatpush.bf16.msra.mxu1 %v3331_v63 }
  0xbc   :  { %v614_v18 = vpack.c.bf16 %v587_v13, %v586_v12  ;;  %v475_v19 = vpop.f32.mrf.mxu2  ;;  %v3324_v12 = vld [vmem:[%s5696_s7 + $0xc8] sm:$0xf0] }
  0xbd   :  { %v476_v20 = vadd.f32 %v475_v19, %v265_v62  ;;  %v519_v21 = vpop.f32.mrf.mxu3  ;;  %v268_v22 = vpop.f32.mrf.mxu0  ;;  %v3327_v14 = vor.u32 %v4009_v11, %v3324_v12 }
  0xbe   :  { %631 = vst.msk [vmem:[#allocation2] sm:$0xff] %vm4706_vm2, %v614_v18  ;;  %v520_v23 = vadd.f32 %v519_v21, %v309_v0  ;;  %v312_v24 = vpop.f32.mrf.mxu1  ;;  %v3276_v0 = vld [vmem:[%s5696_s7 + $0x68] sm:$0xf0]  ;;  %v3322_v18 = vld [vmem:[%s5696_s7 + $0xc0] sm:$0xf] }
  0xbf   :  { %v560_v25 = vadd.f32 %v4675_v57, %v476_v20  ;;  %v3279_v2 = vor.u32 %v3997_v61, %v3276_v0  ;;  %v3275_v20 = vor.u32 %v3998_v17, %v3274_v15  ;;  %v4010_v21 = vld [vmem:[%s5696_s7 + $0xc4] sm:$0xf0]  ;;  %1308 = vmatpush.bf16.msra.mxu3 %v3327_v14  ;;  %v3260_v61 = vld [vmem:[%s5696_s7 + $0x48] sm:$0xf0]  ;;  %v3314_v0 = vld [vmem:[%s5696_s7 + $0xb0] sm:$0xf] }
  0xc0   :  { %v561_v26 = vadd.f32 %v4677_v59, %v520_v23  ;;  %v3268_v23 = vld [vmem:[%s5696_s7 + $0x58] sm:$0xf0]  ;;  %v3263_v63 = vor.u32 %v3993_v60, %v3260_v61  ;;  %v3990_v60 = vld [vmem:[%s5696_s7 + $0x24] sm:$0xf0] }
  0xc1   :  { %v588_v27 = vmax.f32 %v560_v25, 0.0  ;;  %1272 = vmatpush.bf16.msra.mxu2 %v3279_v2  ;;  %v3323_v25 = vor.u32 %v4010_v21, %v3322_v18  ;;  %1204 = vmatpush.bf16.msra.mxu0 %v3275_v20  ;;  %v3258_v2 = vld [vmem:[%s5696_s7 + $0x40] sm:$0xf] }
  0xc2   :  { %v589_v28 = vmax.f32 %v561_v26, 0.0 }
  0xc3   :  { %1240 = vmatpush.bf16.msra.mxu1 %v3323_v25 }
  0xc4   :  { %v615_v29 = vpack.c.bf16 %v589_v28, %v588_v27  ;;  %v478_v30 = vpop.f32.mrf.mxu2 }
  0xc5   :  { %v479_v31 = vadd.f32 %v478_v30, %v268_v22  ;;  %v522_v32 = vpop.f32.mrf.mxu3  ;;  %v270_v33 = vpop.f32.mrf.mxu0  ;;  %v3995_v22 = vld [vmem:[%s5696_s7 + $0x54] sm:$0xf] }
  0xc6   :  { %632 = vst.msk [vmem:[#allocation2 + $0x8] sm:$0xff] %vm4706_vm2, %v615_v29  ;;  %v523_v34 = vadd.f32 %v522_v32, %v312_v24  ;;  %v314_v35 = vpop.f32.mrf.mxu1  ;;  %v3271_v26 = vor.u32 %v3995_v22, %v3268_v23  ;;  %v3991_v22 = vld [vmem:[%s5696_s7 + $0x34] sm:$0xf]  ;;  %v3252_v23 = vld [vmem:[%s5696_s7 + $0x38] sm:$0xf0] }
  0xc7   :  { %v562_v38 = vadd.f32 %v4675_v57, %v479_v31 }
  0xc8   :  { %v563_v42 = vadd.f32 %v4677_v59, %v523_v34  ;;  %1273 = vmatpush.bf16.msra.mxu2 %v3271_v26  ;;  %v3255_v26 = vor.u32 %v3991_v22, %v3252_v23  ;;  %v3234_v22 = vld [vmem:[%s5696_s7 + $0x10] sm:$0xf]  ;;  %v3988_v23 = vld [vmem:[%s5696_s7 + $0x14] sm:$0xf0] }
  0xc9   :  { %v590_v44 = vmax.f32 %v562_v38, 0.0 }
  0xca   :  { %v591_v45 = vmax.f32 %v563_v42, 0.0  ;;  %v3996_v42 = vld [vmem:[%s5696_s7 + $0x54] sm:$0xf0] }
  0xcc   :  { %v616_v46 = vpack.c.bf16 %v591_v45, %v590_v44  ;;  %v480_v47 = vpop.f32.mrf.mxu2  ;;  %v3267_v44 = vor.u32 %v3996_v42, %v3266_v41  ;;  %v4007_v45 = vld [vmem:[%s5696_s7 + $0xb4] sm:$0xf]  ;;  %1274 = vmatpush.bf16.msra.mxu2 %v3263_v63  ;;  %v3992_v41 = vld [vmem:[%s5696_s7 + $0x34] sm:$0xf0]  ;;  %v3298_v63 = vld [vmem:[%s5696_s7 + $0x90] sm:$0xf] }
  0xcd   :  { %v481_v48 = vadd.f32 %v480_v47, %v270_v33  ;;  %v524_v49 = vpop.f32.mrf.mxu3  ;;  %v273_v50 = vpop.f32.mrf.mxu0 }
  0xce   :  { %633 = vst.msk [vmem:[#allocation2 + $0x10] sm:$0xff] %vm4706_vm2, %v616_v46  ;;  %v525_v51 = vadd.f32 %v524_v49, %v314_v35  ;;  %v317_v52 = vpop.f32.mrf.mxu1  ;;  %v3316_v46 = vld [vmem:[%s5696_s7 + $0xb8] sm:$0xf0]  ;;  %1205 = vmatpush.bf16.msra.mxu0 %v3267_v44  ;;  %v3306_v44 = vld [vmem:[%s5696_s7 + $0xa0] sm:$0xf] }
  0xcf   :  { %v564_v55 = vadd.f32 %v4675_v57, %v481_v48  ;;  %v3319_v48 = vor.u32 %v4007_v45, %v3316_v46  ;;  %v4006_v45 = vld [vmem:[%s5696_s7 + $0xa4] sm:$0xf0]  ;;  %v3989_v46 = vld [vmem:[%s5696_s7 + $0x24] sm:$0xf] }
  0xd0   :  { %v565_v62 = vadd.f32 %v4677_v59, %v525_v51  ;;  %1275 = vmatpush.bf16.msra.mxu2 %v3255_v26  ;;  %v3235_v26 = vor.u32 %v3988_v23, %v3234_v22  ;;  %v4080_v22 = vld [vmem:[%s5696_s7 + $0x294] sm:$0xf0]  ;;  %v4065_v23 = vld [vmem:[%s5696_s7 + $0x224] sm:$0xf] }
  0xd1   :  { %v592_v1 = vmax.f32 %v564_v55, 0.0  ;;  %1309 = vmatpush.bf16.msra.mxu3 %v3319_v48 }
  0xd2   :  { %v593_v3 = vmax.f32 %v565_v62, 0.0 }
  0xd4   :  { %v617_v4 = vpack.c.bf16 %v593_v3, %v592_v1  ;;  %v483_v5 = vpop.f32.mrf.mxu2  ;;  %v4008_v1 = vld [vmem:[%s5696_s7 + $0xb4] sm:$0xf0] }
  0xd5   :  { %v484_v6 = vadd.f32 %v483_v5, %v273_v50  ;;  %v527_v7 = vpop.f32.mrf.mxu3  ;;  %v275_v8 = vpop.f32.mrf.mxu0  ;;  %v3056_v30 = vld [vmem:[#allocation2 + $0x10] sm:$0xf]  ;;  %v3977_v35 = vld [vmem:[#allocation2 + $0x14] sm:$0xf]  ;;  %v3994_v5 = vld [vmem:[%s5696_s7 + $0x44] sm:$0xf0] }
  0xd6   :  { %634 = vst.msk [vmem:[#allocation2 + $0x18] sm:$0xff] %vm4706_vm2, %v617_v4  ;;  %v528_v9 = vadd.f32 %v527_v7, %v317_v52  ;;  %v319_v10 = vpop.f32.mrf.mxu1  ;;  %v3315_v4 = vor.u32 %v4008_v1, %v3314_v0  ;;  %v3259_v7 = vor.u32 %v3994_v5, %v3258_v2  ;;  %v4004_v0 = vld [vmem:[%s5696_s7 + $0x94] sm:$0xf0]  ;;  %v3987_v2 = vld [vmem:[%s5696_s7 + $0x14] sm:$0xf] }
  0xd7   :  { %v566_v13 = vadd.f32 %v4675_v57, %v484_v6  ;;  %v3299_v1 = vor.u32 %v4004_v0, %v3298_v63 }
  0xd8   :  { %v567_v19 = vadd.f32 %v4677_v59, %v528_v9  ;;  %1241 = vmatpush.bf16.msra.mxu1 %v3315_v4  ;;  %1206 = vmatpush.bf16.msra.mxu0 %v3259_v7 }
  0xd9   :  { %v594_v24 = vmax.f32 %v566_v13, 0.0 }
  0xda   :  { %v595_v27 = vmax.f32 %v567_v19, 0.0 }
  0xdc   :  { %v618_v28 = vpack.c.bf16 %v595_v27, %v594_v24  ;;  %v485_v29 = vpop.f32.mrf.mxu2  ;;  %v4005_v27 = vld [vmem:[%s5696_s7 + $0xa4] sm:$0xf] }
  0xdd   :  { %v486_v31 = vadd.f32 %v485_v29, %v275_v8  ;;  %v529_v32 = vpop.f32.mrf.mxu3  ;;  %v278_v33 = vpop.f32.mrf.mxu0  ;;  %v3978_v34 = vld [vmem:[#allocation2 + $0x14] sm:$0xf0]  ;;  %v3058_v36 = vld [vmem:[#allocation2 + $0x18] sm:$0xf0] }
  0xde   :  { %635 = vst.msk [vmem:[#allocation2 + $0x20] sm:$0xff] %vm4706_vm2, %v618_v28  ;;  %v530_v37 = vadd.f32 %v529_v32, %v319_v10  ;;  %v322_v38 = vpop.f32.mrf.mxu1  ;;  %v4782_v39 = vor.u32 %v3978_v34, %v3056_v30  ;;  %v4784_v40 = vor.u32 %v3977_v35, %v3058_v36  ;;  %v3308_v28 = vld [vmem:[%s5696_s7 + $0xa8] sm:$0xf0] }
  0xdf   :  { %v568_v43 = vadd.f32 %v4675_v57, %v486_v31  ;;  %v3311_v30 = vor.u32 %v4005_v27, %v3308_v28  ;;  %v4001_v27 = vld [vmem:[%s5696_s7 + $0x84] sm:$0xf]  ;;  %v3292_v28 = vld [vmem:[%s5696_s7 + $0x88] sm:$0xf0] }
  0xe0   :  { %v569_v47 = vadd.f32 %v4677_v59, %v530_v37  ;;  %923 = vmatmul.bf16.vlgmr.msrb.gmra.mxu0 %v4782_v39  ;;  %3206 = vmatmul.msk.bf16.vlgmr.msrb.gmra.mxu1 %vm899_vm3, %v4784_v40 }
  0xe1   :  { %v596_v49 = vmax.f32 %v568_v43, 0.0  ;;  %991 = vmatmul.bf16.vlgmr.msrb.gmra.mxu2 %v4782_v39  ;;  %3211 = vmatmul.msk.bf16.vlgmr.msrb.gmra.mxu3 %vm899_vm3, %v4784_v40 }
  0xe2   :  { %v597_v50 = vmax.f32 %v569_v47, 0.0  ;;  %1310 = vmatpush.bf16.msra.mxu3 %v3311_v30  ;;  %v3295_v30 = vor.u32 %v4001_v27, %v3292_v28  ;;  %v4077_v27 = vld [vmem:[%s5696_s7 + $0x284] sm:$0xf]  ;;  %v3514_v28 = vld [vmem:[%s5696_s7 + $0x288] sm:$0xf0] }
  0xe4   :  { %v619_v51 = vpack.c.bf16 %v597_v50, %v596_v49  ;;  %v488_v52 = vpop.f32.mrf.mxu2  ;;  %v3307_v49 = vor.u32 %v4006_v45, %v3306_v44  ;;  %v3244_v50 = vld [vmem:[%s5696_s7 + $0x28] sm:$0xf0] }
  0xe5   :  { %v489_v53 = vadd.f32 %v488_v52, %v278_v33  ;;  %v532_v54 = vpop.f32.mrf.mxu3  ;;  %v280_v55 = vpop.f32.mrf.mxu0  ;;  %v3064_v11 = vld [vmem:[#allocation2 + $0x20] sm:$0xf]  ;;  %v3979_v15 = vld [vmem:[#allocation2 + $0x24] sm:$0xf]  ;;  %v3300_v52 = vld [vmem:[%s5696_s7 + $0x98] sm:$0xf0] }
  0xe6   :  { %636 = vst.msk [vmem:[#allocation2 + $0x28] sm:$0xff] %vm4706_vm2, %v619_v51  ;;  %v533_v56 = vadd.f32 %v532_v54, %v322_v38  ;;  %v324_v58 = vpop.f32.mrf.mxu1  ;;  %v3250_v38 = vld [vmem:[%s5696_s7 + $0x30] sm:$0xf]  ;;  %v4003_v51 = vld [vmem:[%s5696_s7 + $0x94] sm:$0xf]  ;;  %1242 = vmatpush.bf16.msra.mxu1 %v3307_v49 }
  0xe7   :  { %v570_v62 = vadd.f32 %v4675_v57, %v489_v53  ;;  %v3251_v43 = vor.u32 %v3992_v41, %v3250_v38  ;;  %v3226_v38 = vld [vmem:[%s5696_s7] sm:$0xf]  ;;  %v3986_v41 = vld [vmem:[%s5696_s7 + $0x4] sm:$0xf0] }
  0xe8   :  { %v571_v3 = vadd.f32 %v4677_v59, %v533_v56  ;;  %v3303_v56 = vor.u32 %v4003_v51, %v3300_v52  ;;  %v3227_v45 = vor.u32 %v3986_v41, %v3226_v38  ;;  %v3512_v38 = vld [vmem:[%s5696_s7 + $0x280] sm:$0xf] }
  0xe9   :  { %v598_v6 = vmax.f32 %v570_v62, 0.0  ;;  %1207 = vmatpush.bf16.msra.mxu0 %v3251_v43 }
  0xea   :  { %v599_v8 = vmax.f32 %v571_v3, 0.0  ;;  %1311 = vmatpush.bf16.msra.mxu3 %v3303_v56  ;;  %v3236_v3 = vld [vmem:[%s5696_s7 + $0x18] sm:$0xf0]  ;;  %1243 = vmatpush.bf16.msra.mxu1 %v3299_v1 }
  0xeb   :  { %v3239_v7 = vor.u32 %v3987_v2, %v3236_v3 }
  0xec   :  { %v620_v9 = vpack.c.bf16 %v599_v8, %v598_v6  ;;  %v490_v10 = vpop.f32.mrf.mxu2 }
  0xed   :  { %v491_v12 = vadd.f32 %v490_v10, %v280_v55  ;;  %v534_v13 = vpop.f32.mrf.mxu3  ;;  %v3980_v14 = vld [vmem:[#allocation2 + $0x24] sm:$0xf0]  ;;  %v3066_v17 = vld [vmem:[#allocation2 + $0x28] sm:$0xf0]  ;;  %v283_v19 = vpop.f32.mrf.mxu0  ;;  %v3247_v55 = vor.u32 %v3989_v46, %v3244_v50 }
  0xee   :  { %637 = vst.msk [vmem:[#allocation2 + $0x30] sm:$0xff] %vm4706_vm2, %v620_v9  ;;  %v535_v18 = vadd.f32 %v534_v13, %v324_v58  ;;  %v4830_v20 = vor.u32 %v3980_v14, %v3064_v11  ;;  %v4832_v21 = vor.u32 %v3979_v15, %v3066_v17  ;;  %v327_v25 = vpop.f32.mrf.mxu1  ;;  %v3242_v58 = vld [vmem:[%s5696_s7 + $0x20] sm:$0xf]  ;;  %1312 = vmatpush.bf16.msra.mxu3 %v3295_v30 }
  0xef   :  { %v572_v24 = vadd.f32 %v4675_v57, %v491_v12  ;;  %v3243_v62 = vor.u32 %v3990_v60, %v3242_v58  ;;  %1276 = vmatpush.bf16.msra.mxu2 %v3247_v55 }
  0xf0   :  { %v573_v29 = vadd.f32 %v4677_v59, %v535_v18  ;;  %928 = vmatmul.bf16.gmra.mxu0 %v4830_v20  ;;  %3207 = vmatmul.msk.bf16.gmra.mxu1 %vm899_vm3, %v4832_v21 }
  0xf1   :  { %v600_v31 = vmax.f32 %v572_v24, 0.0  ;;  %996 = vmatmul.bf16.gmra.mxu2 %v4830_v20  ;;  %3212 = vmatmul.msk.bf16.gmra.mxu3 %vm899_vm3, %v4832_v21 }
  0xf2   :  { %v601_v32 = vmax.f32 %v573_v29, 0.0  ;;  %1208 = vmatpush.bf16.msra.mxu0 %v3243_v62 }
  0xf3   :  { %1277 = vmatpush.bf16.msra.mxu2 %v3239_v7 }
  0xf4   :  { %v621_v33 = vpack.c.bf16 %v601_v32, %v600_v31  ;;  %v493_v34 = vpop.f32.mrf.mxu2  ;;  %v3985_v31 = vld [vmem:[%s5696_s7 + $0x4] sm:$0xf]  ;;  %v3228_v32 = vld [vmem:[%s5696_s7 + $0x8] sm:$0xf0] }
  0xf5   :  { %v494_v35 = vadd.f32 %v493_v34, %v283_v19  ;;  %v537_v36 = vpop.f32.mrf.mxu3  ;;  %v285_v48 = vpop.f32.mrf.mxu0  ;;  %v3072_v6 = vld [vmem:[#allocation2 + $0x30] sm:$0xf]  ;;  %v3981_v11 = vld [vmem:[#allocation2 + $0x34] sm:$0xf] }
  0xf6   :  { %638 = vst.msk [vmem:[#allocation2 + $0x38] sm:$0xff] %vm4706_vm2, %v621_v33  ;;  %v538_v37 = vadd.f32 %v537_v36, %v327_v25  ;;  %v329_v54 = vpop.f32.mrf.mxu1  ;;  %v3290_v33 = vld [vmem:[%s5696_s7 + $0x80] sm:$0xf]  ;;  %1209 = vmatpush.bf16.msra.mxu0 %v3235_v26  ;;  %v3231_v36 = vor.u32 %v3985_v31, %v3228_v32 }
  0xf7   :  { %v574_v42 = vadd.f32 %v4675_v57, %v494_v35 }
  0xf8   :  { %v575_v47 = vadd.f32 %v4677_v59, %v538_v37  ;;  %v4002_v37 = vld [vmem:[%s5696_s7 + $0x84] sm:$0xf0]  ;;  %1278 = vmatpush.bf16.msra.mxu2 %v3231_v36  ;;  %v3464_v36 = vld [vmem:[%s5696_s7 + $0x220] sm:$0xf] }
  0xf9   :  { %v602_v53 = vmax.f32 %v574_v42, 0.0  ;;  %v3291_v44 = vor.u32 %v4002_v37, %v3290_v33  ;;  %v4066_v37 = vld [vmem:[%s5696_s7 + $0x224] sm:$0xf0] }
  0xfa   :  { %v603_v61 = vmax.f32 %v575_v47, 0.0  ;;  %1210 = vmatpush.bf16.msra.mxu0 %v3227_v45  ;;  %v3465_v41 = vor.u32 %v4066_v37, %v3464_v36 }
  0xfb   :  { %1244 = vmatpush.bf16.msra.mxu1 %v3291_v44  ;;  %v3458_v44 = vld [vmem:[%s5696_s7 + $0x218] sm:$0xf0] }
  0xfc   :  { %v622_v4 = vpack.c.bf16 %v603_v61, %v602_v53  ;;  %v495_v5 = vpop.f32.mrf.mxu2 }
  0xfd   :  { %v496_v8 = vadd.f32 %v495_v5, %v285_v48  ;;  %v539_v9 = vpop.f32.mrf.mxu3  ;;  %v3982_v10 = vld [vmem:[#allocation2 + $0x34] sm:$0xf0]  ;;  %v3074_v12 = vld [vmem:[#allocation2 + $0x38] sm:$0xf0]  ;;  %v288_v25 = vpop.f32.mrf.mxu0  ;;  %v4067_v5 = vld [vmem:[%s5696_s7 + $0x234] sm:$0xf] }
  0xfe   :  { %639 = vst.msk [vmem:[#allocation2 + $0x40] sm:$0xff] %vm4706_vm2, %v622_v4  ;;  %v540_v13 = vadd.f32 %v539_v9, %v329_v54  ;;  %v4902_v14 = vor.u32 %v3982_v10, %v3072_v6  ;;  %v4904_v15 = vor.u32 %v3981_v11, %v3074_v12  ;;  %v332_v29 = vpop.f32.mrf.mxu1  ;;  %v3474_v6 = vld [vmem:[%s5696_s7 + $0x238] sm:$0xf0]  ;;  %v4079_v9 = vld [vmem:[%s5696_s7 + $0x294] sm:$0xf] }
  0xff   :  { %v576_v17 = vadd.f32 %v4675_v57, %v496_v8  ;;  %v3477_v8 = vor.u32 %v4067_v5, %v3474_v6  ;;  %v3522_v10 = vld [vmem:[%s5696_s7 + $0x298] sm:$0xf0]  ;;  %v3472_v12 = vld [vmem:[%s5696_s7 + $0x230] sm:$0xf] }
 0x100   :  { %v577_v18 = vadd.f32 %v4677_v59, %v540_v13  ;;  %933 = vmatmul.bf16.gmra.mxu0 %v4902_v14  ;;  %3208 = vmatmul.msk.bf16.gmra.mxu1 %vm899_vm3, %v4904_v15  ;;  %v3525_v11 = vor.u32 %v4079_v9, %v3522_v10  ;;  %v4068_v13 = vld [vmem:[%s5696_s7 + $0x234] sm:$0xf0] }
 0x101   :  { %v604_v19 = vmax.f32 %v576_v17, 0.0  ;;  %1001 = vmatmul.bf16.gmra.mxu2 %v4902_v14  ;;  %3213 = vmatmul.msk.bf16.gmra.mxu3 %vm899_vm3, %v4904_v15  ;;  %v3520_v17 = vld [vmem:[%s5696_s7 + $0x290] sm:$0xf] }
 0x102   :  { %v605_v24 = vmax.f32 %v577_v18, 0.0  ;;  %1646 = vmatpush.bf16.msrb.mxu2 %v3477_v8  ;;  %1682 = vmatpush.bf16.msrb.mxu3 %v3525_v11  ;;  %v3504_v11 = vld [vmem:[%s5696_s7 + $0x270] sm:$0xf] }
 0x104   :  { %v623_v34 = vpack.c.bf16 %v605_v24, %v604_v19  ;;  %v498_v35 = vpop.f32.mrf.mxu2  ;;  %v3473_v19 = vor.u32 %v4068_v13, %v3472_v12  ;;  %v3466_v24 = vld [vmem:[%s5696_s7 + $0x228] sm:$0xf0]  ;;  %v4076_v12 = vld [vmem:[%s5696_s7 + $0x274] sm:$0xf0] }
 0x105   :  { %v499_v42 = vadd.f32 %v498_v35, %v288_v25  ;;  %v542_v43 = vpop.f32.mrf.mxu3  ;;  %v290_v52 = vpop.f32.mrf.mxu0  ;;  %v3080_v54 = vld [vmem:[#allocation2 + $0x40] sm:$0xf]  ;;  %v3983_v61 = vld [vmem:[#allocation2 + $0x44] sm:$0xf]  ;;  %v3521_v25 = vor.u32 %v4080_v22, %v3520_v17  ;;  %v3469_v26 = vor.u32 %v4065_v23, %v3466_v24  ;;  %v3505_v17 = vor.u32 %v4076_v12, %v3504_v11 }
 0x106   :  { %640 = vst.msk [vmem:[#allocation2 + $0x48] sm:$0xff] %vm4706_vm2, %v623_v34  ;;  %v543_v46 = vadd.f32 %v542_v43, %v332_v29  ;;  %v334_v55 = vpop.f32.mrf.mxu1  ;;  %1578 = vmatpush.bf16.msrb.mxu0 %v3473_v19  ;;  %v3517_v29 = vor.u32 %v4077_v27, %v3514_v28  ;;  %v4063_v43 = vld [vmem:[%s5696_s7 + $0x214] sm:$0xf]  ;;  %v4062_v19 = vld [vmem:[%s5696_s7 + $0x204] sm:$0xf0] }
 0x107   :  { %v578_v47 = vadd.f32 %v4675_v57, %v499_v42  ;;  %1614 = vmatpush.bf16.msrb.mxu1 %v3521_v25  ;;  %1647 = vmatpush.bf16.msrb.mxu2 %v3469_v26  ;;  %v4078_v42 = vld [vmem:[%s5696_s7 + $0x284] sm:$0xf0]  ;;  %v4059_v25 = vld [vmem:[%s5696_s7 + $0x1f4] sm:$0xf]  ;;  %v3442_v26 = vld [vmem:[%s5696_s7 + $0x1f8] sm:$0xf0] }
 0x108   :  { %v579_v48 = vadd.f32 %v4677_v59, %v543_v46  ;;  %1683 = vmatpush.bf16.msrb.mxu3 %v3517_v29  ;;  %v3513_v45 = vor.u32 %v4078_v42, %v3512_v38  ;;  %v3461_v46 = vor.u32 %v4063_v43, %v3458_v44  ;;  %v4073_v27 = vld [vmem:[%s5696_s7 + $0x264] sm:$0xf]  ;;  %v3440_v43 = vld [vmem:[%s5696_s7 + $0x1f0] sm:$0xf]  ;;  %v4060_v44 = vld [vmem:[%s5696_s7 + $0x1f4] sm:$0xf0] }
 0x109   :  { %v606_v49 = vmax.f32 %v578_v47, 0.0  ;;  %v3456_v47 = vld [vmem:[%s5696_s7 + $0x210] sm:$0xf] }
 0x10a   :  { %v607_v50 = vmax.f32 %v579_v48, 0.0  ;;  %v4064_v48 = vld [vmem:[%s5696_s7 + $0x214] sm:$0xf0]  ;;  %1579 = vmatpush.bf16.msrb.mxu0 %v3465_v41 }
 0x10b   :  { %1615 = vmatpush.bf16.msrb.mxu1 %v3513_v45  ;;  %1648 = vmatpush.bf16.msrb.mxu2 %v3461_v46  ;;  %v3441_v45 = vor.u32 %v4060_v44, %v3440_v43  ;;  %v4057_v46 = vld [vmem:[%s5696_s7 + $0x1e4] sm:$0xf] }
 0x10c   :  { %v624_v51 = vpack.c.bf16 %v607_v50, %v606_v49  ;;  %v500_v53 = vpop.f32.mrf.mxu2  ;;  %v4075_v49 = vld [vmem:[%s5696_s7 + $0x274] sm:$0xf]  ;;  %v3457_v50 = vor.u32 %v4064_v48, %v3456_v47  ;;  %v3434_v47 = vld [vmem:[%s5696_s7 + $0x1e8] sm:$0xf0] }
 0x10d   :  { %v501_v56 = vadd.f32 %v500_v53, %v290_v52  ;;  %v544_v58 = vpop.f32.mrf.mxu3  ;;  %v3984_v60 = vld [vmem:[#allocation2 + $0x44] sm:$0xf0]  ;;  %v3082_v62 = vld [vmem:[#allocation2 + $0x48] sm:$0xf0]  ;;  %v4061_v52 = vld [vmem:[%s5696_s7 + $0x204] sm:$0xf]  ;;  %v3437_v48 = vor.u32 %v4057_v46, %v3434_v47 }
 0x10e   :  { %641 = vst.msk [vmem:[#allocation2 + $0x50] sm:$0xff] %vm4706_vm2, %v624_v51  ;;  %v545_v63 = vadd.f32 %v544_v58, %v334_v55  ;;  %v4950_v0 = vor.u32 %v3984_v60, %v3080_v54  ;;  %v4952_v1 = vor.u32 %v3983_v61, %v3082_v62  ;;  %v3506_v51 = vld [vmem:[%s5696_s7 + $0x278] sm:$0xf0]  ;;  %v3450_v53 = vld [vmem:[%s5696_s7 + $0x208] sm:$0xf0]  ;;  %1580 = vmatpush.bf16.msrb.mxu0 %v3457_v50  ;;  %v293_v60 = vpop.f32.mrf.mxu0  ;;  %v337_v61 = vpop.f32.mrf.mxu1 }
 0x10f   :  { %v580_v2 = vadd.f32 %v4675_v57, %v501_v56  ;;  %v3509_v54 = vor.u32 %v4075_v49, %v3506_v51  ;;  %v3453_v55 = vor.u32 %v4061_v52, %v3450_v53  ;;  %v3976_v56 = vld [vmem:[#allocation2 + $0x4] sm:$0xf0]  ;;  %v3220_v58 = vld [vmem:[#allocation2 + $0x8] sm:$0xf0]  ;;  %1616 = vmatpush.bf16.msrb.mxu1 %v3505_v17  ;;  %v4071_v49 = vld [vmem:[%s5696_s7 + $0x254] sm:$0xf] }
 0x110   :  { %v581_v3 = vadd.f32 %v4677_v59, %v545_v63  ;;  %938 = vmatmul.bf16.gmra.mxu0 %v4950_v0  ;;  %3209 = vmatmul.msk.bf16.gmra.mxu1 %vm899_vm3, %v4952_v1  ;;  %v3218_v63 = vld [vmem:[#allocation2] sm:$0xf]  ;;  %v4058_v51 = vld [vmem:[%s5696_s7 + $0x1e4] sm:$0xf0]  ;;  %v3488_v53 = vld [vmem:[%s5696_s7 + $0x250] sm:$0xf] }
 0x111   :  { %v608_v4 = vmax.f32 %v580_v2, 0.0  ;;  %1006 = vmatmul.bf16.gmra.mxu2 %v4950_v0  ;;  %3214 = vmatmul.msk.bf16.gmra.mxu3 %vm899_vm3, %v4952_v1  ;;  %v3975_v2 = vld [vmem:[#allocation2 + $0x4] sm:$0xf]  ;;  %v3219_v5 = vor.u32 %v3976_v56, %v3218_v63 }
 0x112   :  { %v609_v7 = vmax.f32 %v581_v3, 0.0  ;;  %1684 = vmatpush.bf16.msrb.mxu3 %v3509_v54  ;;  %1649 = vmatpush.bf16.msrb.mxu2 %v3453_v55  ;;  %v3223_v6 = vor.u32 %v3975_v2, %v3220_v58  ;;  %v4072_v54 = vld [vmem:[%s5696_s7 + $0x254] sm:$0xf0]  ;;  %v4055_v55 = vld [vmem:[%s5696_s7 + $0x1d4] sm:$0xf] }
 0x113   :  { %v3489_v56 = vor.u32 %v4072_v54, %v3488_v53  ;;  %v3426_v58 = vld [vmem:[%s5696_s7 + $0x1d8] sm:$0xf0]  ;;  %v4069_v2 = vld [vmem:[%s5696_s7 + $0x244] sm:$0xf] }
 0x114   :  { %v625_v18 = vpack.c.bf16 %v609_v7, %v608_v4  ;;  %v503_v62 = vpop.f32.mrf.mxu2 }
 0x115   :  { %v3088_v30 = vld [vmem:[#allocation2 + $0x50] sm:$0xf]  ;;  %v4013_v32 = vld [vmem:[#allocation2 + $0x54] sm:$0xf]  ;;  %v504_v3 = vadd.f32 %v503_v62, %v293_v60  ;;  %v547_v4 = vpop.f32.mrf.mxu3  ;;  %v3429_v60 = vor.u32 %v4055_v55, %v3426_v58  ;;  %v4056_v62 = vld [vmem:[%s5696_s7 + $0x1d4] sm:$0xf0] }
 0x116   :  { %642 = vst.msk [vmem:[#allocation2 + $0x58] sm:$0xff] %vm4706_vm2, %v625_v18  ;;  %v548_v7 = vadd.f32 %v547_v4, %v337_v61  ;;  %v3448_v18 = vld [vmem:[%s5696_s7 + $0x200] sm:$0xf]  ;;  %v295_v22 = vpop.f32.mrf.mxu0  ;;  %v339_v23 = vpop.f32.mrf.mxu1  ;;  %v3424_v61 = vld [vmem:[%s5696_s7 + $0x1d0] sm:$0xf] }
 0x117   :  { %v582_v8 = vadd.f32 %v4675_v57, %v504_v3  ;;  %v3449_v24 = vor.u32 %v4062_v19, %v3448_v18  ;;  %v3425_v63 = vor.u32 %v4056_v62, %v3424_v61  ;;  %v4053_v3 = vld [vmem:[%s5696_s7 + $0x1c4] sm:$0xf]  ;;  %v3418_v4 = vld [vmem:[%s5696_s7 + $0x1c8] sm:$0xf0]  ;;  %v4045_v58 = vld [vmem:[#allocation2 + $0x34] sm:$0xf] }
 0x118   :  { %v583_v9 = vadd.f32 %v4677_v59, %v548_v7  ;;  %v4070_v7 = vld [vmem:[%s5696_s7 + $0x244] sm:$0xf0] }
 0x119   :  { %v610_v10 = vmax.f32 %v582_v8, 0.0  ;;  %1581 = vmatpush.bf16.msrb.mxu0 %v3449_v24 }
 0x11a   :  { %v611_v13 = vmax.f32 %v583_v9, 0.0  ;;  %v3416_v9 = vld [vmem:[%s5696_s7 + $0x1c0] sm:$0xf] }
 0x11c   :  { %v626_v28 = vpack.c.bf16 %v611_v13, %v610_v10  ;;  %v505_v29 = vpop.f32.mrf.mxu2  ;;  %v4054_v10 = vld [vmem:[%s5696_s7 + $0x1c4] sm:$0xf0] }
 0x11d   :  { %v4014_v31 = vld [vmem:[#allocation2 + $0x54] sm:$0xf0]  ;;  %v3090_v33 = vld [vmem:[#allocation2 + $0x58] sm:$0xf0]  ;;  %1582 = vmatpush.bf16.msrb.mxu0 %v3441_v45  ;;  %v3417_v11 = vor.u32 %v4054_v10, %v3416_v9  ;;  %v4043_v45 = vld [vmem:[#allocation2 + $0x24] sm:$0xf] }
 0x11e   :  { %v3089_v34 = vor.u32 %v4014_v31, %v3088_v30  ;;  %v3093_v35 = vor.u32 %v4013_v32, %v3090_v33  ;;  %v3445_v30 = vor.u32 %v4059_v25, %v3442_v26  ;;  %v3498_v31 = vld [vmem:[%s5696_s7 + $0x268] sm:$0xf0]  ;;  %v506_v32 = vadd.f32 %v505_v29, %v295_v22  ;;  %v549_v33 = vpop.f32.mrf.mxu3  ;;  %643 = vst.msk [vmem:[#allocation2 + $0x60] sm:$0xff] %vm4706_vm2, %v626_v28  ;;  %v3392_v10 = vld [vmem:[#allocation2 + $0x40] sm:$0xf] }
 0x120   :  { %943 = vmatmul.bf16.gmra.mxu0 %v3089_v34  ;;  %3210 = vmatmul.msk.bf16.gmra.mxu1 %vm899_vm3, %v3093_v35  ;;  %v584_v36 = vadd.f32 %v4675_v57, %v506_v32  ;;  %v3496_v57 = vld [vmem:[%s5696_s7 + $0x260] sm:$0xf] }
 0x121   :  { %1011 = vmatmul.bf16.gmra.mxu2 %v3089_v34  ;;  %3215 = vmatmul.msk.bf16.gmra.mxu3 %vm899_vm3, %v3093_v35  ;;  %v3501_v34 = vor.u32 %v4073_v27, %v3498_v31  ;;  %v550_v35 = vadd.f32 %v549_v33, %v339_v23 }
 0x122   :  { %1650 = vmatpush.bf16.msrb.mxu2 %v3445_v30  ;;  %v612_v38 = vmax.f32 %v584_v36, 0.0  ;;  %v4044_v36 = vld [vmem:[#allocation2 + $0x24] sm:$0xf0] }
 0x123   :  { %1685 = vmatpush.bf16.msrb.mxu3 %v3501_v34  ;;  %v585_v37 = vadd.f32 %v4677_v59, %v550_v35  ;;  %v4074_v59 = vld [vmem:[%s5696_s7 + $0x264] sm:$0xf0] }
 0x124   :  { %v3497_v16 = vor.u32 %v4074_v59, %v3496_v57 }
 0x125   :  { %v613_v41 = vmax.f32 %v585_v37, 0.0  ;;  %v3378_v37 = vld [vmem:[#allocation2 + $0x28] sm:$0xf0] }
 0x126   :  { %1617 = vmatpush.bf16.msrb.mxu1 %v3497_v16  ;;  %1651 = vmatpush.bf16.msrb.mxu2 %v3437_v48  ;;  %v3381_v59 = vor.u32 %v4043_v45, %v3378_v37  ;;  %v4049_v37 = vld [vmem:[#allocation2 + $0x54] sm:$0xf] }
 0x127   :  { %v627_v42 = vpack.c.bf16 %v613_v41, %v612_v38 }
 0x129   :  { %644 = vst.msk [vmem:[#allocation2 + $0x68] sm:$0xff] %vm4706_vm2, %v627_v42 }
 0x12a   :  { %1618 = vmatpush.bf16.msrb.mxu1 %v3489_v56  ;;  %1652 = vmatpush.bf16.msrb.mxu2 %v3429_v60  ;;  %v3384_v56 = vld [vmem:[#allocation2 + $0x30] sm:$0xf] }
 0x130   :  { %1211 = vmatmul.bf16.vlgmr.msra.gmra.mxu0 %v3219_v5  ;;  %3336 = vmatmul.msk.bf16.vlgmr.msra.gmra.mxu1 %vm899_vm3, %v3223_v6 }
 0x131   :  { %1279 = vmatmul.bf16.vlgmr.msra.gmra.mxu2 %v3219_v5  ;;  %3341 = vmatmul.msk.bf16.vlgmr.msra.gmra.mxu3 %vm899_vm3, %v3223_v6  ;;  %v3480_v5 = vld [vmem:[%s5696_s7 + $0x240] sm:$0xf]  ;;  %v3421_v6 = vor.u32 %v4053_v3, %v3418_v4  ;;  %v4048_v4 = vld [vmem:[#allocation2 + $0x44] sm:$0xf0] }
 0x132   :  { %v3481_v8 = vor.u32 %v4070_v7, %v3480_v5  ;;  %v3394_v5 = vld [vmem:[#allocation2 + $0x48] sm:$0xf0] }
 0x133   :  { %1653 = vmatpush.bf16.msrb.mxu2 %v3421_v6 }
 0x134   :  { %1619 = vmatpush.bf16.msrb.mxu1 %v3481_v8 }
 0x140   :  { %1216 = vmatmul.bf16.gmra.mxu0 %v4782_v39  ;;  %3337 = vmatmul.msk.bf16.gmra.mxu1 %vm899_vm3, %v4784_v40 }
 0x141   :  { %1284 = vmatmul.bf16.gmra.mxu2 %v4782_v39  ;;  %3342 = vmatmul.msk.bf16.gmra.mxu3 %vm899_vm3, %v4784_v40  ;;  %v3490_v39 = vld [vmem:[%s5696_s7 + $0x258] sm:$0xf0]  ;;  %v3432_v40 = vld [vmem:[%s5696_s7 + $0x1e0] sm:$0xf] }
 0x142   :  { %v3493_v50 = vor.u32 %v4071_v49, %v3490_v39  ;;  %v3433_v52 = vor.u32 %v4058_v51, %v3432_v40  ;;  %v4046_v40 = vld [vmem:[#allocation2 + $0x34] sm:$0xf0] }
 0x143   :  { %v3385_v61 = vor.u32 %v4046_v40, %v3384_v56  ;;  %v3410_v40 = vld [vmem:[#allocation2 + $0x68] sm:$0xf0] }
 0x144   :  { %1686 = vmatpush.bf16.msrb.mxu3 %v3493_v50  ;;  %1583 = vmatpush.bf16.msrb.mxu0 %v3433_v52  ;;  %v3386_v50 = vld [vmem:[#allocation2 + $0x38] sm:$0xf0] }
 0x145   :  { %v3389_v62 = vor.u32 %v4045_v58, %v3386_v50 }
 0x148   :  { %1584 = vmatpush.bf16.msrb.mxu0 %v3425_v63 }
 0x14c   :  { %1585 = vmatpush.bf16.msrb.mxu0 %v3417_v11  ;;  %v4047_v11 = vld [vmem:[#allocation2 + $0x44] sm:$0xf] }
 0x150   :  { %1221 = vmatmul.bf16.gmra.mxu0 %v4830_v20  ;;  %3338 = vmatmul.msk.bf16.gmra.mxu1 %vm899_vm3, %v4832_v21 }
 0x151   :  { %1289 = vmatmul.bf16.gmra.mxu2 %v4830_v20  ;;  %3343 = vmatmul.msk.bf16.gmra.mxu3 %vm899_vm3, %v4832_v21  ;;  %v3482_v20 = vld [vmem:[%s5696_s7 + $0x248] sm:$0xf0] }
 0x152   :  { %v3485_v21 = vor.u32 %v4069_v2, %v3482_v20 }
 0x154   :  { %1687 = vmatpush.bf16.msrb.mxu3 %v3485_v21 }
 0x15d   :  { %v924_v12 = vpop.f32.mrf.mxu0  ;;  %v958_v13 = vpop.f32.mrf.mxu1 }
 0x15e   :  { %v5156_v17 = vadd.f32 %v958_v13, %v924_v12  ;;  %v3393_v13 = vor.u32 %v4048_v4, %v3392_v10 }
 0x160   :  { %1226 = vmatmul.bf16.gmra.mxu0 %v4902_v14  ;;  %3339 = vmatmul.msk.bf16.gmra.mxu1 %vm899_vm3, %v4904_v15 }
 0x161   :  { %1294 = vmatmul.bf16.gmra.mxu2 %v4902_v14  ;;  %3344 = vmatmul.msk.bf16.gmra.mxu3 %vm899_vm3, %v4904_v15 }
 0x164   :  { %v992_v18 = vpop.f32.mrf.mxu2  ;;  %v1026_v19 = vpop.f32.mrf.mxu3 }
 0x165   :  { %v5164_v22 = vadd.f32 %v1026_v19, %v992_v18  ;;  %v926_v23 = vpop.f32.mrf.mxu0  ;;  %v960_v24 = vpop.f32.mrf.mxu1  ;;  %v3397_v18 = vor.u32 %v4047_v11, %v3394_v5 }
 0x166   :  { %v5166_v25 = vadd.f32 %v960_v24, %v926_v23 }
 0x16c   :  { %v994_v26 = vpop.f32.mrf.mxu2  ;;  %v1028_v27 = vpop.f32.mrf.mxu3 }
 0x16d   :  { %v5168_v28 = vadd.f32 %v1028_v27, %v994_v26  ;;  %v929_v29 = vpop.f32.mrf.mxu0  ;;  %v963_v30 = vpop.f32.mrf.mxu1 }
 0x16e   :  { %v5170_v31 = vadd.f32 %v963_v30, %v929_v29  ;;  %v4050_v29 = vld [vmem:[#allocation2 + $0x54] sm:$0xf0]  ;;  %v3402_v30 = vld [vmem:[#allocation2 + $0x58] sm:$0xf0] }
 0x170   :  { %1231 = vmatmul.bf16.gmra.mxu0 %v4950_v0  ;;  %3340 = vmatmul.msk.bf16.gmra.mxu1 %vm899_vm3, %v4952_v1 }
 0x171   :  { %1299 = vmatmul.bf16.gmra.mxu2 %v4950_v0  ;;  %3345 = vmatmul.msk.bf16.gmra.mxu3 %vm899_vm3, %v4952_v1  ;;  %v3376_v0 = vld [vmem:[#allocation2 + $0x20] sm:$0xf] }
 0x172   :  { %v3377_v1 = vor.u32 %v4044_v36, %v3376_v0  ;;  %v3400_v36 = vld [vmem:[#allocation2 + $0x50] sm:$0xf] }
 0x174   :  { %v997_v14 = vpop.f32.mrf.mxu2  ;;  %v1031_v15 = vpop.f32.mrf.mxu3 }
 0x175   :  { %v5178_v32 = vadd.f32 %v1031_v15, %v997_v14  ;;  %v931_v33 = vpop.f32.mrf.mxu0  ;;  %v965_v34 = vpop.f32.mrf.mxu1 }
 0x176   :  { %v5180_v35 = vadd.f32 %v965_v34, %v931_v33 }
 0x17c   :  { %v999_v38 = vpop.f32.mrf.mxu2  ;;  %v1033_v41 = vpop.f32.mrf.mxu3 }
 0x17d   :  { %v5182_v42 = vadd.f32 %v1033_v41, %v999_v38  ;;  %v934_v43 = vpop.f32.mrf.mxu0  ;;  %v968_v44 = vpop.f32.mrf.mxu1  ;;  %v3401_v41 = vor.u32 %v4050_v29, %v3400_v36 }
 0x17e   :  { %v5184_v57 = vadd.f32 %v968_v44, %v934_v43  ;;  %v3405_v43 = vor.u32 %v4049_v37, %v3402_v30  ;;  %v4104_v37 = vld [vmem:[%s5700_s26 + $0x78] sm:$0xff] }
 0x180   :  { %1586 = vmatmul.bf16.vlgmr.msrb.gmra.mxu0 %v3377_v1  ;;  %3526 = vmatmul.msk.bf16.vlgmr.msrb.gmra.mxu1 %vm899_vm3, %v3381_v59 }
 0x181   :  { %1654 = vmatmul.bf16.vlgmr.msrb.gmra.mxu2 %v3377_v1  ;;  %3531 = vmatmul.msk.bf16.vlgmr.msrb.gmra.mxu3 %vm899_vm3, %v3381_v59 }
 0x184   :  { %v1002_v16 = vpop.f32.mrf.mxu2  ;;  %v1036_v46 = vpop.f32.mrf.mxu3 }
 0x185   :  { %v5188_v47 = vadd.f32 %v1036_v46, %v1002_v16  ;;  %v936_v48 = vpop.f32.mrf.mxu0  ;;  %v970_v49 = vpop.f32.mrf.mxu1 }
 0x186   :  { %v5190_v39 = vadd.f32 %v970_v49, %v936_v48  ;;  %v4052_v48 = vld [vmem:[#allocation2 + $0x64] sm:$0xf0]  ;;  %v4051_v49 = vld [vmem:[#allocation2 + $0x64] sm:$0xf] }
 0x18c   :  { %v1004_v51 = vpop.f32.mrf.mxu2  ;;  %v1038_v52 = vpop.f32.mrf.mxu3 }
 0x18d   :  { %v5192_v53 = vadd.f32 %v1038_v52, %v1004_v51  ;;  %v939_v54 = vpop.f32.mrf.mxu0  ;;  %v973_v55 = vpop.f32.mrf.mxu1 }
 0x18e   :  { %v5194_v60 = vadd.f32 %v973_v55, %v939_v54 }
 0x190   :  { %1591 = vmatmul.bf16.gmra.mxu0 %v3385_v61  ;;  %3527 = vmatmul.msk.bf16.gmra.mxu1 %vm899_vm3, %v3389_v62 }
 0x191   :  { %1659 = vmatmul.bf16.gmra.mxu2 %v3385_v61  ;;  %3532 = vmatmul.msk.bf16.gmra.mxu3 %vm899_vm3, %v3389_v62  ;;  %v4106_v61 = vld [vmem:[%s5700_s26 + $0x88] sm:$0xff]  ;;  %v4108_v62 = vld [vmem:[%s5700_s26 + $0x98] sm:$0xff] }
 0x192   :  { %1948 = vmatpush.bf16.msra.mxu0 %v4106_v61  ;;  %1978 = vmatpush.bf16.msra.mxu1 %v4108_v62 }
 0x194   :  { %v1007_v63 = vpop.f32.mrf.mxu2  ;;  %v1041_v2 = vpop.f32.mrf.mxu3 }
 0x195   :  { %v5198_v20 = vadd.f32 %v1041_v2, %v1007_v63  ;;  %v5200_v21 = vpop.f32.mrf.mxu0  ;;  %v5202_v3 = vpop.f32.mrf.mxu1 }
 0x19c   :  { %v5204_v6 = vpop.f32.mrf.mxu2  ;;  %v5206_v7 = vpop.f32.mrf.mxu3 }
 0x19d   :  { %v944_v8 = vpop.f32.mrf.mxu0  ;;  %v978_v9 = vpop.f32.mrf.mxu1 }
 0x19e   :  { %v5208_v12 = vadd.f32 %v978_v9, %v944_v8  ;;  %v4105_v9 = vld [vmem:[%s5700_s26 + $0x80] sm:$0xff] }
 0x19f   :  { %1949 = vmatpush.bf16.msra.mxu0 %v4105_v9 }
 0x1a0   :  { %1596 = vmatmul.bf16.gmra.mxu0 %v3393_v13  ;;  %3528 = vmatmul.msk.bf16.gmra.mxu1 %vm899_vm3, %v3397_v18 }
 0x1a1   :  { %1664 = vmatmul.bf16.gmra.mxu2 %v3393_v13  ;;  %3533 = vmatmul.msk.bf16.gmra.mxu3 %vm899_vm3, %v3397_v18 }
 0x1a3   :  { %1950 = vmatpush.bf16.msra.mxu0 %v4104_v37 }
 0x1a4   :  { %v1012_v19 = vpop.f32.mrf.mxu2  ;;  %v1046_v23 = vpop.f32.mrf.mxu3 }
 0x1a5   :  { %v5212_v24 = vadd.f32 %v1046_v23, %v1012_v19  ;;  %v5214_v26 = vpop.f32.mrf.mxu0  ;;  %v5216_v27 = vpop.f32.mrf.mxu1 }
 0x1ac   :  { %v5218_v14 = vpop.f32.mrf.mxu2  ;;  %v5220_v15 = vpop.f32.mrf.mxu3 }
 0x1ad   :  { %v1212_v33 = vpop.f32.mrf.mxu0  ;;  %v1246_v34 = vpop.f32.mrf.mxu1 }
 0x1ae   :  { %v1213_v38 = vadd.f32 %v1212_v33, %v5156_v17  ;;  %v3408_v17 = vld [vmem:[#allocation2 + $0x60] sm:$0xf] }
 0x1af   :  { %v3409_v56 = vor.u32 %v4052_v48, %v3408_v17  ;;  %v4103_v17 = vld [vmem:[%s5700_s26 + $0x70] sm:$0xff]  ;;  %v4094_v48 = vld [vmem:[%s5700_s26 + $0x38] sm:$0xff] }
 0x1b0   :  { %v5223_v44 = vadd.f32 %v1246_v34, %v1213_v38  ;;  %1601 = vmatmul.bf16.gmra.mxu0 %v3401_v41  ;;  %3529 = vmatmul.msk.bf16.gmra.mxu1 %vm899_vm3, %v3405_v43 }
 0x1b1   :  { %1669 = vmatmul.bf16.gmra.mxu2 %v3401_v41  ;;  %3534 = vmatmul.msk.bf16.gmra.mxu3 %vm899_vm3, %v3405_v43 }
 0x1b2   :  { %1951 = vmatpush.bf16.msra.mxu0 %v4103_v17  ;;  %2068 = vmatpush.bf16.msra.mxu2 %v4094_v48 }
 0x1b4   :  { %v1280_v0 = vpop.f32.mrf.mxu2  ;;  %v1314_v45 = vpop.f32.mrf.mxu3 }
 0x1b5   :  { %v1281_v1 = vadd.f32 %v1280_v0, %v5164_v22  ;;  %v5228_v59 = vpop.f32.mrf.mxu0  ;;  %v5230_v16 = vpop.f32.mrf.mxu1  ;;  %v3413_v22 = vor.u32 %v4051_v49, %v3410_v40 }
 0x1b7   :  { %v5232_v46 = vadd.f32 %v1314_v45, %v1281_v1 }
 0x1bc   :  { %v5234_v50 = vpop.f32.mrf.mxu2  ;;  %v5236_v51 = vpop.f32.mrf.mxu3 }
 0x1bd   :  { %v1217_v52 = vpop.f32.mrf.mxu0  ;;  %v1251_v54 = vpop.f32.mrf.mxu1 }
 0x1be   :  { %v1218_v55 = vadd.f32 %v1217_v52, %v5170_v31 }
 0x1c0   :  { %v5239_v58 = vadd.f32 %v1251_v54, %v1218_v55  ;;  %1606 = vmatmul.bf16.gmra.mxu0 %v3409_v56  ;;  %3530 = vmatmul.msk.bf16.gmra.mxu1 %vm899_vm3, %v3413_v22  ;;  %v4093_v54 = vld [vmem:[%s5700_s26 + $0x30] sm:$0xff] }
 0x1c1   :  { %1674 = vmatmul.bf16.gmra.mxu2 %v3409_v56  ;;  %3535 = vmatmul.msk.bf16.gmra.mxu3 %vm899_vm3, %v3413_v22 }
 0x1c2   :  { %2069 = vmatpush.bf16.msra.mxu2 %v4093_v54 }
 0x1c4   :  { %v1285_v31 = vpop.f32.mrf.mxu2  ;;  %v1319_v63 = vpop.f32.mrf.mxu3 }
 0x1c5   :  { %v1286_v2 = vadd.f32 %v1285_v31, %v5178_v32  ;;  %v5250_v4 = vpop.f32.mrf.mxu0  ;;  %v5252_v5 = vpop.f32.mrf.mxu1  ;;  %v4102_v31 = vld [vmem:[%s5700_s26 + $0x68] sm:$0xff] }
 0x1c6   :  { %1952 = vmatpush.bf16.msra.mxu0 %v4102_v31 }
 0x1c7   :  { %v5254_v8 = vadd.f32 %v1319_v63, %v1286_v2  ;;  %v4107_v63 = vld [vmem:[%s5700_s26 + $0x90] sm:$0xff]  ;;  %v4096_v2 = vld [vmem:[%s5700_s26 + $0x48] sm:$0xff] }
 0x1c8   :  { %1979 = vmatpush.bf16.msra.mxu1 %v4107_v63  ;;  %2098 = vmatpush.bf16.msra.mxu3 %v4096_v2  ;;  %v1215_v2 = vadd.f32 %v5228_v59, %v5166_v25 }
 0x1cc   :  { %v5259_v10 = vpop.f32.mrf.mxu2  ;;  %v5261_v11 = vpop.f32.mrf.mxu3 }
 0x1cd   :  { %v1222_v13 = vpop.f32.mrf.mxu0  ;;  %v1256_v18 = vpop.f32.mrf.mxu1 }
 0x1ce   :  { %v1223_v19 = vadd.f32 %v1222_v13, %v5184_v57 }
 0x1d0   :  { %v5264_v32 = vadd.f32 %v1256_v18, %v1223_v19 }
 0x1d4   :  { %v1290_v23 = vpop.f32.mrf.mxu2  ;;  %v1324_v29 = vpop.f32.mrf.mxu3 }
 0x1d5   :  { %v1291_v30 = vadd.f32 %v1290_v23, %v5188_v47  ;;  %v5267_v33 = vpop.f32.mrf.mxu0  ;;  %v5269_v34 = vpop.f32.mrf.mxu1 }
 0x1d7   :  { %v5271_v36 = vadd.f32 %v1324_v29, %v1291_v30  ;;  %v4090_v30 = vld [vmem:[%s5700_s26 + $0x18] sm:$0xff] }
 0x1dc   :  { %v5276_v38 = vpop.f32.mrf.mxu2  ;;  %v5278_v57 = vpop.f32.mrf.mxu3 }
 0x1dd   :  { %v1227_v41 = vpop.f32.mrf.mxu0  ;;  %v1261_v43 = vpop.f32.mrf.mxu1 }
 0x1de   :  { %v1228_v0 = vadd.f32 %v1227_v41, %v5194_v60  ;;  %v4101_v41 = vld [vmem:[%s5700_s26 + $0x60] sm:$0xff] }
 0x1df   :  { %1953 = vmatpush.bf16.msra.mxu0 %v4101_v41 }
 0x1e0   :  { %v5281_v47 = vadd.f32 %v1261_v43, %v1228_v0  ;;  %v1049_v43 = vadd.f32 %v5220_v15, %v5218_v14  ;;  %v4087_v14 = vld [vmem:[%s5700_s26] sm:$0xff] }
 0x1e1   :  { %v4095_v15 = vld [vmem:[%s5700_s26 + $0x40] sm:$0xff] }
 0x1e2   :  { %2099 = vmatpush.bf16.msra.mxu3 %v4095_v15 }
 0x1e4   :  { %v1295_v45 = vpop.f32.mrf.mxu2  ;;  %v1329_v1 = vpop.f32.mrf.mxu3 }
 0x1e5   :  { %v1296_v49 = vadd.f32 %v1295_v45, %v5198_v20  ;;  %v5290_v40 = vpop.f32.mrf.mxu0  ;;  %v5292_v52 = vpop.f32.mrf.mxu1  ;;  %v4092_v20 = vld [vmem:[%s5700_s26 + $0x28] sm:$0xff] }
 0x1e6   :  { %2070 = vmatpush.bf16.msra.mxu2 %v4092_v20 }
 0x1e7   :  { %v5294_v60 = vadd.f32 %v1329_v1, %v1296_v49  ;;  %v4088_v49 = vld [vmem:[%s5700_s26 + $0x8] sm:$0xff] }
 0x1ec   :  { %v5299_v55 = vpop.f32.mrf.mxu2  ;;  %v5301_v56 = vpop.f32.mrf.mxu3 }
 0x1ed   :  { %v1232_v22 = vpop.f32.mrf.mxu0  ;;  %v1266_v61 = vpop.f32.mrf.mxu1 }
 0x1ee   :  { %v1233_v62 = vadd.f32 %v1232_v22, %v5208_v12  ;;  %v4091_v12 = vld [vmem:[%s5700_s26 + $0x20] sm:$0xff] }
 0x1ef   :  { %2071 = vmatpush.bf16.msra.mxu2 %v4091_v12 }
 0x1f0   :  { %v5316_v9 = vadd.f32 %v1266_v61, %v1233_v62  ;;  %v1734_v61 = vld [vmem:[%s5701_s25] sm:$0x3] }
 0x1f1   :  { %v5354_v62 = vperm.slane %v1734_v61, 0 }
 0x1f3   :  { %2072 = vmatpush.bf16.msra.mxu2 %v4090_v30 }
 0x1f4   :  { %v1300_v13 = vpop.f32.mrf.mxu2  ;;  %v1334_v18 = vpop.f32.mrf.mxu3 }
 0x1f5   :  { %v1301_v19 = vadd.f32 %v1300_v13, %v5212_v24  ;;  %v5322_v23 = vpop.f32.mrf.mxu0  ;;  %v5324_v29 = vpop.f32.mrf.mxu1  ;;  %v4089_v24 = vld [vmem:[%s5700_s26 + $0x10] sm:$0xff]  ;;  %v5358_v13 = vperm.slane %v1734_v61, 1 }
 0x1f7   :  { %v5329_v37 = vadd.f32 %v1334_v18, %v1301_v19  ;;  %2073 = vmatpush.bf16.msra.mxu2 %v4089_v24 }
 0x1fb   :  { %2074 = vmatpush.bf16.msra.mxu2 %v4088_v49 }
 0x1fc   :  { %v1302_v0 = vpop.f32.mrf.mxu2  ;;  %v1336_v45 = vpop.f32.mrf.mxu3 }
 0x1fd   :  { %v1303_v1 = vadd.f32 %v1302_v0, %v1049_v43  ;;  %v1587_v17 = vpop.f32.mrf.mxu0  ;;  %v1621_v48 = vpop.f32.mrf.mxu1  ;;  %v1249_v43 = vadd.f32 %v5230_v16, %v1215_v2  ;;  %v1283_v0 = vadd.f32 %v5234_v50, %v5168_v28 }
 0x1fe   :  { %v1622_v22 = vadd.f32 %v1621_v48, %v1587_v17 }
 0x1ff   :  { %v5342_v54 = vadd.f32 %v1336_v45, %v1303_v1  ;;  %2075 = vmatpush.bf16.msra.mxu2 %v4087_v14  ;;  %v1317_v49 = vadd.f32 %v5236_v51, %v1283_v0 }
 0x200   :  { %v1714_v20 = vadd.f32 %v1622_v22, %v5223_v44  ;;  %v4100_v44 = vld [vmem:[%s5700_s26 + $0x58] sm:$0xff] }
 0x201   :  { %1954 = vmatpush.bf16.msra.mxu0 %v4100_v44 }
 0x202   :  { %v1740_v30 = vadd.f32 %v5354_v62, %v1714_v20  ;;  %v4099_v20 = vld [vmem:[%s5700_s26 + $0x50] sm:$0xff] }
 0x204   :  { %v1655_v31 = vpop.f32.mrf.mxu2  ;;  %v1689_v63 = vpop.f32.mrf.mxu3  ;;  %v1760_v59 = vmax.f32 %v1740_v30, 0.0 }
 0x205   :  { %v1690_v12 = vadd.f32 %v1689_v63, %v1655_v31  ;;  %v1589_v18 = vpop.f32.mrf.mxu0  ;;  %v1623_v19 = vpop.f32.mrf.mxu1  ;;  %1955 = vmatpush.bf16.msra.mxu0 %v4099_v20 }
 0x206   :  { %v1624_v24 = vadd.f32 %v1623_v19, %v1589_v18 }
 0x207   :  { %v1715_v41 = vadd.f32 %v1690_v12, %v5232_v46  ;;  %v1220_v12 = vadd.f32 %v5250_v4, %v5180_v35  ;;  %v4124_v35 = vld [vmem:[%s5700_s26 + $0xe8] sm:$0xff] }
 0x208   :  { %v1716_v1 = vadd.f32 %v1624_v24, %v1249_v43  ;;  %2269 = vmatpush.bf16.msrb.mxu1 %v4124_v35 }
 0x209   :  { %v1741_v25 = vadd.f32 %v5358_v13, %v1715_v41  ;;  %v1254_v4 = vadd.f32 %v5252_v5, %v1220_v12 }
 0x20a   :  { %v1742_v50 = vadd.f32 %v5354_v62, %v1716_v1 }
 0x20b   :  { %v1761_v45 = vmax.f32 %v1741_v25, 0.0 }
 0x20c   :  { %v1657_v17 = vpop.f32.mrf.mxu2  ;;  %v1691_v48 = vpop.f32.mrf.mxu3  ;;  %v1762_v63 = vmax.f32 %v1742_v50, 0.0 }
 0x20d   :  { %v1780_v16 = vpack.c.bf16 %v1761_v45, %v1760_v59  ;;  %v1692_v22 = vadd.f32 %v1691_v48, %v1657_v17  ;;  %v1592_v61 = vpop.f32.mrf.mxu0  ;;  %v1626_v28 = vpop.f32.mrf.mxu1  ;;  %v1288_v59 = vadd.f32 %v5259_v10, %v5182_v42 }
 0x20e   :  { %v1627_v15 = vadd.f32 %v1626_v28, %v1592_v61 }
 0x20f   :  { %1792 = vst.msk [vmem:[#allocation3] sm:$0xff] %vm5370_vm5, %v1780_v16  ;;  %v1717_v14 = vadd.f32 %v1692_v22, %v1317_v49  ;;  %v1322_v16 = vadd.f32 %v5261_v11, %v1288_v59  ;;  %v4121_v11 = vld [vmem:[%s5700_s26 + $0xd0] sm:$0xff] }
 0x210   :  { %v1718_v2 = vadd.f32 %v1627_v15, %v5239_v58  ;;  %v4122_v58 = vld [vmem:[%s5700_s26 + $0xd8] sm:$0xff] }
 0x211   :  { %v1743_v31 = vadd.f32 %v5358_v13, %v1717_v14  ;;  %2239 = vmatpush.bf16.msrb.mxu0 %v4122_v58 }
 0x212   :  { %v1744_v0 = vadd.f32 %v5354_v62, %v1718_v2 }
 0x213   :  { %v1763_v51 = vmax.f32 %v1743_v31, 0.0 }
 0x214   :  { %v1660_v18 = vpop.f32.mrf.mxu2  ;;  %v1694_v19 = vpop.f32.mrf.mxu3  ;;  %v1764_v17 = vmax.f32 %v1744_v0, 0.0 }
 0x215   :  { %v1781_v30 = vpack.c.bf16 %v1763_v51, %v1762_v63  ;;  %v1695_v41 = vadd.f32 %v1694_v19, %v1660_v18  ;;  %v1594_v24 = vpop.f32.mrf.mxu0  ;;  %v1628_v44 = vpop.f32.mrf.mxu1  ;;  %2240 = vmatpush.bf16.msrb.mxu0 %v4121_v11 }
 0x216   :  { %v1629_v43 = vadd.f32 %v1628_v44, %v1594_v24  ;;  %v3625_v14 = vld [vmem:[#allocation3] sm:$0xf]  ;;  %v4081_v10 = vld [vmem:[#allocation3 + $0x4] sm:$0xf] }
 0x217   :  { %1793 = vst.msk [vmem:[#allocation3 + $0x8] sm:$0xff] %vm5370_vm5, %v1781_v30  ;;  %v1719_v25 = vadd.f32 %v1695_v41, %v5254_v8  ;;  %v1225_v30 = vadd.f32 %v5267_v33, %v5190_v39  ;;  %v1293_v33 = vadd.f32 %v5276_v38, %v5192_v53 }
 0x218   :  { %v1720_v1 = vadd.f32 %v1629_v43, %v1254_v4 }
 0x219   :  { %v1745_v45 = vadd.f32 %v5358_v13, %v1719_v25  ;;  %v1259_v39 = vadd.f32 %v5269_v34, %v1225_v30 }
 0x21a   :  { %v1746_v5 = vadd.f32 %v5354_v62, %v1720_v1 }
 0x21b   :  { %v1765_v8 = vmax.f32 %v1745_v45, 0.0  ;;  %v4119_v45 = vld [vmem:[%s5700_s26 + $0xc0] sm:$0xff] }
 0x21c   :  { %v1662_v48 = vpop.f32.mrf.mxu2  ;;  %v1696_v49 = vpop.f32.mrf.mxu3  ;;  %v1766_v12 = vmax.f32 %v1746_v5, 0.0 }
 0x21d   :  { %v1782_v22 = vpack.c.bf16 %v1765_v8, %v1764_v17  ;;  %v1697_v61 = vadd.f32 %v1696_v49, %v1662_v48  ;;  %v1597_v28 = vpop.f32.mrf.mxu0  ;;  %v1631_v50 = vpop.f32.mrf.mxu1  ;;  %v1327_v49 = vadd.f32 %v5278_v57, %v1293_v33  ;;  %v4118_v57 = vld [vmem:[%s5700_s26 + $0xb8] sm:$0xff] }
 0x21e   :  { %v4082_v42 = vld [vmem:[#allocation3 + $0x4] sm:$0xf0]  ;;  %v3627_v15 = vld [vmem:[#allocation3 + $0x8] sm:$0xf0]  ;;  %v1632_v31 = vadd.f32 %v1631_v50, %v1597_v28 }
 0x21f   :  { %1794 = vst.msk [vmem:[#allocation3 + $0x10] sm:$0xff] %vm5370_vm5, %v1782_v22  ;;  %v1721_v20 = vadd.f32 %v1697_v61, %v1322_v16  ;;  %v3626_v63 = vor.u32 %v4082_v42, %v3625_v14  ;;  %v3630_v51 = vor.u32 %v4081_v10, %v3627_v15 }
 0x220   :  { %v1722_v19 = vadd.f32 %v1632_v31, %v5264_v32  ;;  %v4120_v32 = vld [vmem:[%s5700_s26 + $0xc8] sm:$0xff] }
 0x221   :  { %v1747_v2 = vadd.f32 %v5358_v13, %v1721_v20  ;;  %2076 = vmatmul.bf16.vlgmr.msra.gmra.mxu2 %v3626_v63  ;;  %3671 = vmatmul.msk.bf16.vlgmr.msra.gmra.mxu3 %vm1938_vm6, %v3630_v51  ;;  %v4123_v20 = vld [vmem:[%s5700_s26 + $0xe0] sm:$0xff]  ;;  %v976_v63 = vadd.f32 %v5202_v3, %v5200_v21  ;;  %v1044_v21 = vadd.f32 %v5206_v7, %v5204_v6  ;;  %v4116_v6 = vld [vmem:[%s5700_s26 + $0xa8] sm:$0xff] }
 0x222   :  { %v1748_v35 = vadd.f32 %v5354_v62, %v1722_v19  ;;  %2241 = vmatpush.bf16.msrb.mxu0 %v4120_v32  ;;  %2270 = vmatpush.bf16.msrb.mxu1 %v4123_v20 }
 0x223   :  { %v1767_v18 = vmax.f32 %v1747_v2, 0.0 }
 0x224   :  { %v1665_v41 = vpop.f32.mrf.mxu2  ;;  %v1699_v24 = vpop.f32.mrf.mxu3  ;;  %v1768_v17 = vmax.f32 %v1748_v35, 0.0 }
 0x225   :  { %v1783_v44 = vpack.c.bf16 %v1767_v18, %v1766_v12  ;;  %v1700_v43 = vadd.f32 %v1699_v24, %v1665_v41  ;;  %v1599_v0 = vpop.f32.mrf.mxu0  ;;  %v1633_v25 = vpop.f32.mrf.mxu1  ;;  %v1230_v12 = vadd.f32 %v5290_v40, %v976_v63  ;;  %v4117_v40 = vld [vmem:[%s5700_s26 + $0xb0] sm:$0xff] }
 0x226   :  { %v1634_v58 = vadd.f32 %v1633_v25, %v1599_v0  ;;  %v3558_v28 = vld [vmem:[#allocation3 + $0x10] sm:$0xf]  ;;  %2242 = vmatpush.bf16.msrb.mxu0 %v4119_v45  ;;  %v4083_v50 = vld [vmem:[#allocation3 + $0x14] sm:$0xf]  ;;  %v1298_v25 = vadd.f32 %v5299_v55, %v1044_v21 }
 0x227   :  { %1795 = vst.msk [vmem:[#allocation3 + $0x18] sm:$0xff] %vm5370_vm5, %v1783_v44  ;;  %v1723_v4 = vadd.f32 %v1700_v43, %v5271_v36  ;;  %v1264_v0 = vadd.f32 %v5292_v52, %v1230_v12 }
 0x228   :  { %v1724_v1 = vadd.f32 %v1634_v58, %v1259_v39  ;;  %v1332_v39 = vadd.f32 %v5301_v56, %v1298_v25  ;;  %v4115_v56 = vld [vmem:[%s5700_s26 + $0xa0] sm:$0xff] }
 0x229   :  { %v1749_v59 = vadd.f32 %v5358_v13, %v1723_v4 }
 0x22a   :  { %v1750_v53 = vadd.f32 %v5354_v62, %v1724_v1  ;;  %2243 = vmatpush.bf16.msrb.mxu0 %v4118_v57 }
 0x22b   :  { %v1769_v8 = vmax.f32 %v1749_v59, 0.0 }
 0x22c   :  { %v1667_v36 = vpop.f32.mrf.mxu2  ;;  %v1701_v48 = vpop.f32.mrf.mxu3  ;;  %v1770_v51 = vmax.f32 %v1750_v53, 0.0 }
 0x22d   :  { %v1784_v16 = vpack.c.bf16 %v1769_v8, %v1768_v17  ;;  %v1702_v22 = vadd.f32 %v1701_v48, %v1667_v36  ;;  %v1602_v34 = vpop.f32.mrf.mxu0  ;;  %v1636_v61 = vpop.f32.mrf.mxu1 }
 0x22e   :  { %v4084_v38 = vld [vmem:[#allocation3 + $0x14] sm:$0xf0]  ;;  %v3560_v14 = vld [vmem:[#allocation3 + $0x18] sm:$0xf0]  ;;  %v1637_v42 = vadd.f32 %v1636_v61, %v1602_v34  ;;  %2244 = vmatpush.bf16.msrb.mxu0 %v4117_v40  ;;  %v981_v61 = vadd.f32 %v5216_v27, %v5214_v26 }
 0x22f   :  { %1796 = vst.msk [vmem:[#allocation3 + $0x20] sm:$0xff] %vm5370_vm5, %v1784_v16  ;;  %v1725_v5 = vadd.f32 %v1702_v22, %v1327_v49  ;;  %v3559_v10 = vor.u32 %v4084_v38, %v3558_v28  ;;  %v3563_v15 = vor.u32 %v4083_v50, %v3560_v14 }
 0x230   :  { %v1726_v2 = vadd.f32 %v1637_v42, %v5281_v47 }
 0x231   :  { %v1751_v31 = vadd.f32 %v5358_v13, %v1725_v5  ;;  %1956 = vmatmul.bf16.vlgmr.msra.gmra.mxu0 %v3559_v10  ;;  %3620 = vmatmul.msk.bf16.vlgmr.msra.gmra.mxu1 %vm1938_vm6, %v3563_v15  ;;  %v1235_v5 = vadd.f32 %v5322_v23, %v981_v61  ;;  %v4130_v61 = vld [vmem:[%s5666_s9 + $0x20] sm:$0xff] }
 0x232   :  { %2081 = vmatmul.bf16.gmra.mxu2 %v3559_v10  ;;  %3672 = vmatmul.msk.bf16.gmra.mxu3 %vm1938_vm6, %v3563_v15  ;;  %v1752_v3 = vadd.f32 %v5354_v62, %v1726_v2 }
 0x233   :  { %v1771_v11 = vmax.f32 %v1751_v31, 0.0  ;;  %2245 = vmatpush.bf16.msrb.mxu0 %v4116_v6  ;;  %v1269_v31 = vadd.f32 %v5324_v29, %v1235_v5  ;;  %v4128_v5 = vld [vmem:[%s5666_s9 + $0x10] sm:$0xff] }
 0x234   :  { %v1670_v18 = vpop.f32.mrf.mxu2  ;;  %v1704_v19 = vpop.f32.mrf.mxu3  ;;  %v1772_v35 = vmax.f32 %v1752_v3, 0.0 }
 0x235   :  { %v1785_v30 = vpack.c.bf16 %v1771_v11, %v1770_v51  ;;  %v1705_v41 = vadd.f32 %v1704_v19, %v1670_v18  ;;  %v1604_v24 = vpop.f32.mrf.mxu0  ;;  %v1638_v44 = vpop.f32.mrf.mxu1 }
 0x236   :  { %v1639_v43 = vadd.f32 %v1638_v44, %v1604_v24  ;;  %v3566_v1 = vld [vmem:[#allocation3 + $0x20] sm:$0xf]  ;;  %v4085_v8 = vld [vmem:[#allocation3 + $0x24] sm:$0xf] }
 0x237   :  { %1797 = vst.msk [vmem:[#allocation3 + $0x28] sm:$0xff] %vm5370_vm5, %v1785_v30  ;;  %v1727_v47 = vadd.f32 %v1705_v41, %v5294_v60  ;;  %2246 = vmatpush.bf16.msrb.mxu0 %v4115_v56  ;;  %v4109_v6 = vld [vmem:[#allocation3 + $0x24] sm:$0xf]  ;;  %v4131_v56 = vld [vmem:[%s5666_s9 + $0x28] sm:$0xff] }
 0x238   :  { %v1728_v7 = vadd.f32 %v1639_v43, %v1264_v0  ;;  %2455 = vmatpush.bf16.msrb.mxu3 %v4131_v56 }
 0x239   :  { %v1753_v58 = vadd.f32 %v5358_v13, %v1727_v47 }
 0x23a   :  { %v1754_v55 = vadd.f32 %v5354_v62, %v1728_v7 }
 0x23b   :  { %v1773_v4 = vmax.f32 %v1753_v58, 0.0  ;;  %v3696_v58 = vld [vmem:[#allocation3 + $0x20] sm:$0xf] }
 0x23c   :  { %v1672_v32 = vpop.f32.mrf.mxu2  ;;  %v1706_v60 = vpop.f32.mrf.mxu3  ;;  %v1774_v28 = vmax.f32 %v1754_v55, 0.0  ;;  %2456 = vmatpush.bf16.msrb.mxu3 %v4130_v61 }
 0x23d   :  { %v1786_v33 = vpack.c.bf16 %v1773_v4, %v1772_v35  ;;  %v1707_v59 = vadd.f32 %v1706_v60, %v1672_v32  ;;  %v1607_v45 = vpop.f32.mrf.mxu0  ;;  %v1641_v52 = vpop.f32.mrf.mxu1 }
 0x23e   :  { %v4086_v17 = vld [vmem:[#allocation3 + $0x24] sm:$0xf0]  ;;  %v3568_v36 = vld [vmem:[#allocation3 + $0x28] sm:$0xf0]  ;;  %v1642_v49 = vadd.f32 %v1641_v52, %v1607_v45 }
 0x23f   :  { %1798 = vst.msk [vmem:[#allocation3 + $0x30] sm:$0xff] %vm5370_vm5, %v1786_v33  ;;  %v1729_v48 = vadd.f32 %v1707_v59, %v1332_v39  ;;  %v3567_v16 = vor.u32 %v4086_v17, %v3566_v1  ;;  %v3571_v22 = vor.u32 %v4085_v8, %v3568_v36  ;;  %v4110_v0 = vld [vmem:[#allocation3 + $0x24] sm:$0xf0]  ;;  %v3698_v25 = vld [vmem:[#allocation3 + $0x28] sm:$0xf0] }
 0x240   :  { %v1730_v38 = vadd.f32 %v1642_v49, %v5316_v9  ;;  %v3701_v7 = vor.u32 %v4109_v6, %v3698_v25  ;;  %v4138_v36 = vld [vmem:[%s5666_s9 + $0x58] sm:$0xff] }
 0x241   :  { %v1755_v34 = vadd.f32 %v5358_v13, %v1729_v48  ;;  %1961 = vmatmul.bf16.gmra.mxu0 %v3567_v16  ;;  %3621 = vmatmul.msk.bf16.gmra.mxu1 %vm1938_vm6, %v3571_v22 }
 0x242   :  { %2086 = vmatmul.bf16.gmra.mxu2 %v3567_v16  ;;  %3673 = vmatmul.msk.bf16.gmra.mxu3 %vm1938_vm6, %v3571_v22  ;;  %v1756_v20 = vadd.f32 %v5354_v62, %v1730_v38  ;;  %v4129_v38 = vld [vmem:[%s5666_s9 + $0x18] sm:$0xff] }
 0x243   :  { %v1775_v53 = vmax.f32 %v1755_v34, 0.0  ;;  %2397 = vmatpush.bf16.msrb.mxu2 %v4138_v36  ;;  %v4137_v34 = vld [vmem:[%s5666_s9 + $0x50] sm:$0xff]  ;;  %2457 = vmatpush.bf16.msrb.mxu3 %v4129_v38 }
 0x244   :  { %v1675_v50 = vpop.f32.mrf.mxu2  ;;  %v1709_v14 = vpop.f32.mrf.mxu3  ;;  %v1776_v63 = vmax.f32 %v1756_v20, 0.0 }
 0x245   :  { %v1787_v42 = vpack.c.bf16 %v1775_v53, %v1774_v28  ;;  %v1710_v10 = vadd.f32 %v1709_v14, %v1675_v50  ;;  %v1609_v15 = vpop.f32.mrf.mxu0  ;;  %v1643_v57 = vpop.f32.mrf.mxu1  ;;  %v4136_v14 = vld [vmem:[%s5666_s9 + $0x48] sm:$0xff] }
 0x246   :  { %v1644_v27 = vadd.f32 %v1643_v57, %v1609_v15  ;;  %v3574_v19 = vld [vmem:[#allocation3 + $0x30] sm:$0xf]  ;;  %v4097_v41 = vld [vmem:[#allocation3 + $0x34] sm:$0xf]  ;;  %v4127_v57 = vld [vmem:[%s5666_s9 + $0x8] sm:$0xff] }
 0x247   :  { %1799 = vst.msk [vmem:[#allocation3 + $0x38] sm:$0xff] %vm5370_vm5, %v1787_v42  ;;  %v1731_v26 = vadd.f32 %v1710_v10, %v5329_v37  ;;  %v3704_v35 = vld [vmem:[#allocation3 + $0x30] sm:$0xf]  ;;  %v4111_v4 = vld [vmem:[#allocation3 + $0x34] sm:$0xf]  ;;  %2398 = vmatpush.bf16.msrb.mxu2 %v4137_v34  ;;  %2458 = vmatpush.bf16.msrb.mxu3 %v4128_v5 }
 0x248   :  { %v1732_v11 = vadd.f32 %v1644_v27, %v1269_v31  ;;  %v4135_v27 = vld [vmem:[%s5666_s9 + $0x40] sm:$0xff] }
 0x249   :  { %v1757_v9 = vadd.f32 %v5358_v13, %v1731_v26  ;;  %v4126_v31 = vld [vmem:[%s5666_s9] sm:$0xff] }
 0x24a   :  { %v1758_v37 = vadd.f32 %v5354_v62, %v1732_v11  ;;  %v3697_v62 = vor.u32 %v4110_v0, %v3696_v58 }
 0x24b   :  { %v1777_v51 = vmax.f32 %v1757_v9, 0.0  ;;  %2399 = vmatpush.bf16.msrb.mxu2 %v4136_v14  ;;  %2459 = vmatpush.bf16.msrb.mxu3 %v4127_v57 }
 0x24c   :  { %v1677_v23 = vpop.f32.mrf.mxu2  ;;  %v1711_v2 = vpop.f32.mrf.mxu3  ;;  %v1778_v3 = vmax.f32 %v1758_v37, 0.0 }
 0x24d   :  { %v1788_v12 = vpack.c.bf16 %v1777_v51, %v1776_v63  ;;  %v1712_v18 = vadd.f32 %v1711_v2, %v1677_v23 }
 0x24e   :  { %v4098_v30 = vld [vmem:[#allocation3 + $0x34] sm:$0xf0]  ;;  %v3576_v24 = vld [vmem:[#allocation3 + $0x38] sm:$0xf0] }
 0x24f   :  { %1800 = vst.msk [vmem:[#allocation3 + $0x40] sm:$0xff] %vm5370_vm5, %v1788_v12  ;;  %v1733_v29 = vadd.f32 %v1712_v18, %v5342_v54  ;;  %v3575_v44 = vor.u32 %v4098_v30, %v3574_v19  ;;  %v3579_v43 = vor.u32 %v4097_v41, %v3576_v24  ;;  %v4112_v54 = vld [vmem:[#allocation3 + $0x34] sm:$0xf0]  ;;  %2400 = vmatpush.bf16.msrb.mxu2 %v4135_v27  ;;  %v5533_v18 = vld [vmem:[%s5665_s8] ss:$0 sm:$0xff]  ;;  %v4134_v30 = vld [vmem:[%s5666_s9 + $0x38] sm:$0xff] }
 0x250   :  { %v3705_v32 = vor.u32 %v4112_v54, %v3704_v35  ;;  %2460 = vmatpush.bf16.msrb.mxu3 %v4126_v31 }
 0x251   :  { %v1759_v21 = vadd.f32 %v5358_v13, %v1733_v29  ;;  %1966 = vmatmul.bf16.gmra.mxu0 %v3575_v44  ;;  %3622 = vmatmul.msk.bf16.gmra.mxu1 %vm1938_vm6, %v3579_v43  ;;  %v3706_v13 = vld [vmem:[#allocation3 + $0x38] sm:$0xf0]  ;;  %v4133_v44 = vld [vmem:[%s5666_s9 + $0x30] sm:$0xff] }
 0x252   :  { %v3709_v60 = vor.u32 %v4111_v4, %v3706_v13 }
 0x253   :  { %v1779_v47 = vmax.f32 %v1759_v21, 0.0  ;;  %2401 = vmatpush.bf16.msrb.mxu2 %v4134_v30 }
 0x255   :  { %v1789_v40 = vpack.c.bf16 %v1779_v47, %v1778_v3  ;;  %v4145_v3 = vld [vmem:[%s5666_s9 + $0x88] sm:$0xff] }
 0x256   :  { %v3712_v33 = vld [vmem:[#allocation3 + $0x40] sm:$0xf]  ;;  %v4113_v59 = vld [vmem:[#allocation3 + $0x44] sm:$0xf] }
 0x257   :  { %1801 = vst.msk [vmem:[#allocation3 + $0x48] sm:$0xff] %vm5370_vm5, %v1789_v40  ;;  %2402 = vmatpush.bf16.msrb.mxu2 %v4133_v44 }
 0x25b   :  { %2528 = vmatpush.bf16.msra.mxu2 %v4145_v3  ;;  %v4147_v3 = vld [vmem:[%s5669_s11 + $0x8] sm:$0xff] }
 0x25c   :  { %2580 = vmatpush.bf16.msra.mxu3 %v4147_v3 }
 0x25e   :  { %v4114_v46 = vld [vmem:[#allocation3 + $0x44] sm:$0xf0]  ;;  %v3714_v39 = vld [vmem:[#allocation3 + $0x48] sm:$0xf0] }
 0x25f   :  { %v3713_v45 = vor.u32 %v4114_v46, %v3712_v33  ;;  %v3717_v52 = vor.u32 %v4113_v59, %v3714_v39 }
 0x261   :  { %2247 = vmatmul.bf16.vlgmr.msrb.gmra.mxu0 %v3697_v62  ;;  %3758 = vmatmul.msk.bf16.vlgmr.msrb.gmra.mxu1 %vm1938_vm6, %v3701_v7  ;;  %v4144_v62 = vld [vmem:[%s5666_s9 + $0x80] sm:$0xff] }
 0x262   :  { %2529 = vmatpush.bf16.msra.mxu2 %v4144_v62  ;;  %v4161_v62 = vld [vmem:[%s5667_s10] ss:$0 sm:$0xff] }
 0x271   :  { %2252 = vmatmul.bf16.gmra.mxu0 %v3705_v32  ;;  %3759 = vmatmul.msk.bf16.gmra.mxu1 %vm1938_vm6, %v3709_v60  ;;  %v4143_v60 = vld [vmem:[%s5666_s9 + $0x78] sm:$0xff] }
 0x272   :  { %2530 = vmatpush.bf16.msra.mxu2 %v4143_v60 }
 0x281   :  { %2257 = vmatmul.bf16.gmra.mxu0 %v3713_v45  ;;  %3760 = vmatmul.msk.bf16.gmra.mxu1 %vm1938_vm6, %v3717_v52 }
 0x2a4   :  { %v2077_v50 = vpop.f32.mrf.mxu2  ;;  %v2101_v42 = vpop.f32.mrf.mxu3 }
 0x2ac   :  { %v2079_v26 = vpop.f32.mrf.mxu2  ;;  %v2103_v63 = vpop.f32.mrf.mxu3 }
 0x2ae   :  { %v1957_v1 = vpop.f32.mrf.mxu0  ;;  %v1981_v55 = vpop.f32.mrf.mxu1 }
 0x2af   :  { %v1982_v20 = vadd.f32 %v1981_v55, %v1957_v1  ;;  %v4142_v1 = vld [vmem:[%s5666_s9 + $0x70] sm:$0xff] }
 0x2b0   :  { %2531 = vmatpush.bf16.msra.mxu2 %v4142_v1 }
 0x2b1   :  { %v2078_v9 = vadd.f32 %v2077_v50, %v1982_v20  ;;  %v4140_v50 = vld [vmem:[%s5666_s9 + $0x60] sm:$0xff] }
 0x2b3   :  { %v2102_v2 = vadd.f32 %v2101_v42, %v2078_v9 }
 0x2b5   :  { %v2082_v41 = vpop.f32.mrf.mxu2  ;;  %v2106_v47 = vpop.f32.mrf.mxu3 }
 0x2b6   :  { %v1959_v17 = vpop.f32.mrf.mxu0  ;;  %v1983_v8 = vpop.f32.mrf.mxu1 }
 0x2b7   :  { %v1984_v23 = vadd.f32 %v1983_v8, %v1959_v17  ;;  %v4141_v8 = vld [vmem:[%s5666_s9 + $0x68] sm:$0xff] }
 0x2b8   :  { %2532 = vmatpush.bf16.msra.mxu2 %v4141_v8  ;;  %v4178_v8 = vmov 32.0  }
 0x2b9   :  { %v2080_v24 = vadd.f32 %v2079_v26, %v1984_v23  ;;  %4168 = vrcp.f32 %v4178_v8  ;;  %v4165_v8 = vld [vmem:[%s5676_s17] ss:$0 sm:$0xff] }
 0x2bb   :  { %v2104_v25 = vadd.f32 %v2103_v63, %v2080_v24 }
 0x2bc   :  { %2533 = vmatpush.bf16.msra.mxu2 %v4140_v50 }
 0x2bd   :  { %v2084_v13 = vpop.f32.mrf.mxu2  ;;  %v2108_v45 = vpop.f32.mrf.mxu3 }
 0x2be   :  { %v1962_v48 = vpop.f32.mrf.mxu0  ;;  %v1986_v49 = vpop.f32.mrf.mxu1 }
 0x2bf   :  { %v1987_v40 = vadd.f32 %v1986_v49, %v1962_v48 }
 0x2c1   :  { %v2083_v7 = vadd.f32 %v2082_v41, %v1987_v40 }
 0x2c3   :  { %v2107_v33 = vadd.f32 %v2106_v47, %v2083_v7  ;;  %v4146_v47 = vld [vmem:[%s5669_s11] sm:$0xff] }
 0x2c4   :  { %2581 = vmatpush.bf16.msra.mxu3 %v4146_v47 }
 0x2c5   :  { %v2087_v61 = vpop.f32.mrf.mxu2  ;;  %v2111_v5 = vpop.f32.mrf.mxu3 }
 0x2c6   :  { %v5491_v16 = vpop.f32.mrf.mxu0  ;;  %v5493_v22 = vpop.f32.mrf.mxu1 }
 0x2c7   :  { %v1989_v46 = vadd.f32 %v5493_v22, %v5491_v16 }
 0x2c9   :  { %v2085_v55 = vadd.f32 %v2084_v13, %v1989_v46 }
 0x2cb   :  { %v2109_v56 = vadd.f32 %v2108_v45, %v2085_v55 }
 0x2ce   :  { %v5504_v28 = vpop.f32.mrf.mxu0  ;;  %v5506_v53 = vpop.f32.mrf.mxu1 }
 0x2cf   :  { %v1992_v16 = vadd.f32 %v5506_v53, %v5504_v28 }
 0x2d1   :  { %v2088_v42 = vadd.f32 %v2087_v61, %v1992_v16 }
 0x2d3   :  { %v2112_v31 = vadd.f32 %v2111_v5, %v2088_v42 }
 0x2d6   :  { %v5517_v10 = vpop.f32.mrf.mxu0  ;;  %v5519_v15 = vpop.f32.mrf.mxu1 }
 0x2d7   :  { %v1994_v26 = vadd.f32 %v5519_v15, %v5517_v10 }
 0x2de   :  { %v2248_v51 = vpop.f32.mrf.mxu0  ;;  %v2272_v11 = vpop.f32.mrf.mxu1 }
 0x2df   :  { %v2273_v12 = vadd.f32 %v2272_v11, %v2248_v51  ;;  %v2089_v51 = vpop.f32.mrf.mxu2 }
 0x2e0   :  { %v2090_v11 = vadd.f32 %v2089_v51, %v1994_v26  ;;  %v2659_v51 = vld [vmem:[%s5674_s1 + $0x8] sm:$0xff] }
 0x2e1   :  { %v2287_v19 = vadd.f32 %v2273_v12, %v2102_v2  ;;  %v2113_v2 = vpop.f32.mrf.mxu3 }
 0x2e2   :  { %v2114_v24 = vadd.f32 %v2113_v2, %v2090_v11 }
 0x2e3   :  { %v2297_v37 = vadd.f32 %v5533_v18, %v2287_v19 }
 0x2e5   :  { %v2303_v29 = vmax.f32 %v2297_v37, 0.0 }
 0x2e6   :  { %v2250_v43 = vpop.f32.mrf.mxu0  ;;  %v2274_v21 = vpop.f32.mrf.mxu1 }
 0x2e7   :  { %v2309_v0 = vpack.c.bf16 %v2303_v29, %v2303_v29  ;;  %v2275_v58 = vadd.f32 %v2274_v21, %v2250_v43 }
 0x2e9   :  { %2316 = vst.msk [vmem:[#allocation4] sm:$0xf] %vm2315_vm7, %v2309_v0  ;;  %v2288_v6 = vadd.f32 %v2275_v58, %v2104_v25 }
 0x2eb   :  { %v2298_v54 = vadd.f32 %v5533_v18, %v2288_v6 }
 0x2ed   :  { %v2304_v35 = vmax.f32 %v2298_v54, 0.0 }
 0x2ee   :  { %v2253_v4 = vpop.f32.mrf.mxu0  ;;  %v2277_v32 = vpop.f32.mrf.mxu1 }
 0x2ef   :  { %v2310_v39 = vpack.c.bf16 %v2304_v35, %v2304_v35  ;;  %v2278_v59 = vadd.f32 %v2277_v32, %v2253_v4 }
 0x2f1   :  { %2317 = vst.msk [vmem:[#allocation4 + $0x4] sm:$0xf] %vm2315_vm7, %v2310_v39  ;;  %v2289_v52 = vadd.f32 %v2278_v59, %v2107_v33  ;;  %v4162_v33 = vld [vmem:[%s5668_s12] ss:$0 sm:$0xff] }
 0x2f3   :  { %v2299_v17 = vadd.f32 %v5533_v18, %v2289_v52 }
 0x2f5   :  { %v2305_v36 = vmax.f32 %v2299_v17, 0.0 }
 0x2f6   :  { %v2255_v48 = vpop.f32.mrf.mxu0  ;;  %v2279_v49 = vpop.f32.mrf.mxu1 }
 0x2f7   :  { %v2311_v22 = vpack.c.bf16 %v2305_v36, %v2305_v36  ;;  %v2280_v34 = vadd.f32 %v2279_v49, %v2255_v48  ;;  %v4169_v36 = vpop.eup %4168 }
 0x2f8   :  { %v4125_v38 = vld [vmem:[#allocation4] sm:$0xff]  ;;  %v2595_v48 = vmul.f32 32.0, %v4169_v36  ;;  %vm2599_vm8 = vweird.f32 %v4169_v36 }
 0x2f9   :  { %2318 = vst.msk [vmem:[#allocation4 + $0x8] sm:$0xf] %vm2315_vm7, %v2311_v22  ;;  %v2290_v14 = vadd.f32 %v2280_v34, %v2109_v56  ;;  %3830 = vmatmul.msk.bf16.vlgmr.msrb.gmra.mxu3 %vm899_vm3, %v4125_v38 }
 0x2fa   :  { %v2596_v49 = vsub.f32 1.0, %v2595_v48 }
 0x2fb   :  { %v2300_v57 = vadd.f32 %v5533_v18, %v2290_v14 }
 0x2fc   :  { %v2597_v16 = vmul.f32 %v4169_v36, %v2596_v49 }
 0x2fd   :  { %v2306_v28 = vmax.f32 %v2300_v57, 0.0 }
 0x2fe   :  { %v2258_v53 = vpop.f32.mrf.mxu0  ;;  %v2282_v20 = vpop.f32.mrf.mxu1  ;;  %v2598_v22 = vadd.f32 %v4169_v36, %v2597_v16 }
 0x2ff   :  { %v2312_v27 = vpack.c.bf16 %v2306_v28, %v2306_v28  ;;  %v2283_v9 = vadd.f32 %v2282_v20, %v2258_v53 }
 0x300   :  { %v2600_v56 = vsel %vm2599_vm8, %v4169_v36, %v2598_v22 }
 0x301   :  { %2319 = vst.msk [vmem:[#allocation4 + $0xc] sm:$0xf] %vm2315_vm7, %v2312_v27  ;;  %v2291_v63 = vadd.f32 %v2283_v9, %v2112_v31  ;;  %v4150_v31 = vld [vmem:[%s5672_s16] sm:$0xff]  ;;  %v4149_v9 = vld [vmem:[%s5673_s15 + $0x8] sm:$0xff] }
 0x302   :  { %2680 = vmatpush.bf16.msrb.mxu3 %v4150_v31 }
 0x303   :  { %v2301_v23 = vadd.f32 %v5533_v18, %v2291_v63  ;;  %v2658_v63 = vld [vmem:[%s5674_s1] sm:$0xff] }
 0x304   :  { %v2660_v11 = vpack.c.bf16 %v2659_v51, %v2658_v63 }
 0x305   :  { %v2307_v12 = vmax.f32 %v2301_v23, 0.0  ;;  %v4148_v23 = vld [vmem:[%s5673_s15] sm:$0xff] }
 0x306   :  { %v2260_v19 = vpop.f32.mrf.mxu0  ;;  %v2284_v30 = vpop.f32.mrf.mxu1 }
 0x307   :  { %v2313_v41 = vpack.c.bf16 %v2307_v12, %v2307_v12  ;;  %v2285_v37 = vadd.f32 %v2284_v30, %v2260_v19 }
 0x308   :  { %v4132_v29 = vld [vmem:[#allocation4 + $0x8] sm:$0xff] }
 0x309   :  { %2320 = vst.msk [vmem:[#allocation4 + $0x10] sm:$0xf] %vm2315_vm7, %v2313_v41  ;;  %v2292_v10 = vadd.f32 %v2285_v37, %v2114_v24  ;;  %3801 = vmatmul.msk.bf16.vlgmr.msrb.gmra.mxu2 %vm899_vm3, %v4132_v29  ;;  %v4154_v37 = vld [vmem:[%s5675_s18 + $0x18] sm:$0xff] }
 0x30a   :  { %2708 = vmatpush.bf16.msrb.mxu2 %v4149_v9  ;;  %2769 = vmatpush.bf16.msra.mxu0 %v4154_v37 }
 0x30b   :  { %v2302_v15 = vadd.f32 %v5533_v18, %v2292_v10  ;;  %v4153_v10 = vld [vmem:[%s5675_s18 + $0x10] sm:$0xff] }
 0x30d   :  { %v2308_v44 = vmax.f32 %v2302_v15, 0.0 }
 0x30e   :  { %2709 = vmatpush.bf16.msrb.mxu2 %v4148_v23  ;;  %2770 = vmatpush.bf16.msra.mxu0 %v4153_v10 }
 0x30f   :  { %v2314_v43 = vpack.c.bf16 %v2308_v44, %v2308_v44 }
 0x311   :  { %2321 = vst.msk [vmem:[#allocation4 + $0x14] sm:$0xf] %vm2315_vm7, %v2314_v43 }
 0x318   :  { %v4139_v21 = vld [vmem:[#allocation4 + $0x10] sm:$0xff] }
 0x319   :  { %3871 = vmatmul.msk.bf16.vlgmr.msra.gmra.mxu2 %vm899_vm3, %v4139_v21 }
 0x37c   :  { %v2462_v18 = vpop.f32.mrf.mxu3 }
 0x384   :  { %v2464_v7 = vpop.f32.mrf.mxu3 }
 0x38c   :  { %v2404_v40 = vpop.f32.mrf.mxu2 }
 0x38d   :  { %v2463_v58 = vadd.f32 %v2462_v18, %v2404_v40  ;;  %v4163_v40 = vld [vmem:[%s5670_s13] ss:$0 sm:$0xff] }
 0x394   :  { %v2406_v0 = vpop.f32.mrf.mxu2 }
 0x395   :  { %v2465_v54 = vadd.f32 %v2464_v7, %v2406_v0 }
 0x39c   :  { %v2535_v25 = vpop.f32.mrf.mxu2 }
 0x39d   :  { %v2540_v6 = vadd.f32 %v2535_v25, %v2463_v58  ;;  %v4164_v58 = vld [vmem:[%s5671_s14] ss:$0 sm:$0xff] }
 0x39f   :  { %v2546_v35 = vadd.f32 %v4161_v62, %v2540_v6 }
 0x3a1   :  { %v2548_v60 = vmax.f32 %v2546_v35, 0.0 }
 0x3a4   :  { %v2537_v13 = vpop.f32.mrf.mxu2 }
 0x3a5   :  { %v2541_v4 = vadd.f32 %v2537_v13, %v2465_v54 }
 0x3a7   :  { %v2547_v32 = vadd.f32 %v4161_v62, %v2541_v4 }
 0x3a9   :  { %v2549_v46 = vmax.f32 %v2547_v32, 0.0 }
 0x3ab   :  { %v2550_v39 = vpack.c.bf16 %v2549_v46, %v2548_v60 }
 0x3ad   :  { %3880 = vmatmul.msk.bf16.vlgmr.msra.gmra.mxu3 %vm1938_vm6, %v2550_v39  ;;  %v4152_v39 = vld [vmem:[%s5675_s18 + $0x8] sm:$0xff] }
 0x3ae   :  { %2771 = vmatpush.bf16.msra.mxu0 %v4152_v39 }
 0x3bd   :  { %3885 = vmatmul.msk.bf16.vlgmr.msrb.gmra.mxu3 %vm2669_vm9, %v2660_v11 }
 0x430   :  { %v2583_v59 = vpop.f32.mrf.mxu3 }
 0x431   :  { %v2584_v45 = vadd.f32 %v4162_v33, %v2583_v59  ;;  %v4158_v59 = vld [vmem:[%s5678_s20 + $0x18] sm:$0xff] }
 0x432   :  { %2825 = vmatpush.bf16.msra.mxu1 %v4158_v59 }
 0x433   :  { %v2588_v52 = vsel %vm1938_vm6, %v2584_v45, 0.0 }
 0x434   :  { %2589 = vadd.xlane.f32.xlu0 %v2588_v52  ;;  %v4156_v52 = vld [vmem:[%s5678_s20 + $0x8] sm:$0xff] }
 0x438   :  { %v2585_v1 = vpop.f32.mrf.mxu3 }
 0x439   :  { %v2586_v55 = vadd.f32 %v4162_v33, %v2585_v1  ;;  %v4151_v33 = vld [vmem:[%s5675_s18] sm:$0xff] }
 0x43a   :  { %2772 = vmatpush.bf16.msra.mxu0 %v4151_v33 }
 0x43b   :  { %v2591_v17 = vsel %vm1938_vm6, %v2586_v55, 0.0 }
 0x43c   :  { %2592 = vadd.xlane.f32.xlu0 %v2591_v17 }
 0x440   :  { %v2682_v1 = vpop.f32.mrf.mxu3 }
 0x448   :  { %v2684_v36 = vpop.f32.mrf.mxu3 }
 0x4a7   :  { %v2590_v34 = vpop.xlane.xlu0 %2589 }
 0x4a8   :  { %v2601_v61 = vmul.f32 %v2600_v56, %v2590_v34 }
 0x4aa   :  { %v2603_v38 = vsub.f32 %v2584_v45, %v2601_v61  ;;  %v4157_v45 = vld [vmem:[%s5678_s20 + $0x10] sm:$0xff] }
 0x4ab   :  { %2826 = vmatpush.bf16.msra.mxu1 %v4157_v45 }
 0x4ac   :  { %v2605_v50 = vmul.f32 %v2603_v38, %v2603_v38 }
 0x4ae   :  { %v2607_v14 = vsel %vm1938_vm6, %v2605_v50, 0.0 }
 0x4af   :  { %2608 = vadd.xlane.f32.xlu1 %v2607_v14  ;;  %v2593_v5 = vpop.xlane.xlu0 %2592  ;;  %2827 = vmatpush.bf16.msra.mxu1 %v4156_v52  ;;  %v4166_v14 = vld [vmem:[%s5677_s19] ss:$0 sm:$0xff] }
 0x4b0   :  { %v2602_v42 = vmul.f32 %v2600_v56, %v2593_v5 }
 0x4b2   :  { %v2604_v57 = vsub.f32 %v2586_v55, %v2602_v42 }
 0x4b4   :  { %v2606_v28 = vmul.f32 %v2604_v57, %v2604_v57 }
 0x4b6   :  { %v2610_v53 = vsel %vm1938_vm6, %v2606_v28, 0.0 }
 0x4b7   :  { %2611 = vadd.xlane.f32.xlu1 %v2610_v53 }
 0x522   :  { %v2609_v20 = vpop.xlane.xlu1 %2608 }
 0x523   :  { %v2613_v26 = vmul.f32 %v2609_v20, %v2600_v56 }
 0x525   :  { %v2615_v27 = vadd.f32 1e-05, %v2613_v26  ;;  %v4167_v26 = vld [vmem:[%s5679_s21] ss:$0 sm:$0xff] }
 0x527   :  { %4170 = vrsqrt.f32 %v2615_v27  ;;  %vm2623_vm11 = vweird.f32 %v2615_v27 }
 0x52a   :  { %v2612_v2 = vpop.xlane.xlu1 %2611 }
 0x52b   :  { %v2614_v12 = vmul.f32 %v2612_v2, %v2600_v56 }
 0x52d   :  { %v4171_v19 = vpop.eup %4170  ;;  %v2616_v30 = vadd.f32 1e-05, %v2614_v12 }
 0x52e   :  { %v2618_v41 = vmul.f32 %v4171_v19, %v2615_v27  ;;  %vm2624_vm10 = vweird.f32 %v4171_v19 }
 0x52f   :  { %4172 = vrsqrt.f32 %v2616_v30  ;;  %vm2625_vm12 = vmor %vm2623_vm11, %vm2624_vm10  ;;  %vm2633_vm14 = vweird.f32 %v2616_v30 }
 0x530   :  { %v2619_v24 = vmul.f32 %v4171_v19, %v2618_v41 }
 0x532   :  { %v2620_v29 = vmul.f32 0.5, %v2619_v24 }
 0x534   :  { %v2621_v15 = vsub.f32 1.5, %v2620_v29 }
 0x535   :  { %v4173_v44 = vpop.eup %4172 }
 0x536   :  { %v2622_v43 = vmul.f32 %v4171_v19, %v2621_v15  ;;  %v2628_v21 = vmul.f32 %v4173_v44, %v2616_v30  ;;  %vm2634_vm13 = vweird.f32 %v4173_v44 }
 0x537   :  { %vm2635_vm15 = vmor %vm2633_vm14, %vm2634_vm13 }
 0x538   :  { %v2626_v3 = vsel %vm2625_vm12, %v4171_v19, %v2622_v43  ;;  %v2629_v47 = vmul.f32 %v4173_v44, %v2628_v21 }
 0x539   :  { %v2637_v0 = vmul.f32 %v2626_v3, %v2603_v38  ;;  %v4155_v38 = vld [vmem:[%s5678_s20] sm:$0xff] }
 0x53a   :  { %v2630_v18 = vmul.f32 0.5, %v2629_v47  ;;  %2828 = vmatpush.bf16.msra.mxu1 %v4155_v38 }
 0x53b   :  { %v2643_v6 = vmul.f32 %v4163_v40, %v2637_v0 }
 0x53c   :  { %v2631_v25 = vsub.f32 1.5, %v2630_v18 }
 0x53d   :  { %v2649_v13 = vadd.f32 %v4164_v58, %v2643_v6 }
 0x53e   :  { %v2632_v62 = vmul.f32 %v4173_v44, %v2631_v25 }
 0x53f   :  { %4174 = vtanh.f32 %v2649_v13 }
 0x540   :  { %v2636_v7 = vsel %vm2635_vm15, %v4173_v44, %v2632_v62 }
 0x541   :  { %v2638_v54 = vmul.f32 %v2636_v7, %v2604_v57 }
 0x543   :  { %v2644_v35 = vmul.f32 %v4163_v40, %v2638_v54 }
 0x545   :  { %v2650_v4 = vadd.f32 %v4164_v58, %v2644_v35  ;;  %v4175_v32 = vpop.eup %4174 }
 0x547   :  { %4176 = vtanh.f32 %v2650_v4 }
 0x54d   :  { %v4177_v60 = vpop.eup %4176 }
 0x54e   :  { %v2653_v46 = vpack.c.bf16 %v4177_v60, %v4175_v32 }
 0x550   :  { %3894 = vmatmul.msk.bf16.vlgmr.msrb.gmra.mxu2 %vm1938_vm6, %v2653_v46 }
 0x5d3   :  { %v2711_v55 = vpop.f32.mrf.mxu2 }
 0x5d4   :  { %v2712_v17 = vadd.f32 %v2711_v55, %v2682_v1 }
 0x5d6   :  { %v2720_v49 = vadd.f32 %v4165_v8, %v2712_v17 }
 0x5d8   :  { %v2722_v56 = vmax.f32 %v2720_v49, 0.0 }
 0x5db   :  { %v2713_v48 = vpop.f32.mrf.mxu2 }
 0x5dc   :  { %v2714_v16 = vadd.f32 %v2713_v48, %v2684_v36 }
 0x5de   :  { %v2721_v22 = vadd.f32 %v4165_v8, %v2714_v16 }
 0x5e0   :  { %v2723_v34 = vmax.f32 %v2721_v22, 0.0 }
 0x5e2   :  { %v2724_v61 = vpack.c.bf16 %v2723_v34, %v2722_v56 }
 0x5e4   :  { %3911 = vmatmul.msk.bf16.vlgmr.msra.gmra.mxu0 %vm2761_vm0, %v2724_v61 }
 0x661   :  { %v2774_v50 = vpop.f32.mrf.mxu0 }
 0x662   :  { %v2775_v5 = vadd.f32 %v4166_v14, %v2774_v50 }
 0x664   :  { %v2779_v28 = vmax.f32 %v2775_v5, 0.0 }
 0x669   :  { %v2776_v42 = vpop.f32.mrf.mxu0 }
 0x66a   :  { %v2777_v57 = vadd.f32 %v4166_v14, %v2776_v42 }
 0x66c   :  { %v2780_v53 = vmax.f32 %v2777_v57, 0.0 }
 0x66e   :  { %v2781_v20 = vpack.c.bf16 %v2780_v53, %v2779_v28 }
 0x670   :  { %3928 = vmatmul.msk.bf16.vlgmr.msra.gmra.mxu1 %vm2761_vm0, %v2781_v20 }
 0x6ed   :  { %v2830_v27 = vpop.f32.mrf.mxu1 }
 0x6ee   :  { %v2831_v31 = vadd.f32 %v4167_v26, %v2830_v27 }
 0x6f0   :  { %2836 = vst.msk [vmem:[%s5680_s22] sm:$0xff] %vm2835_vm1, %v2831_v31 }
 0x6f5   :  { %v2832_v9 = vpop.f32.mrf.mxu1 }
 0x6f6   :  { %v2833_v63 = vadd.f32 %v4167_v26, %v2832_v9 }
 0x6f8   :  { %2837 = vst.msk [vmem:[%s5680_s22 + $0x8] sm:$0xff] %vm2835_vm1, %v2833_v63 }

</bundles_post_ra>
